<compile_context>
chip_gen: v7x
topology: tpu7x:2x2x1
jax: 0.10.0
libtpu: 0.0.40
codegen_flags: <defaults>
</compile_context>

<pallas_src>
import jax
import jax.numpy as jnp
from jax import lax
from jax.experimental import pallas as pl
from jax.experimental.pallas import tpu as pltpu

OUT = 96         # RandomResizedCrop(size=(96, 96))
OUT_PAD = 128    # lane-padded output width (last 32 lanes are zero / discarded)


def _fmod(x, m):
    return x - m * jnp.floor(x / m)


def _color_jitter(r, g, b, bright, cont, sat, hue):
    """ColorJitter (fixed order brightness, contrast, saturation, hue) on (96,128) tiles."""
    clip01 = lambda v: jnp.clip(v, 0.0, 1.0)

    # TODO(synk): kornia applies the four jitter ops in a random per-call order.
    # brightness
    r, g, b = clip01(r * bright), clip01(g * bright), clip01(b * bright)

    # contrast: blend with the scalar mean of the grayscale image.
    # (padded lanes 96..127 are exactly 0 here, so sum/ (96*96) is the true mean)
    mean_gray = jnp.sum(0.299 * r + 0.587 * g + 0.114 * b) * (1.0 / float(OUT * OUT))
    r = clip01(cont * r + (1.0 - cont) * mean_gray)
    g = clip01(cont * g + (1.0 - cont) * mean_gray)
    b = clip01(cont * b + (1.0 - cont) * mean_gray)

    # saturation: blend with per-pixel grayscale
    gray = 0.299 * r + 0.587 * g + 0.114 * b
    r = clip01(sat * r + (1.0 - sat) * gray)
    g = clip01(sat * g + (1.0 - sat) * gray)
    b = clip01(sat * b + (1.0 - sat) * gray)

    # hue: RGB -> HSV -> shift -> RGB, compact formulation (low vreg pressure)
    maxc = jnp.maximum(jnp.maximum(r, g), b)
    minc = jnp.minimum(jnp.minimum(r, g), b)
    delta = maxc - minc
    nonzero = delta > 0.0
    inv_delta = 1.0 / jnp.where(nonzero, delta, 1.0)
    h6 = jnp.where(maxc == r, _fmod((g - b) * inv_delta, 6.0),
                   jnp.where(maxc == g, (b - r) * inv_delta + 2.0,
                             (r - g) * inv_delta + 4.0))
    h6 = jnp.where(nonzero, h6, 0.0)
    h6 = _fmod(h6 + 6.0 * hue, 6.0)                    # hue shift in sector units
    s_hsv = jnp.where(maxc > 0.0, delta / jnp.where(maxc > 0.0, maxc, 1.0), 0.0)
    vs = maxc * s_hsv

    def chan(n):
        k = _fmod(n + h6, 6.0)
        return maxc - vs * jnp.clip(jnp.minimum(k, 4.0 - k), 0.0, 1.0)

    return chan(5.0), chan(3.0), chan(1.0)


def _kornia_da_kernel(params_ref, img_ref, out_ref):
    # params_ref: SMEM (NB, 8)  -> [bright, cont, sat, hue, y_start, y_step, x_start, x_step]
    # img_ref:    VMEM (NB, 3*H, W)   channels stacked along rows (free reshape of NCHW)
    # out_ref:    VMEM (NB, 3*OUT, OUT_PAD)
    nb, chw, w = img_ref.shape
    h = chw // 3

    def body(n, carry):
        bright = params_ref[n, 0]
        cont = params_ref[n, 1]
        sat = params_ref[n, 2]
        hue = params_ref[n, 3]
        y_start = params_ref[n, 4]
        y_step = params_ref[n, 5]
        x_start = params_ref[n, 6]
        x_step = params_ref[n, 7]

        # --- horizontal resample matrix (flip already folded into x_start/x_step) ---
        oi = lax.broadcasted_iota(jnp.int32, (w, OUT_PAD), 1).astype(jnp.float32)
        si = lax.broadcasted_iota(jnp.int32, (w, OUT_PAD), 0).astype(jnp.float32)
        xc = jnp.clip(x_start + oi * x_step, 0.0, float(w - 1))
        rxt = jnp.maximum(0.0, 1.0 - jnp.abs(xc - si))          # tent == bilinear weights
        rxt = jnp.where(oi < float(OUT), rxt, 0.0)              # zero-pad lanes 96..127

        # --- horizontal pass: one MXU dot over all 3 channels at once ---
        s1 = jnp.dot(img_ref[n], rxt, preferred_element_type=jnp.float32)  # (3H, 128)

        # --- vertical resample matrix ---
        oy = lax.broadcasted_iota(jnp.int32, (OUT, h), 0).astype(jnp.float32)
        sy = lax.broadcasted_iota(jnp.int32, (OUT, h), 1).astype(jnp.float32)
        yc = jnp.clip(y_start + oy * y_step, 0.0, float(h - 1))
        ry = jnp.maximum(0.0, 1.0 - jnp.abs(yc - sy))           # (96, H)

        r = jnp.dot(ry, s1[0:h], preferred_element_type=jnp.float32)        # (96, 128)
        g = jnp.dot(ry, s1[h:2 * h], preferred_element_type=jnp.float32)
        b = jnp.dot(ry, s1[2 * h:3 * h], preferred_element_type=jnp.float32)

        r, g, b = _color_jitter(r, g, b, bright, cont, sat, hue)

        # --- Normalize((0.5,), 0.5) and lane-dense store ---
        out_ref[n] = jnp.concatenate(
            [(r - 0.5) * 2.0, (g - 0.5) * 2.0, (b - 0.5) * 2.0], axis=0)    # (288, 128)
        return carry

    lax.fori_loop(0, nb, body, 0)


def _choose_block(batch, h, w, budget_bytes=8 << 20):
    """Largest divisor of `batch` whose double-buffered in+out footprint fits the budget."""
    per_img = 4 * (3 * h * w + 3 * OUT * OUT_PAD)   # f32 input + padded output
    cap = max(1, budget_bytes // (2 * per_img))      # x2 for double buffering
    cap = int(min(cap, 8, batch))
    nb = 1
    for d in range(1, cap + 1):
        if batch % d == 0:
            nb = d
    return nb


def kornia_da(x, key):
    """x: (B, 3, H, W) float32 in [0, 1]  ->  (B, 3, 96, 96) float32."""
    B, C, H, W = x.shape
    assert C == 3, "ColorJitter path assumes RGB input"
    keys = jax.random.split(key, 8)

    # --- RandomHorizontalFlip(p=0.5) ---
    flip = jax.random.bernoulli(keys[0], 0.5, (B,))

    # --- RandomResizedCrop box sampling ---
    # TODO(synk): kornia uses rejection sampling with scale=(0.08, 1.0); simplified here.
    scale = jax.random.uniform(keys[1], (B,), minval=0.5, maxval=1.0)
    ratio = jax.random.uniform(keys[2], (B,), minval=3.0 / 4.0, maxval=4.0 / 3.0)
    area = scale * float(H * W)
    cw = jnp.clip(jnp.sqrt(area * ratio), 8.0, float(W))
    ch = jnp.clip(jnp.sqrt(area / ratio), 8.0, float(H))
    x0 = jax.random.uniform(keys[3], (B,)) * (W - cw)
    y0 = jax.random.uniform(keys[4], (B,)) * (H - ch)

    # align_corners-style source-coordinate maps; flip folded into (x_start, x_step).
    y_step = (ch - 1.0) / float(OUT - 1)
    x_step = (cw - 1.0) / float(OUT - 1)
    x_start = jnp.where(flip, (float(W) - 1.0) - x0, x0)
    x_step = jnp.where(flip, -x_step, x_step)

    # --- ColorJitter(brightness=0.5, contrast=0.5, saturation=0.5, hue=0.1, p=0.8) ---
    apply = jax.random.bernoulli(keys[5], 0.8, (B,))
    fac = jax.random.uniform(keys[6], (B, 3), minval=0.5, maxval=1.5)
    hue = jax.random.uniform(keys[7], (B,), minval=-0.1, maxval=0.1)
    bright = jnp.where(apply, fac[:, 0], 1.0)
    cont = jnp.where(apply, fac[:, 1], 1.0)
    sat = jnp.where(apply, fac[:, 2], 1.0)
    hue = jnp.where(apply, hue, 0.0)

    params = jnp.stack(
        [bright, cont, sat, hue, y0, y_step, x_start, x_step], axis=1
    ).astype(jnp.float32)                                                  # (B, 8)

    nb = _choose_block(B, H, W)
    x_flat = x.astype(jnp.float32).reshape(B, C * H, W)   # free reshape, channels along rows

    out_padded = pl.pallas_call(
        _kornia_da_kernel,
        out_shape=jax.ShapeDtypeStruct((B, C * OUT, OUT_PAD), jnp.float32),
        grid=(B // nb,),
        in_specs=[
            pl.BlockSpec((nb, 8), lambda i: (i, 0),
                         memory_space=pltpu.MemorySpace.SMEM),
            pl.BlockSpec((nb, C * H, W), lambda i: (i, 0, 0)),
        ],
        out_specs=pl.BlockSpec((nb, C * OUT, OUT_PAD), lambda i: (i, 0, 0)),
        compiler_params=pltpu.CompilerParams(
            dimension_semantics=("parallel",),
            vmem_limit_bytes=32 * 1024 * 1024,
        ),
    )(params, x_flat)

    # drop the 32 padding lanes, recover NCHW
    return out_padded.reshape(B, C, OUT, OUT_PAD)[..., :OUT]


if __name__ == "__main__":
    key = jax.random.PRNGKey(0)
    k_x, k_aug = jax.random.split(key)
    x = jax.random.uniform(k_x, (2, 3, 128, 128), dtype=jnp.float32)   # images in [0, 1]
    y = kornia_da(x, k_aug)
    jax.block_until_ready(y)
    assert y.shape == (2, 3, 96, 96) and y.dtype == jnp.float32
    assert bool(jnp.all(jnp.isfinite(y)))
    print("KERNEL_OK")
</pallas_src>

<mosaic_0001>
module attributes {stable_mosaic.version = 11 : i64} {
  func.func @_kornia_da_kernel(%arg0: i32, %arg1: memref<2x8xf32, #tpu.memory_space<smem>>, %arg2: memref<2x384x128xf32, #tpu.memory_space<vmem>>, %arg3: memref<2x288x128xf32, #tpu.memory_space<vmem>>) attributes {dimension_semantics = [#tpu.dimension_semantics<parallel>], iteration_bounds = array<i64: 1>, scalar_prefetch = 0 : i64, scratch_operands = 0 : i64, tpu.core_type = #tpu.core_type<tc>, window_params = [{transform_indices = @transform_0, window_bounds = array<i64: 2, 8>}, {transform_indices = @transform_1, window_bounds = array<i64: 2, 384, 128>}, {transform_indices = @transform_2, window_bounds = array<i64: 2, 288, 128>}]} {
    %c0_i32 = arith.constant 0 : i32
    %c2_i32 = arith.constant 2 : i32
    %0 = arith.addi %c0_i32, %c2_i32 : i32
    %c1_i32 = arith.constant 1 : i32
    scf.for %arg4 = %c0_i32 to %0 step %c1_i32  : i32 {
      %1 = arith.index_cast %arg4 : i32 to index
      %c0 = arith.constant 0 : index
      %2 = memref.load %arg1[%1, %c0] : memref<2x8xf32, #tpu.memory_space<smem>>
      %3 = arith.index_cast %arg4 : i32 to index
      %c1 = arith.constant 1 : index
      %4 = memref.load %arg1[%3, %c1] : memref<2x8xf32, #tpu.memory_space<smem>>
      %5 = arith.index_cast %arg4 : i32 to index
      %c2 = arith.constant 2 : index
      %6 = memref.load %arg1[%5, %c2] : memref<2x8xf32, #tpu.memory_space<smem>>
      %7 = arith.index_cast %arg4 : i32 to index
      %c3 = arith.constant 3 : index
      %8 = memref.load %arg1[%7, %c3] : memref<2x8xf32, #tpu.memory_space<smem>>
      %9 = arith.index_cast %arg4 : i32 to index
      %c4 = arith.constant 4 : index
      %10 = memref.load %arg1[%9, %c4] : memref<2x8xf32, #tpu.memory_space<smem>>
      %11 = arith.index_cast %arg4 : i32 to index
      %c5 = arith.constant 5 : index
      %12 = memref.load %arg1[%11, %c5] : memref<2x8xf32, #tpu.memory_space<smem>>
      %13 = arith.index_cast %arg4 : i32 to index
      %c6 = arith.constant 6 : index
      %14 = memref.load %arg1[%13, %c6] : memref<2x8xf32, #tpu.memory_space<smem>>
      %15 = arith.index_cast %arg4 : i32 to index
      %c7 = arith.constant 7 : index
      %16 = memref.load %arg1[%15, %c7] : memref<2x8xf32, #tpu.memory_space<smem>>
      %17 = tpu.iota {dimensions = array<i32: 1>} : vector<128x128xi32>
      %18 = arith.sitofp %17 : vector<128x128xi32> to vector<128x128xf32>
      %19 = tpu.iota {dimensions = array<i32: 0>} : vector<128x128xi32>
      %20 = arith.sitofp %19 : vector<128x128xi32> to vector<128x128xf32>
      %21 = vector.broadcast %16 : f32 to vector<128x128xf32>
      %22 = arith.mulf %18, %21 : vector<128x128xf32>
      %23 = vector.broadcast %14 : f32 to vector<128x128xf32>
      %24 = arith.addf %23, %22 : vector<128x128xf32>
      %cst = arith.constant 0.000000e+00 : f32
      %cst_1 = arith.constant 1.270000e+02 : f32
      %25 = vector.broadcast %cst : f32 to vector<128x128xf32>
      %26 = arith.maximumf %25, %24 : vector<128x128xf32>
      %27 = vector.broadcast %cst_1 : f32 to vector<128x128xf32>
      %28 = arith.minimumf %27, %26 : vector<128x128xf32>
      %29 = arith.subf %28, %20 : vector<128x128xf32>
      %30 = math.absf %29 : vector<128x128xf32>
      %cst_2 = arith.constant 1.000000e+00 : f32
      %31 = vector.broadcast %cst_2 : f32 to vector<128x128xf32>
      %32 = arith.subf %31, %30 : vector<128x128xf32>
      %cst_3 = arith.constant 0.000000e+00 : f32
      %33 = vector.broadcast %cst_3 : f32 to vector<128x128xf32>
      %34 = arith.maximumf %33, %32 : vector<128x128xf32>
      %cst_4 = arith.constant 9.600000e+01 : f32
      %35 = vector.broadcast %cst_4 : f32 to vector<128x128xf32>
      %36 = arith.cmpf olt, %18, %35 : vector<128x128xf32>
      %cst_5 = arith.constant 0.000000e+00 : f32
      %37 = vector.broadcast %cst_5 : f32 to vector<128x128xf32>
      %38 = arith.select %36, %34, %37 : vector<128x128xi1>, vector<128x128xf32>
      %39 = arith.index_cast %arg4 : i32 to index
      %c0_6 = arith.constant 0 : index
      %c0_7 = arith.constant 0 : index
      %40 = vector.load %arg2[%39, %c0_6, %c0_7] : memref<2x384x128xf32, #tpu.memory_space<vmem>>, vector<1x384x128xf32>
      %41 = vector.shape_cast %40 : vector<1x384x128xf32> to vector<384x128xf32>
      %cst_8 = arith.constant dense<0.000000e+00> : vector<384x128xf32>
      %42 = tpu.matmul %41, %38, %cst_8 {dimension_numbers = #tpu.dot_dimension_numbers<[1], [0], [0], [1], [0, 0, 1, 1], [], []>} : vector<384x128xf32>, vector<128x128xf32>, vector<384x128xf32> -> vector<384x128xf32>
      %43 = tpu.iota {dimensions = array<i32: 0>} : vector<96x128xi32>
      %44 = arith.sitofp %43 : vector<96x128xi32> to vector<96x128xf32>
      %45 = tpu.iota {dimensions = array<i32: 1>} : vector<96x128xi32>
      %46 = arith.sitofp %45 : vector<96x128xi32> to vector<96x128xf32>
      %47 = vector.broadcast %12 : f32 to vector<96x128xf32>
      %48 = arith.mulf %44, %47 : vector<96x128xf32>
      %49 = vector.broadcast %10 : f32 to vector<96x128xf32>
      %50 = arith.addf %49, %48 : vector<96x128xf32>
      %cst_9 = arith.constant 0.000000e+00 : f32
      %cst_10 = arith.constant 1.270000e+02 : f32
      %51 = vector.broadcast %cst_9 : f32 to vector<96x128xf32>
      %52 = arith.maximumf %51, %50 : vector<96x128xf32>
      %53 = vector.broadcast %cst_10 : f32 to vector<96x128xf32>
      %54 = arith.minimumf %53, %52 : vector<96x128xf32>
      %55 = arith.subf %54, %46 : vector<96x128xf32>
      %56 = math.absf %55 : vector<96x128xf32>
      %cst_11 = arith.constant 1.000000e+00 : f32
      %57 = vector.broadcast %cst_11 : f32 to vector<96x128xf32>
      %58 = arith.subf %57, %56 : vector<96x128xf32>
      %cst_12 = arith.constant 0.000000e+00 : f32
      %59 = vector.broadcast %cst_12 : f32 to vector<96x128xf32>
      %60 = arith.maximumf %59, %58 : vector<96x128xf32>
      %61 = vector.extract_strided_slice %42 {offsets = [0, 0], sizes = [128, 128], strides = [1, 1]} : vector<384x128xf32> to vector<128x128xf32>
      %cst_13 = arith.constant dense<0.000000e+00> : vector<96x128xf32>
      %62 = tpu.matmul %60, %61, %cst_13 {dimension_numbers = #tpu.dot_dimension_numbers<[1], [0], [0], [1], [0, 0, 1, 1], [], []>} : vector<96x128xf32>, vector<128x128xf32>, vector<96x128xf32> -> vector<96x128xf32>
      %63 = vector.extract_strided_slice %42 {offsets = [128, 0], sizes = [128, 128], strides = [1, 1]} : vector<384x128xf32> to vector<128x128xf32>
      %cst_14 = arith.constant dense<0.000000e+00> : vector<96x128xf32>
      %64 = tpu.matmul %60, %63, %cst_14 {dimension_numbers = #tpu.dot_dimension_numbers<[1], [0], [0], [1], [0, 0, 1, 1], [], []>} : vector<96x128xf32>, vector<128x128xf32>, vector<96x128xf32> -> vector<96x128xf32>
      %65 = vector.extract_strided_slice %42 {offsets = [256, 0], sizes = [128, 128], strides = [1, 1]} : vector<384x128xf32> to vector<128x128xf32>
      %cst_15 = arith.constant dense<0.000000e+00> : vector<96x128xf32>
      %66 = tpu.matmul %60, %65, %cst_15 {dimension_numbers = #tpu.dot_dimension_numbers<[1], [0], [0], [1], [0, 0, 1, 1], [], []>} : vector<96x128xf32>, vector<128x128xf32>, vector<96x128xf32> -> vector<96x128xf32>
      %67 = vector.broadcast %2 : f32 to vector<96x128xf32>
      %68 = arith.mulf %62, %67 : vector<96x128xf32>
      %cst_16 = arith.constant 0.000000e+00 : f32
      %cst_17 = arith.constant 1.000000e+00 : f32
      %69 = vector.broadcast %cst_16 : f32 to vector<96x128xf32>
      %70 = arith.maximumf %69, %68 : vector<96x128xf32>
      %71 = vector.broadcast %cst_17 : f32 to vector<96x128xf32>
      %72 = arith.minimumf %71, %70 : vector<96x128xf32>
      %73 = vector.broadcast %2 : f32 to vector<96x128xf32>
      %74 = arith.mulf %64, %73 : vector<96x128xf32>
      %cst_18 = arith.constant 0.000000e+00 : f32
      %cst_19 = arith.constant 1.000000e+00 : f32
      %75 = vector.broadcast %cst_18 : f32 to vector<96x128xf32>
      %76 = arith.maximumf %75, %74 : vector<96x128xf32>
      %77 = vector.broadcast %cst_19 : f32 to vector<96x128xf32>
      %78 = arith.minimumf %77, %76 : vector<96x128xf32>
      %79 = vector.broadcast %2 : f32 to vector<96x128xf32>
      %80 = arith.mulf %66, %79 : vector<96x128xf32>
      %cst_20 = arith.constant 0.000000e+00 : f32
      %cst_21 = arith.constant 1.000000e+00 : f32
      %81 = vector.broadcast %cst_20 : f32 to vector<96x128xf32>
      %82 = arith.maximumf %81, %80 : vector<96x128xf32>
      %83 = vector.broadcast %cst_21 : f32 to vector<96x128xf32>
      %84 = arith.minimumf %83, %82 : vector<96x128xf32>
      %cst_22 = arith.constant 2.990000e-01 : f32
      %85 = vector.broadcast %cst_22 : f32 to vector<96x128xf32>
      %86 = arith.mulf %85, %72 : vector<96x128xf32>
      %cst_23 = arith.constant 5.870000e-01 : f32
      %87 = vector.broadcast %cst_23 : f32 to vector<96x128xf32>
      %88 = arith.mulf %87, %78 : vector<96x128xf32>
      %89 = arith.addf %86, %88 : vector<96x128xf32>
      %cst_24 = arith.constant 1.140000e-01 : f32
      %90 = vector.broadcast %cst_24 : f32 to vector<96x128xf32>
      %91 = arith.mulf %90, %84 : vector<96x128xf32>
      %92 = arith.addf %89, %91 : vector<96x128xf32>
      %93 = vector.shape_cast %92 : vector<96x128xf32> to vector<1x96x128xf32>
      %cst_25 = arith.constant dense<0.000000e+00> : vector<1xf32>
      %94 = vector.multi_reduction <add>, %93, %cst_25 [1, 2] : vector<1x96x128xf32> to vector<1xf32>
      %95 = vector.shape_cast %94 : vector<1xf32> to vector<1x1x1xf32>
      %96 = vector.extract %95[0, 0, 0] : f32 from vector<1x1x1xf32>
      %cst_26 = arith.constant 1.08506945E-4 : f32
      %97 = arith.mulf %96, %cst_26 : f32
      %98 = vector.broadcast %4 : f32 to vector<96x128xf32>
      %99 = arith.mulf %98, %72 : vector<96x128xf32>
      %cst_27 = arith.constant 1.000000e+00 : f32
      %100 = arith.subf %cst_27, %4 : f32
      %101 = arith.mulf %100, %97 : f32
      %102 = vector.broadcast %101 : f32 to vector<96x128xf32>
      %103 = arith.addf %99, %102 : vector<96x128xf32>
      %cst_28 = arith.constant 0.000000e+00 : f32
      %cst_29 = arith.constant 1.000000e+00 : f32
      %104 = vector.broadcast %cst_28 : f32 to vector<96x128xf32>
      %105 = arith.maximumf %104, %103 : vector<96x128xf32>
      %106 = vector.broadcast %cst_29 : f32 to vector<96x128xf32>
      %107 = arith.minimumf %106, %105 : vector<96x128xf32>
      %108 = vector.broadcast %4 : f32 to vector<96x128xf32>
      %109 = arith.mulf %108, %78 : vector<96x128xf32>
      %cst_30 = arith.constant 1.000000e+00 : f32
      %110 = arith.subf %cst_30, %4 : f32
      %111 = arith.mulf %110, %97 : f32
      %112 = vector.broadcast %111 : f32 to vector<96x128xf32>
      %113 = arith.addf %109, %112 : vector<96x128xf32>
      %cst_31 = arith.constant 0.000000e+00 : f32
      %cst_32 = arith.constant 1.000000e+00 : f32
      %114 = vector.broadcast %cst_31 : f32 to vector<96x128xf32>
      %115 = arith.maximumf %114, %113 : vector<96x128xf32>
      %116 = vector.broadcast %cst_32 : f32 to vector<96x128xf32>
      %117 = arith.minimumf %116, %115 : vector<96x128xf32>
      %118 = vector.broadcast %4 : f32 to vector<96x128xf32>
      %119 = arith.mulf %118, %84 : vector<96x128xf32>
      %cst_33 = arith.constant 1.000000e+00 : f32
      %120 = arith.subf %cst_33, %4 : f32
      %121 = arith.mulf %120, %97 : f32
      %122 = vector.broadcast %121 : f32 to vector<96x128xf32>
      %123 = arith.addf %119, %122 : vector<96x128xf32>
      %cst_34 = arith.constant 0.000000e+00 : f32
      %cst_35 = arith.constant 1.000000e+00 : f32
      %124 = vector.broadcast %cst_34 : f32 to vector<96x128xf32>
      %125 = arith.maximumf %124, %123 : vector<96x128xf32>
      %126 = vector.broadcast %cst_35 : f32 to vector<96x128xf32>
      %127 = arith.minimumf %126, %125 : vector<96x128xf32>
      %cst_36 = arith.constant 2.990000e-01 : f32
      %128 = vector.broadcast %cst_36 : f32 to vector<96x128xf32>
      %129 = arith.mulf %128, %107 : vector<96x128xf32>
      %cst_37 = arith.constant 5.870000e-01 : f32
      %130 = vector.broadcast %cst_37 : f32 to vector<96x128xf32>
      %131 = arith.mulf %130, %117 : vector<96x128xf32>
      %132 = arith.addf %129, %131 : vector<96x128xf32>
      %cst_38 = arith.constant 1.140000e-01 : f32
      %133 = vector.broadcast %cst_38 : f32 to vector<96x128xf32>
      %134 = arith.mulf %133, %127 : vector<96x128xf32>
      %135 = arith.addf %132, %134 : vector<96x128xf32>
      %136 = vector.broadcast %6 : f32 to vector<96x128xf32>
      %137 = arith.mulf %136, %107 : vector<96x128xf32>
      %cst_39 = arith.constant 1.000000e+00 : f32
      %138 = arith.subf %cst_39, %6 : f32
      %139 = vector.broadcast %138 : f32 to vector<96x128xf32>
      %140 = arith.mulf %139, %135 : vector<96x128xf32>
      %141 = arith.addf %137, %140 : vector<96x128xf32>
      %cst_40 = arith.constant 0.000000e+00 : f32
      %cst_41 = arith.constant 1.000000e+00 : f32
      %142 = vector.broadcast %cst_40 : f32 to vector<96x128xf32>
      %143 = arith.maximumf %142, %141 : vector<96x128xf32>
      %144 = vector.broadcast %cst_41 : f32 to vector<96x128xf32>
      %145 = arith.minimumf %144, %143 : vector<96x128xf32>
      %146 = vector.broadcast %6 : f32 to vector<96x128xf32>
      %147 = arith.mulf %146, %117 : vector<96x128xf32>
      %cst_42 = arith.constant 1.000000e+00 : f32
      %148 = arith.subf %cst_42, %6 : f32
      %149 = vector.broadcast %148 : f32 to vector<96x128xf32>
      %150 = arith.mulf %149, %135 : vector<96x128xf32>
      %151 = arith.addf %147, %150 : vector<96x128xf32>
      %cst_43 = arith.constant 0.000000e+00 : f32
      %cst_44 = arith.constant 1.000000e+00 : f32
      %152 = vector.broadcast %cst_43 : f32 to vector<96x128xf32>
      %153 = arith.maximumf %152, %151 : vector<96x128xf32>
      %154 = vector.broadcast %cst_44 : f32 to vector<96x128xf32>
      %155 = arith.minimumf %154, %153 : vector<96x128xf32>
      %156 = vector.broadcast %6 : f32 to vector<96x128xf32>
      %157 = arith.mulf %156, %127 : vector<96x128xf32>
      %cst_45 = arith.constant 1.000000e+00 : f32
      %158 = arith.subf %cst_45, %6 : f32
      %159 = vector.broadcast %158 : f32 to vector<96x128xf32>
      %160 = arith.mulf %159, %135 : vector<96x128xf32>
      %161 = arith.addf %157, %160 : vector<96x128xf32>
      %cst_46 = arith.constant 0.000000e+00 : f32
      %cst_47 = arith.constant 1.000000e+00 : f32
      %162 = vector.broadcast %cst_46 : f32 to vector<96x128xf32>
      %163 = arith.maximumf %162, %161 : vector<96x128xf32>
      %164 = vector.broadcast %cst_47 : f32 to vector<96x128xf32>
      %165 = arith.minimumf %164, %163 : vector<96x128xf32>
      %166 = arith.maximumf %145, %155 : vector<96x128xf32>
      %167 = arith.maximumf %166, %165 : vector<96x128xf32>
      %168 = arith.minimumf %145, %155 : vector<96x128xf32>
      %169 = arith.minimumf %168, %165 : vector<96x128xf32>
      %170 = arith.subf %167, %169 : vector<96x128xf32>
      %cst_48 = arith.constant 0.000000e+00 : f32
      %171 = vector.broadcast %cst_48 : f32 to vector<96x128xf32>
      %172 = arith.cmpf ogt, %170, %171 : vector<96x128xf32>
      %cst_49 = arith.constant 1.000000e+00 : f32
      %173 = vector.broadcast %cst_49 : f32 to vector<96x128xf32>
      %174 = arith.select %172, %170, %173 : vector<96x128xi1>, vector<96x128xf32>
      %cst_50 = arith.constant 1.000000e+00 : f32
      %175 = vector.broadcast %cst_50 : f32 to vector<96x128xf32>
      %176 = arith.divf %175, %174 : vector<96x128xf32>
      %177 = arith.cmpf oeq, %167, %145 : vector<96x128xf32>
      %178 = arith.subf %155, %165 : vector<96x128xf32>
      %179 = arith.mulf %178, %176 : vector<96x128xf32>
      %cst_51 = arith.constant 6.000000e+00 : f32
      %180 = vector.broadcast %cst_51 : f32 to vector<96x128xf32>
      %181 = arith.divf %179, %180 : vector<96x128xf32>
      %182 = math.floor %181 : vector<96x128xf32>
      %cst_52 = arith.constant 6.000000e+00 : f32
      %183 = vector.broadcast %cst_52 : f32 to vector<96x128xf32>
      %184 = arith.mulf %183, %182 : vector<96x128xf32>
      %185 = arith.subf %179, %184 : vector<96x128xf32>
      %186 = arith.cmpf oeq, %167, %155 : vector<96x128xf32>
      %187 = arith.subf %165, %145 : vector<96x128xf32>
      %188 = arith.mulf %187, %176 : vector<96x128xf32>
      %cst_53 = arith.constant 2.000000e+00 : f32
      %189 = vector.broadcast %cst_53 : f32 to vector<96x128xf32>
      %190 = arith.addf %188, %189 : vector<96x128xf32>
      %191 = arith.subf %145, %155 : vector<96x128xf32>
      %192 = arith.mulf %191, %176 : vector<96x128xf32>
      %cst_54 = arith.constant 4.000000e+00 : f32
      %193 = vector.broadcast %cst_54 : f32 to vector<96x128xf32>
      %194 = arith.addf %192, %193 : vector<96x128xf32>
      %195 = arith.select %186, %190, %194 : vector<96x128xi1>, vector<96x128xf32>
      %196 = arith.select %177, %185, %195 : vector<96x128xi1>, vector<96x128xf32>
      %cst_55 = arith.constant 0.000000e+00 : f32
      %197 = vector.broadcast %cst_55 : f32 to vector<96x128xf32>
      %198 = arith.select %172, %196, %197 : vector<96x128xi1>, vector<96x128xf32>
      %cst_56 = arith.constant 6.000000e+00 : f32
      %199 = arith.mulf %cst_56, %8 : f32
      %200 = vector.broadcast %199 : f32 to vector<96x128xf32>
      %201 = arith.addf %198, %200 : vector<96x128xf32>
      %cst_57 = arith.constant 6.000000e+00 : f32
      %202 = vector.broadcast %cst_57 : f32 to vector<96x128xf32>
      %203 = arith.divf %201, %202 : vector<96x128xf32>
      %204 = math.floor %203 : vector<96x128xf32>
      %cst_58 = arith.constant 6.000000e+00 : f32
      %205 = vector.broadcast %cst_58 : f32 to vector<96x128xf32>
      %206 = arith.mulf %205, %204 : vector<96x128xf32>
      %207 = arith.subf %201, %206 : vector<96x128xf32>
      %cst_59 = arith.constant 0.000000e+00 : f32
      %208 = vector.broadcast %cst_59 : f32 to vector<96x128xf32>
      %209 = arith.cmpf ogt, %167, %208 : vector<96x128xf32>
      %cst_60 = arith.constant 0.000000e+00 : f32
      %210 = vector.broadcast %cst_60 : f32 to vector<96x128xf32>
      %211 = arith.cmpf ogt, %167, %210 : vector<96x128xf32>
      %cst_61 = arith.constant 1.000000e+00 : f32
      %212 = vector.broadcast %cst_61 : f32 to vector<96x128xf32>
      %213 = arith.select %211, %167, %212 : vector<96x128xi1>, vector<96x128xf32>
      %214 = arith.divf %170, %213 : vector<96x128xf32>
      %cst_62 = arith.constant 0.000000e+00 : f32
      %215 = vector.broadcast %cst_62 : f32 to vector<96x128xf32>
      %216 = arith.select %209, %214, %215 : vector<96x128xi1>, vector<96x128xf32>
      %217 = arith.mulf %167, %216 : vector<96x128xf32>
      %cst_63 = arith.constant 5.000000e+00 : f32
      %218 = vector.broadcast %cst_63 : f32 to vector<96x128xf32>
      %219 = arith.addf %218, %207 : vector<96x128xf32>
      %cst_64 = arith.constant 6.000000e+00 : f32
      %220 = vector.broadcast %cst_64 : f32 to vector<96x128xf32>
      %221 = arith.divf %219, %220 : vector<96x128xf32>
      %222 = math.floor %221 : vector<96x128xf32>
      %cst_65 = arith.constant 6.000000e+00 : f32
      %223 = vector.broadcast %cst_65 : f32 to vector<96x128xf32>
      %224 = arith.mulf %223, %222 : vector<96x128xf32>
      %225 = arith.subf %219, %224 : vector<96x128xf32>
      %cst_66 = arith.constant 4.000000e+00 : f32
      %226 = vector.broadcast %cst_66 : f32 to vector<96x128xf32>
      %227 = arith.subf %226, %225 : vector<96x128xf32>
      %228 = arith.minimumf %225, %227 : vector<96x128xf32>
      %cst_67 = arith.constant 0.000000e+00 : f32
      %cst_68 = arith.constant 1.000000e+00 : f32
      %229 = vector.broadcast %cst_67 : f32 to vector<96x128xf32>
      %230 = arith.maximumf %229, %228 : vector<96x128xf32>
      %231 = vector.broadcast %cst_68 : f32 to vector<96x128xf32>
      %232 = arith.minimumf %231, %230 : vector<96x128xf32>
      %233 = arith.mulf %217, %232 : vector<96x128xf32>
      %234 = arith.subf %167, %233 : vector<96x128xf32>
      %cst_69 = arith.constant 3.000000e+00 : f32
      %235 = vector.broadcast %cst_69 : f32 to vector<96x128xf32>
      %236 = arith.addf %235, %207 : vector<96x128xf32>
      %cst_70 = arith.constant 6.000000e+00 : f32
      %237 = vector.broadcast %cst_70 : f32 to vector<96x128xf32>
      %238 = arith.divf %236, %237 : vector<96x128xf32>
      %239 = math.floor %238 : vector<96x128xf32>
      %cst_71 = arith.constant 6.000000e+00 : f32
      %240 = vector.broadcast %cst_71 : f32 to vector<96x128xf32>
      %241 = arith.mulf %240, %239 : vector<96x128xf32>
      %242 = arith.subf %236, %241 : vector<96x128xf32>
      %cst_72 = arith.constant 4.000000e+00 : f32
      %243 = vector.broadcast %cst_72 : f32 to vector<96x128xf32>
      %244 = arith.subf %243, %242 : vector<96x128xf32>
      %245 = arith.minimumf %242, %244 : vector<96x128xf32>
      %cst_73 = arith.constant 0.000000e+00 : f32
      %cst_74 = arith.constant 1.000000e+00 : f32
      %246 = vector.broadcast %cst_73 : f32 to vector<96x128xf32>
      %247 = arith.maximumf %246, %245 : vector<96x128xf32>
      %248 = vector.broadcast %cst_74 : f32 to vector<96x128xf32>
      %249 = arith.minimumf %248, %247 : vector<96x128xf32>
      %250 = arith.mulf %217, %249 : vector<96x128xf32>
      %251 = arith.subf %167, %250 : vector<96x128xf32>
      %cst_75 = arith.constant 1.000000e+00 : f32
      %252 = vector.broadcast %cst_75 : f32 to vector<96x128xf32>
      %253 = arith.addf %252, %207 : vector<96x128xf32>
      %cst_76 = arith.constant 6.000000e+00 : f32
      %254 = vector.broadcast %cst_76 : f32 to vector<96x128xf32>
      %255 = arith.divf %253, %254 : vector<96x128xf32>
      %256 = math.floor %255 : vector<96x128xf32>
      %cst_77 = arith.constant 6.000000e+00 : f32
      %257 = vector.broadcast %cst_77 : f32 to vector<96x128xf32>
      %258 = arith.mulf %257, %256 : vector<96x128xf32>
      %259 = arith.subf %253, %258 : vector<96x128xf32>
      %cst_78 = arith.constant 4.000000e+00 : f32
      %260 = vector.broadcast %cst_78 : f32 to vector<96x128xf32>
      %261 = arith.subf %260, %259 : vector<96x128xf32>
      %262 = arith.minimumf %259, %261 : vector<96x128xf32>
      %cst_79 = arith.constant 0.000000e+00 : f32
      %cst_80 = arith.constant 1.000000e+00 : f32
      %263 = vector.broadcast %cst_79 : f32 to vector<96x128xf32>
      %264 = arith.maximumf %263, %262 : vector<96x128xf32>
      %265 = vector.broadcast %cst_80 : f32 to vector<96x128xf32>
      %266 = arith.minimumf %265, %264 : vector<96x128xf32>
      %267 = arith.mulf %217, %266 : vector<96x128xf32>
      %268 = arith.subf %167, %267 : vector<96x128xf32>
      %cst_81 = arith.constant 5.000000e-01 : f32
      %269 = vector.broadcast %cst_81 : f32 to vector<96x128xf32>
      %270 = arith.subf %234, %269 : vector<96x128xf32>
      %cst_82 = arith.constant 2.000000e+00 : f32
      %271 = vector.broadcast %cst_82 : f32 to vector<96x128xf32>
      %272 = arith.mulf %270, %271 : vector<96x128xf32>
      %cst_83 = arith.constant 5.000000e-01 : f32
      %273 = vector.broadcast %cst_83 : f32 to vector<96x128xf32>
      %274 = arith.subf %251, %273 : vector<96x128xf32>
      %cst_84 = arith.constant 2.000000e+00 : f32
      %275 = vector.broadcast %cst_84 : f32 to vector<96x128xf32>
      %276 = arith.mulf %274, %275 : vector<96x128xf32>
      %cst_85 = arith.constant 5.000000e-01 : f32
      %277 = vector.broadcast %cst_85 : f32 to vector<96x128xf32>
      %278 = arith.subf %268, %277 : vector<96x128xf32>
      %cst_86 = arith.constant 2.000000e+00 : f32
      %279 = vector.broadcast %cst_86 : f32 to vector<96x128xf32>
      %280 = arith.mulf %278, %279 : vector<96x128xf32>
      %281 = tpu.concatenate %272, %276, %280 in 0 : vector<96x128xf32>, vector<96x128xf32>, vector<96x128xf32> -> vector<288x128xf32>
      %282 = arith.index_cast %arg4 : i32 to index
      %c0_87 = arith.constant 0 : index
      %c0_88 = arith.constant 0 : index
      %283 = vector.load %arg3[%282, %c0_87, %c0_88] : memref<2x288x128xf32, #tpu.memory_space<vmem>>, vector<1x288x128xf32>
      %284 = vector.shape_cast %283 : vector<1x288x128xf32> to vector<288x128xf32>
      %285 = vector.shape_cast %281 : vector<288x128xf32> to vector<1x288x128xf32>
      tpu.vector_store %arg3[%282, %c0_87, %c0_88], %285 {strides = array<i32>} : memref<2x288x128xf32, #tpu.memory_space<vmem>>, vector<1x288x128xf32>,
    }
    %c2_i32_0 = arith.constant 2 : i32
    return
  }
  func.func @transform_0(%arg0: i32) -> (i32, i32) {
    %c0_i32 = arith.constant 0 : i32
    %c0_i32_0 = arith.constant 0 : i32
    return %arg0, %c0_i32 : i32, i32
  }
  func.func @transform_1(%arg0: i32) -> (i32, i32, i32) {
    %c0_i32 = arith.constant 0 : i32
    %c0_i32_0 = arith.constant 0 : i32
    %c0_i32_1 = arith.constant 0 : i32
    return %arg0, %c0_i32, %c0_i32_0 : i32, i32, i32
  }
  func.func @transform_2(%arg0: i32) -> (i32, i32, i32) {
    %c0_i32 = arith.constant 0 : i32
    %c0_i32_0 = arith.constant 0 : i32
    %c0_i32_1 = arith.constant 0 : i32
    return %arg0, %c0_i32, %c0_i32_0 : i32, i32, i32
  }
}

</mosaic_0001>

<bundles_post_ra>
// kernel: tpu_custom_call.1
= control target key start
LH: loop header
LB: loop body
LE: loop exit
PB: predicated region body
PF: predicated region fallthrough
CT: control target
= control target key end

     0   :  { %7 = vsyncpa [#allocation5], 0  ;;  %s5569_s0 = inlined_call_operand.hbm [shape: f32[2,8], index: 0, kind: input, shape index: {}]   ;;  %s5570_s1 = inlined_call_operand.hbm [shape: f32[2,384,128], index: 1, kind: input, shape index: {}]   ;;  %s5571_s2 = inlined_call_operand.hbm [shape: f32[2,288,128], index: 2, kind: output, shape index: {}]  }
   0x1   :  { %8 = vsyncpa [#allocation3], 0 }
   0x2   :  { %9 = vsyncpa [#allocation4], 0  ;;  %s3209_s11 = scalar_lea.hbm %s5569_s0, 32 }
   0x3   :  { %p3210_p0 = scmp.ne.s32.totalorder %s5569_s0, %s3209_s11  ;;  %p3213_p1 = scmp.lt.u32.totalorder %s3209_s11, %s5569_s0 }
   0x5   :  { %p3215_p2 = pnand %p3213_p1, %p3210_p0 }
   0x7   :  { %3218 = shalt.err (!%p3215_p2)
}
   0x8   :  { %s3277_s16 = smov [#allocation2]   ;;  %s3278_s19 = smov [#allocation6]  }
   0x9   :  { %17 = dma.hbm_to_smem %s5569_s0, 32, %s3277_s16, [#allocation5]  }
   0xa   :  { %s23_s20 = sshll.u32 %s3278_s19, 4  ;;  %s3219_s23 = scalar_lea.hbm %s5570_s1, 12288  ;;  %s24_s20 = int_to_ptr.vmem [resolvable:$true] %s23_s20 }
   0xb   :  { %p3220_p3 = scmp.ne.s32.totalorder %s5570_s1, %s3219_s23  ;;  %p3223_p4 = scmp.lt.u32.totalorder %s3219_s23, %s5570_s1 }
   0xd   :  { %p3225_p5 = pnand %p3223_p4, %p3220_p3 }
   0xf   :  { %3228 = shalt.err (!%p3225_p5)
}
  0x10   :  { %s3229_s28 = scalar_lea.vmem %s24_s20, 12288  ;;  %p3234_p7 = scmp.lt.s32.totalorder %s24_s20, %s24_s20 }
  0x11   :  { %p3230_p6 = scmp.ne.s32.totalorder %s24_s20, %s3229_s28  ;;  %p3235_p8 = scmp.lt.s32.totalorder %s3229_s28, %s3229_s28 }
  0x13   :  { %p3236_p9 = por %p3235_p8, %p3234_p7 }
  0x15   :  { %p3237_p10 = pnand %p3236_p9, %p3230_p6 }
  0x17   :  { %3240 = shalt.err (!%p3237_p10)
}
  0x18   :  { %s3279_s0 = smov 128   ;;  %s3280_s29 = smov 8  }
  0x19   :  { %29 = dma.hbm_to_vmem [thread:$0]  %s5570_s1, 12288, %s24_s20, [#allocation3], %s3279_s0, %s3279_s0, %s3280_s29  }
  0x1a   :  { %3267 = dma.done.wait [#allocation5], 32  }
  0x1b   :  { %3268 = vsyncadd [#allocation5], 4294967264 }
  0x1c   :  { %3269 = dma.done.wait [#allocation3], 12288  }
  0x1d   :  { %3270 = vsyncadd [#allocation3], 4294955008 }
  0x1e   :  { %36 = sfence }
  0x1f   :  { %s3324_s4 = smov 0  }
  0x20 LB: > { %v59_v0 = vlaneseq  ;;  %s3330_s5 = sshll.u32 %s3275_s4, 7  ;;  %s182_s1 = smul.u32 384, %s3275_s4  ;;  %s3275_s4 = sphi %s3324_s4, %s42_s4  }
  0x21   : > { %s55_s6 = sadd.s32 6, %s3330_s5  ;;  %s57_s8 = sadd.s32 7, %s3330_s5 }
  0x22   : > { %s56_s7 = sld [smem:[#allocation2 + %s55_s6]]  ;;  %v60_v1 = vand.u32 127, %v59_v0  ;;  %s3335_s10 = scalar_lea.vmem [#allocation6], %s182_s1  ;;  %v3338_v3 = vshrl.u32 %v59_v0, 7 }
  0x23   : > { %s58_s9 = sld [smem:[#allocation2 + %s57_s8]]  ;;  %v184_v2 = vld [vmem:[%s3335_s10] sm:$0xff]  ;;  %s53_s11 = sadd.s32 5, %s3330_s5 }
  0x24   : > { %2780 = vmatprep.mubr.f32.mxu0 %v184_v2  ;;  %v3340_v4 = vcvt.s32.f32 %v60_v1  ;;  %v3343_v5 = vadd.s32 8, %v3338_v3  ;;  %v79_v8 = vcvt.s32.f32 %v3338_v3  ;;  %v3348_v10 = vadd.s32 16, %v3338_v3  ;;  %s54_s12 = sld [smem:[#allocation2 + %s53_s11]]  ;;  %s51_s13 = sadd.s32 4, %s3330_s5 }
  0x25   : > { %v3351_v11 = vadd.s32 24, %v3338_v3  ;;  %v3354_v12 = vadd.s32 32, %v3338_v3  ;;  %v3357_v13 = vadd.s32 40, %v3338_v3  ;;  %v3360_v14 = vadd.s32 48, %v3338_v3  ;;  %s52_s14 = sld [smem:[#allocation2 + %s51_s13]]  ;;  %s45_s16 = sadd.s32 1, %s3330_s5 }
  0x26   : > { %v3363_v15 = vadd.s32 56, %v3338_v3  ;;  %v3366_v17 = vadd.s32 64, %v3338_v3  ;;  %v3369_v18 = vadd.s32 72, %v3338_v3  ;;  %v3372_v19 = vadd.s32 80, %v3338_v3  ;;  %s44_s15 = sld [smem:[#allocation2 + %s3330_s5]]  ;;  %s47_s17 = sadd.s32 2, %s3330_s5 }
  0x27   : > { %v80_v20 = vcvt.s32.f32 %v3343_v5  ;;  %v3376_v21 = vadd.s32 88, %v3338_v3  ;;  %v3379_v22 = vadd.s32 96, %v3338_v3  ;;  %v3382_v23 = vadd.s32 104, %v3338_v3  ;;  %s3844_s18 = sld [smem:[#allocation2 + %s45_s16]]  ;;  %s49_s25 = sadd.s32 3, %s3330_s5 }
  0x28   : > { %v97_v7 = vstv %s56_s7  ;;  %vm165_vm0 = vcmp.lt.f32.partialorder %v3340_v4, 96.0  ;;  %v81_v25 = vcvt.s32.f32 %v3348_v10  ;;  %v82_v26 = vcvt.s32.f32 %v3351_v11  ;;  %s48_s19 = sld [smem:[#allocation2 + %s47_s17]]  ;;  %s2482_s28 = smul.u32 288, %s3275_s4 }
  0x29   : > { %v95_v6 = vstv %s58_s9  ;;  %v83_v27 = vcvt.s32.f32 %v3354_v12  ;;  %v84_v28 = vcvt.s32.f32 %v3357_v13  ;;  %v85_v29 = vcvt.s32.f32 %v3360_v14  ;;  %vm3433_vm1 = vmpackc.low %vm165_vm0, %vm165_vm0  ;;  %s4479_s26 = sld [smem:[#allocation2 + %s49_s25]]  ;;  %s42_s4 = sadd.s32 1, %s3275_s4  }
  0x2a   : > { %v96_v9 = vmul.f32 %v95_v6, %v3340_v4  ;;  %v86_v30 = vcvt.s32.f32 %v3363_v15  ;;  %v87_v32 = vcvt.s32.f32 %v3366_v17  ;;  %v88_v33 = vcvt.s32.f32 %v3369_v18  ;;  %v191_v6 = vld [vmem:[%s3335_s10 + $0x38] sm:$0xff]  ;;  %s5441_s30 = scalar_lea.vmem [#allocation7], %s2482_s28  ;;  %p39_p11 = scmp.ge.s32.totalorder %s42_s4, 2  }
  0x2b   : > { %v89_v34 = vcvt.s32.f32 %v3372_v19  ;;  %v90_v35 = vcvt.s32.f32 %v3376_v21  ;;  %v91_v36 = vcvt.s32.f32 %v3379_v22  ;;  %v92_v37 = vcvt.s32.f32 %v3382_v23  ;;  %s3281_s3 = smov (%p39_p11), [#allocation7]  }
  0x2c   : > { %v98_v16 = vadd.f32 %v97_v7, %v96_v9  ;;  %v77_v38 = vadd.s32 112, %v3338_v3  ;;  %v78_v22 = vadd.s32 120, %v3338_v3  ;;  %s2525_s5 = sshll.u32 (%p39_p11), %s3281_s3, 4  ;;  %s2526_s5 = int_to_ptr.vmem [resolvable:$true] %s2525_s5 }
  0x2d   : > { %s1213_s21 = ssub.f32 1.0, %s3844_s18  ;;  %s3241_s1 = scalar_lea.vmem (%p39_p11), %s2526_s5, 9216 }
  0x2e   : > { %v99_v24 = vmax.f32 %v98_v16, 0.0  ;;  %s1421_s20 = ssub.f32 1.0, %s48_s19  ;;  %p3242_p12 = scmp.ne.s32.totalorder (%p39_p11), %s2526_s5, %s3241_s1 }
  0x2f   : > { %s1880_s27 = smul.f32 6.0, %s4479_s26  ;;  %p3246_p13 = scmp.lt.s32.totalorder (%p39_p11), %s2526_s5, %s2526_s5 }
  0x30   : > { %v3391_v31 = vmin.f32 %v99_v24, 127.0  ;;  %p3247_p0 = scmp.lt.s32.totalorder (%p39_p11), %s3241_s1, %s3241_s1 }
  0x32   : > { %v101_v39 = vsub.f32 %v3391_v31, %v79_v8  ;;  %v102_v40 = vsub.f32 %v3391_v31, %v80_v20  ;;  %v103_v41 = vsub.f32 %v3391_v31, %v81_v25  ;;  %v104_v42 = vsub.f32 %v3391_v31, %v82_v26  ;;  %p3248_p1 = por (%p39_p11), %p3247_p0, %p3246_p13 }
  0x33   : > { %v105_v43 = vsub.f32 %v3391_v31, %v83_v27  ;;  %v106_v44 = vsub.f32 %v3391_v31, %v84_v28  ;;  %v107_v45 = vsub.f32 %v3391_v31, %v85_v29  ;;  %v108_v46 = vsub.f32 %v3391_v31, %v86_v30 }
  0x34   : > { %v117_v47 = vand.u32 2147483647, %v101_v39  ;;  %v118_v48 = vand.u32 2147483647, %v102_v40  ;;  %v119_v49 = vand.u32 2147483647, %v103_v41  ;;  %v109_v50 = vsub.f32 %v3391_v31, %v87_v32  ;;  %p3249_p2 = pnand (%p39_p11), %p3248_p1, %p3242_p12 }
  0x35   : > { %v120_v51 = vand.u32 2147483647, %v104_v42  ;;  %v121_v52 = vand.u32 2147483647, %v105_v43  ;;  %v122_v53 = vand.u32 2147483647, %v106_v44  ;;  %v110_v54 = vsub.f32 %v3391_v31, %v88_v33 }
  0x36   : > { %v133_v55 = vsub.f32 1.0, %v117_v47  ;;  %v134_v56 = vsub.f32 1.0, %v118_v48  ;;  %v135_v57 = vsub.f32 1.0, %v119_v49  ;;  %v123_v58 = vand.u32 2147483647, %v107_v45 }
  0x37   : > { %v136_v59 = vsub.f32 1.0, %v120_v51  ;;  %v137_v60 = vsub.f32 1.0, %v121_v52  ;;  %v138_v61 = vsub.f32 1.0, %v122_v53  ;;  %v124_v62 = vand.u32 2147483647, %v108_v46 }
  0x38   : > { %v149_v63 = vmax.f32 %v133_v55, 0.0  ;;  %v150_v0 = vmax.f32 %v134_v56, 0.0  ;;  %v151_v1 = vmax.f32 %v135_v57, 0.0  ;;  %v139_v2 = vsub.f32 1.0, %v123_v58 }
  0x39   : > { %v152_v7 = vmax.f32 %v136_v59, 0.0  ;;  %v153_v9 = vmax.f32 %v137_v60, 0.0  ;;  %v140_v16 = vsub.f32 1.0, %v124_v62  ;;  %v154_v24 = vmax.f32 %v138_v61, 0.0 }
  0x3a   : > { %v3002_v23 = vpack.c.bf16 %v150_v0, %v149_v63  ;;  %v125_v39 = vand.u32 2147483647, %v109_v50  ;;  %v126_v40 = vand.u32 2147483647, %v110_v54  ;;  %v111_v42 = vsub.f32 %v3391_v31, %v89_v34 }
  0x3b   : > { %v3008_v41 = vpack.c.bf16 %v152_v7, %v151_v1  ;;  %v155_v43 = vmax.f32 %v139_v2, 0.0  ;;  %v156_v44 = vmax.f32 %v140_v16, 0.0  ;;  %v112_v45 = vsub.f32 %v3391_v31, %v90_v35 }
  0x3c   : > { %3004 = vmatprep.subr.msk.bf16.mxu0 %vm3433_vm1, %v3002_v23  ;;  %v93_v46 = vcvt.s32.f32 %v77_v38  ;;  %v141_v47 = vsub.f32 1.0, %v125_v39  ;;  %v142_v48 = vsub.f32 1.0, %v126_v40  ;;  %v113_v49 = vsub.f32 %v3391_v31, %v91_v36 }
  0x3d   : > { %3007 = vmatpush3.bf16.msk.msra.mxu0 %vm3433_vm1, %v3002_v23  ;;  %v94_v50 = vcvt.s32.f32 %v78_v22  ;;  %v3014_v51 = vpack.c.bf16 %v154_v24, %v153_v9  ;;  %v127_v52 = vand.u32 2147483647, %v111_v42  ;;  %v128_v53 = vand.u32 2147483647, %v112_v45  ;;  %v185_v42 = vld [vmem:[%s3335_s10 + $0x8] sm:$0xff]  ;;  %v188_v45 = vld [vmem:[%s3335_s10 + $0x20] sm:$0xff] }
  0x3e   : > { %3010 = vmatprep.subr.msk.bf16.mxu0 %vm3433_vm1, %v3008_v41  ;;  %v114_v54 = vsub.f32 %v3391_v31, %v92_v37  ;;  %v3020_v55 = vpack.c.bf16 %v156_v44, %v155_v43  ;;  %v157_v38 = vmax.f32 %v141_v47, 0.0  ;;  %v158_v56 = vmax.f32 %v142_v48, 0.0  ;;  %v186_v43 = vld [vmem:[%s3335_s10 + $0x10] sm:$0xff]  ;;  %v187_v44 = vld [vmem:[%s3335_s10 + $0x18] sm:$0xff]  ;;  %v192_v48 = vld [vmem:[%s3335_s10 + $0x40] sm:$0xff] }
  0x3f   : > { %v129_v57 = vand.u32 2147483647, %v113_v49  ;;  %v115_v58 = vsub.f32 %v3391_v31, %v93_v46  ;;  %v143_v36 = vsub.f32 1.0, %v127_v52  ;;  %v144_v59 = vsub.f32 1.0, %v128_v53  ;;  %v189_v46 = vld [vmem:[%s3335_s10 + $0x28] sm:$0xff]  ;;  %v190_v47 = vld [vmem:[%s3335_s10 + $0x30] sm:$0xff] }
  0x40   : > { %v130_v60 = vand.u32 2147483647, %v114_v54  ;;  %v116_v61 = vsub.f32 %v3391_v31, %v94_v50  ;;  %v3026_v37 = vpack.c.bf16 %v158_v56, %v157_v38  ;;  %v193_v49 = vld [vmem:[%s3335_s10 + $0x48] sm:$0xff]  ;;  %v194_v50 = vld [vmem:[%s3335_s10 + $0x50] sm:$0xff]  ;;  %v196_v52 = vld [vmem:[%s3335_s10 + $0x60] sm:$0xff] }
  0x41   : > { %3013 = vmatpush3.bf16.msk.msra.mxu0 %vm3433_vm1, %v3008_v41  ;;  %v145_v62 = vsub.f32 1.0, %v129_v57  ;;  %v131_v63 = vand.u32 2147483647, %v115_v58  ;;  %v159_v0 = vmax.f32 %v143_v36, 0.0  ;;  %v160_v1 = vmax.f32 %v144_v59, 0.0  ;;  %v197_v53 = vld [vmem:[%s3335_s10 + $0x68] sm:$0xff] }
  0x42   : > { %3016 = vmatprep.subr.msk.bf16.mxu0 %vm3433_vm1, %v3014_v51  ;;  %v146_v2 = vsub.f32 1.0, %v130_v60  ;;  %v132_v7 = vand.u32 2147483647, %v116_v61  ;;  %v198_v54 = vld [vmem:[%s3335_s10 + $0x70] sm:$0xff]  ;;  %v200_v38 = vld [vmem:[%s3335_s10 + $0x80] sm:$0xff]  ;;  %v201_v56 = vld [vmem:[%s3335_s10 + $0x88] sm:$0xff] }
  0x43   : > { %v147_v9 = vsub.f32 1.0, %v131_v63  ;;  %v3032_v31 = vpack.c.bf16 %v160_v1, %v159_v0  ;;  %v161_v16 = vmax.f32 %v145_v62, 0.0  ;;  %v202_v57 = vld [vmem:[%s3335_s10 + $0x90] sm:$0xff]  ;;  %v203_v58 = vld [vmem:[%s3335_s10 + $0x98] sm:$0xff]  ;;  %v204_v36 = vld [vmem:[%s3335_s10 + $0xa0] sm:$0xff] }
  0x44   : > { %v162_v22 = vmax.f32 %v146_v2, 0.0  ;;  %v148_v23 = vsub.f32 1.0, %v132_v7  ;;  %v205_v59 = vld [vmem:[%s3335_s10 + $0xa8] sm:$0xff]  ;;  %v206_v60 = vld [vmem:[%s3335_s10 + $0xb0] sm:$0xff]  ;;  %v207_v61 = vld [vmem:[%s3335_s10 + $0xb8] sm:$0xff] }
  0x45   : > { %3019 = vmatpush3.bf16.msk.msra.mxu0 %vm3433_vm1, %v3014_v51  ;;  %v163_v39 = vmax.f32 %v147_v9, 0.0  ;;  %v195_v51 = vld [vmem:[%s3335_s10 + $0x58] sm:$0xff]  ;;  %v209_v62 = vld [vmem:[%s3335_s10 + $0xc8] sm:$0xff]  ;;  %v210_v63 = vld [vmem:[%s3335_s10 + $0xd0] sm:$0xff] }
  0x46   : > { %3022 = vmatprep.subr.msk.bf16.mxu0 %vm3433_vm1, %v3020_v55  ;;  %v3038_v24 = vpack.c.bf16 %v162_v22, %v161_v16  ;;  %v164_v40 = vmax.f32 %v148_v23, 0.0  ;;  %v211_v0 = vld [vmem:[%s3335_s10 + $0xd8] sm:$0xff]  ;;  %v212_v1 = vld [vmem:[%s3335_s10 + $0xe0] sm:$0xff]  ;;  %v213_v2 = vld [vmem:[%s3335_s10 + $0xe8] sm:$0xff] }
  0x47   : > { %v214_v7 = vld [vmem:[%s3335_s10 + $0xf0] sm:$0xff]  ;;  %v215_v9 = vld [vmem:[%s3335_s10 + $0xf8] sm:$0xff]  ;;  %v217_v16 = vld [vmem:[%s3335_s10 + $0x108] sm:$0xff] }
  0x48   : > { %v3044_v41 = vpack.c.bf16 %v164_v40, %v163_v39  ;;  %v218_v22 = vld [vmem:[%s3335_s10 + $0x110] sm:$0xff]  ;;  %v219_v23 = vld [vmem:[%s3335_s10 + $0x118] sm:$0xff]  ;;  %v221_v39 = vld [vmem:[%s3335_s10 + $0x128] sm:$0xff] }
  0x49   : > { %3025 = vmatpush3.bf16.msk.msra.mxu0 %vm3433_vm1, %v3020_v55  ;;  %v199_v55 = vld [vmem:[%s3335_s10 + $0x78] sm:$0xff]  ;;  %v222_v40 = vld [vmem:[%s3335_s10 + $0x130] sm:$0xff] }
  0x4a   : > { %3028 = vmatprep.subr.msk.bf16.mxu0 %vm3433_vm1, %v3026_v37 }
  0x4d   : > { %3031 = vmatpush3.bf16.msk.msra.mxu0 %vm3433_vm1, %v3026_v37  ;;  %v208_v37 = vld [vmem:[%s3335_s10 + $0xc0] sm:$0xff] }
  0x4e   : > { %3034 = vmatprep.subr.msk.bf16.mxu0 %vm3433_vm1, %v3032_v31 }
  0x51   : > { %3037 = vmatpush3.bf16.msk.msra.mxu0 %vm3433_vm1, %v3032_v31  ;;  %v216_v31 = vld [vmem:[%s3335_s10 + $0x100] sm:$0xff] }
  0x52   : > { %3040 = vmatprep.subr.msk.bf16.mxu0 %vm3433_vm1, %v3038_v24 }
  0x55   : > { %3043 = vmatpush3.bf16.msk.msra.mxu0 %vm3433_vm1, %v3038_v24  ;;  %v220_v24 = vld [vmem:[%s3335_s10 + $0x120] sm:$0xff] }
  0x56   : > { %3046 = vmatprep.subr.msk.bf16.mxu0 %vm3433_vm1, %v3044_v41 }
  0x59   : > { %3049 = vmatpush3.bf16.msk.msra.mxu0 %vm3433_vm1, %v3044_v41  ;;  %v223_v41 = vld [vmem:[%s3335_s10 + $0x138] sm:$0xff] }
  0x5c   : > { %2781 = vmatmul.mubr.f32.vlgmr.msra.gmra.mrb[0].mxu0 %v185_v42  ;;  %v224_v42 = vld [vmem:[%s3335_s10 + $0x140] sm:$0xff] }
  0x5d   : > { %2783 = vmatprep.mubr.f32.mxu0 %v186_v43  ;;  %v225_v43 = vld [vmem:[%s3335_s10 + $0x148] sm:$0xff] }
  0x60   : > { %2784 = vmatmul.mubr.f32.gmra.mrb[2].mxu0 %v187_v44  ;;  %v226_v44 = vld [vmem:[%s3335_s10 + $0x150] sm:$0xff] }
  0x61   : > { %2786 = vmatprep.mubr.f32.mxu0 %v188_v45  ;;  %v227_v45 = vld [vmem:[%s3335_s10 + $0x158] sm:$0xff] }
  0x64   : > { %2787 = vmatmul.mubr.f32.gmra.mrb[4].mxu0 %v189_v46  ;;  %v228_v46 = vld [vmem:[%s3335_s10 + $0x160] sm:$0xff] }
  0x65   : > { %2789 = vmatprep.mubr.f32.mxu0 %v190_v47  ;;  %v229_v47 = vld [vmem:[%s3335_s10 + $0x168] sm:$0xff] }
  0x68   : > { %2790 = vmatmul.mubr.f32.gmra.mrb[6].mxu0 %v191_v6  ;;  %v230_v6 = vld [vmem:[%s3335_s10 + $0x170] sm:$0xff] }
  0x69   : > { %2792 = vmatprep.mubr.f32.mxu0 %v192_v48  ;;  %v231_v48 = vld [vmem:[%s3335_s10 + $0x178] sm:$0xff] }
  0x6c   : > { %2793 = vmatmul.mubr.f32.gmra.mrb[8].mxu0 %v193_v49  ;;  %v3529_v49 = vstv %s54_s12 }
  0x6d   : > { %2795 = vmatprep.mubr.f32.mxu0 %v194_v50  ;;  %v538_v50 = vmul.f32 %v3529_v49, %v79_v8  ;;  %v542_v10 = vmul.f32 %v3529_v49, %v83_v27  ;;  %v543_v11 = vmul.f32 %v3529_v49, %v84_v28  ;;  %v544_v12 = vmul.f32 %v3529_v49, %v85_v29 }
  0x6e   : > { %v545_v13 = vmul.f32 %v3529_v49, %v86_v30  ;;  %v546_v14 = vmul.f32 %v3529_v49, %v87_v32 }
  0x70   : > { %2796 = vmatmul.mubr.f32.gmra.mrb[10].mxu0 %v195_v51  ;;  %v539_v51 = vmul.f32 %v3529_v49, %v80_v20  ;;  %v540_v20 = vmul.f32 %v3529_v49, %v81_v25 }
  0x71   : > { %2798 = vmatprep.mubr.f32.mxu0 %v196_v52  ;;  %v3537_v52 = vstv %s52_s14 }
  0x72   : > { %v558_v30 = vadd.f32 %v3537_v52, %v545_v13  ;;  %v559_v32 = vadd.f32 %v3537_v52, %v546_v14 }
  0x74   : > { %2799 = vmatmul.mubr.f32.gmra.mrb[12].mxu0 %v197_v53  ;;  %v551_v53 = vadd.f32 %v3537_v52, %v538_v50 }
  0x75   : > { %2801 = vmatprep.mubr.f32.mxu0 %v198_v54  ;;  %v552_v54 = vadd.f32 %v3537_v52, %v539_v51 }
  0x78   : > { %2802 = vmatmul.mubr.f32.gmra.mrb[14].mxu0 %v199_v55  ;;  %v563_v55 = vmax.f32 %v551_v53, 0.0 }
  0x79   : > { %2804 = vmatprep.mubr.f32.mxu0 %v200_v38 }
  0x7a   : > { %v575_v38 = vmin.f32 %v563_v55, 127.0 }
  0x7c   : > { %2805 = vmatmul.mubr.f32.gmra.mrb[16].mxu0 %v201_v56  ;;  %v587_v56 = vsub.f32 %v575_v38, %v3340_v4  ;;  %v570_v38 = vmax.f32 %v558_v30, 0.0 }
  0x7d   : > { %2807 = vmatprep.mubr.f32.mxu0 %v202_v57 }
  0x7e   : > { %v599_v57 = vand.u32 2147483647, %v587_v56  ;;  %v549_v56 = vmul.f32 %v3529_v49, %v90_v35 }
  0x80   : > { %2808 = vmatmul.mubr.f32.gmra.mrb[18].mxu0 %v203_v58  ;;  %v611_v58 = vsub.f32 1.0, %v599_v57  ;;  %v562_v35 = vadd.f32 %v3537_v52, %v549_v56 }
  0x81   : > { %2810 = vmatprep.mubr.f32.mxu0 %v204_v36 }
  0x82   : > { %v3542_v36 = vmax.f32 %v611_v58, 0.0  ;;  %v571_v58 = vmax.f32 %v559_v32, 0.0 }
  0x84   : > { %2811 = vmatmul.mubr.f32.gmra.mrb[20].mxu0 %v205_v59  ;;  %2884 = vmatprep.mubr.f32.mxu1 %v3542_v36 }
  0x85   : > { %2813 = vmatprep.mubr.f32.mxu0 %v206_v60 }
  0x88   : > { %2814 = vmatmul.mubr.f32.gmra.mrb[22].mxu0 %v207_v61 }
  0x89   : > { %2816 = vmatprep.mubr.f32.mxu0 %v208_v37  ;;  %v553_v37 = vadd.f32 %v3537_v52, %v540_v20 }
  0x8c   : > { %2817 = vmatmul.mubr.f32.gmra.mrb[24].mxu0 %v209_v62  ;;  %v541_v62 = vmul.f32 %v3529_v49, %v82_v26 }
  0x8d   : > { %2819 = vmatprep.mubr.f32.mxu0 %v210_v63 }
  0x90   : > { %2820 = vmatmul.mubr.f32.gmra.mrb[26].mxu0 %v211_v0 }
  0x91   : > { %2822 = vmatprep.mubr.f32.mxu0 %v212_v1  ;;  %v564_v1 = vmax.f32 %v552_v54, 0.0 }
  0x94   : > { %2823 = vmatmul.mubr.f32.gmra.mrb[28].mxu0 %v213_v2  ;;  %v565_v2 = vmax.f32 %v553_v37, 0.0  ;;  %v582_v37 = vmin.f32 %v570_v38, 127.0 }
  0x95   : > { %2825 = vmatprep.mubr.f32.mxu0 %v214_v7  ;;  %v554_v7 = vadd.f32 %v3537_v52, %v541_v62 }
  0x98   : > { %2826 = vmatmul.mubr.f32.gmra.mrb[30].mxu0 %v215_v9 }
  0x99   : > { %2828 = vmatprep.mubr.f32.mxu0 %v216_v31  ;;  %v555_v31 = vadd.f32 %v3537_v52, %v542_v10 }
  0x9c   : > { %2829 = vmatmul.mubr.f32.gmra.mrb[32].mxu0 %v217_v16  ;;  %v576_v16 = vmin.f32 %v564_v1, 127.0 }
  0x9d   : > { %2831 = vmatprep.mubr.f32.mxu0 %v218_v22  ;;  %v577_v22 = vmin.f32 %v565_v2, 127.0 }
  0xa0   : > { %2832 = vmatmul.mubr.f32.gmra.mrb[34].mxu0 %v219_v23  ;;  %v566_v23 = vmax.f32 %v554_v7, 0.0 }
  0xa1   : > { %2834 = vmatprep.mubr.f32.mxu0 %v220_v24 }
  0xa4   : > { %2835 = vmatmul.mubr.f32.gmra.mrb[36].mxu0 %v221_v39  ;;  %v556_v39 = vadd.f32 %v3537_v52, %v543_v11 }
  0xa5   : > { %2837 = vmatprep.mubr.f32.mxu0 %v222_v40  ;;  %v567_v40 = vmax.f32 %v555_v31, 0.0 }
  0xa6   : > { %v568_v15 = vmax.f32 %v556_v39, 0.0 }
  0xa7   : > { %v579_v17 = vmin.f32 %v567_v40, 127.0 }
  0xa8   : > { %2838 = vmatmul.mubr.f32.gmra.mrb[38].mxu0 %v223_v41  ;;  %v557_v41 = vadd.f32 %v3537_v52, %v544_v12  ;;  %v580_v18 = vmin.f32 %v568_v15, 127.0 }
  0xa9   : > { %2840 = vmatprep.mubr.f32.mxu0 %v224_v42  ;;  %v588_v42 = vsub.f32 %v576_v16, %v3340_v4  ;;  %v591_v19 = vsub.f32 %v579_v17, %v3340_v4 }
  0xab   : > { %v600_v51 = vand.u32 2147483647, %v588_v42  ;;  %v603_v62 = vand.u32 2147483647, %v591_v19 }
  0xac   : > { %2841 = vmatmul.mubr.f32.gmra.mrb[40].mxu0 %v225_v43  ;;  %v589_v43 = vsub.f32 %v577_v22, %v3340_v4 }
  0xad   : > { %2843 = vmatprep.mubr.f32.mxu0 %v226_v44  ;;  %v578_v44 = vmin.f32 %v566_v23, 127.0 }
  0xae   : > { %v601_v53 = vand.u32 2147483647, %v589_v43 }
  0xaf   : > { %v590_v54 = vsub.f32 %v578_v44, %v3340_v4 }
  0xb0   : > { %2844 = vmatmul.mubr.f32.gmra.mrb[42].mxu0 %v227_v45  ;;  %v613_v20 = vsub.f32 1.0, %v601_v53 }
  0xb1   : > { %2846 = vmatprep.mubr.f32.mxu0 %v228_v46  ;;  %v547_v46 = vmul.f32 %v3529_v49, %v88_v33 }
  0xb2   : > { %v3593_v2 = vmax.f32 %v613_v20, 0.0 }
  0xb3   : > { %v560_v33 = vadd.f32 %v3537_v52, %v547_v46 }
  0xb4   : > { %2847 = vmatmul.mubr.f32.gmra.mrb[44].mxu0 %v229_v47 }
  0xb5   : > { %2849 = vmatprep.mubr.f32.mxu0 %v230_v6  ;;  %v569_v6 = vmax.f32 %v557_v41, 0.0  ;;  %v572_v21 = vmax.f32 %v560_v33, 0.0 }
  0xb7   : > { %v584_v31 = vmin.f32 %v572_v21, 127.0 }
  0xb8   : > { %2850 = vmatmul.mubr.f32.gmra.mrb[46].mxu0 %v231_v48  ;;  %v548_v48 = vmul.f32 %v3529_v49, %v89_v34  ;;  %v581_v34 = vmin.f32 %v569_v6, 127.0 }
  0xb9   : > { %v596_v41 = vsub.f32 %v584_v31, %v3340_v4 }
  0xbb   : > { %v608_v17 = vand.u32 2147483647, %v596_v41 }
 0x12f   : > { %v2782_v3 = vpop.f32.mrb[0].mxu0 }
 0x130   : > { %v298_v5 = vpop.f32.mrb[1].mxu0 }
 0x131   : > { %v3050_v8 = vpack.c.bf16 %v2782_v3, %v298_v5  ;;  %v561_v3 = vadd.f32 %v3537_v52, %v548_v48  ;;  %v574_v52 = vmax.f32 %v562_v35, 0.0 }
 0x133   : > { %v2785_v59 = vpop.f32.mrb[2].mxu0  ;;  %3051 = vmatprep.subr.bf16.mxu1 %v3050_v8  ;;  %v573_v10 = vmax.f32 %v561_v3, 0.0  ;;  %v586_v14 = vmin.f32 %v574_v52, 127.0 }
 0x134   : > { %v308_v60 = vpop.f32.mrb[3].mxu0  ;;  %3053 = vmatpush3.bf16.msra.mxu1 %v3050_v8  ;;  %v612_v8 = vsub.f32 1.0, %v600_v51 }
 0x135   : > { %v3054_v61 = vpack.c.bf16 %v2785_v59, %v308_v60  ;;  %v602_v59 = vand.u32 2147483647, %v590_v54  ;;  %v585_v23 = vmin.f32 %v573_v10, 127.0  ;;  %v598_v6 = vsub.f32 %v586_v14, %v3340_v4 }
 0x136   : > { %v3591_v1 = vmax.f32 %v612_v8, 0.0 }
 0x137   : > { %v2788_v63 = vpop.f32.mrb[4].mxu0  ;;  %3055 = vmatprep.subr.bf16.mxu1 %v3054_v61  ;;  %v614_v7 = vsub.f32 1.0, %v602_v59  ;;  %v610_v38 = vand.u32 2147483647, %v598_v6 }
 0x138   : > { %v318_v0 = vpop.f32.mrb[5].mxu0  ;;  %3057 = vmatpush3.bf16.msra.mxu1 %v3054_v61  ;;  %v592_v61 = vsub.f32 %v580_v18, %v3340_v4  ;;  %v620_v18 = vsub.f32 1.0, %v608_v17 }
 0x139   : > { %v3058_v25 = vpack.c.bf16 %v2788_v63, %v318_v0  ;;  %v593_v63 = vsub.f32 %v581_v34, %v3340_v4  ;;  %v583_v0 = vmin.f32 %v571_v58, 127.0  ;;  %v3597_v39 = vmax.f32 %v614_v7, 0.0 }
 0x13a   : > { %v604_v11 = vand.u32 2147483647, %v592_v61  ;;  %v3619_v34 = vmax.f32 %v620_v18, 0.0  ;;  %v622_v58 = vsub.f32 1.0, %v610_v38 }
 0x13b   : > { %v2791_v9 = vpop.f32.mrb[6].mxu0  ;;  %3059 = vmatprep.subr.bf16.mxu1 %v3058_v25  ;;  %v605_v16 = vand.u32 2147483647, %v593_v63  ;;  %v595_v22 = vsub.f32 %v583_v0, %v3340_v4 }
 0x13c   : > { %v328_v26 = vpop.f32.mrb[7].mxu0  ;;  %3061 = vmatpush3.bf16.msra.mxu1 %v3058_v25  ;;  %v3625_v59 = vmax.f32 %v622_v58, 0.0 }
 0x13d   : > { %v3062_v27 = vpack.c.bf16 %v2791_v9, %v328_v26  ;;  %v594_v26 = vsub.f32 %v582_v37, %v3340_v4  ;;  %v617_v43 = vsub.f32 1.0, %v605_v16  ;;  %v607_v44 = vand.u32 2147483647, %v595_v22 }
 0x13f   : > { %v2794_v24 = vpop.f32.mrb[8].mxu0  ;;  %3063 = vmatprep.subr.bf16.mxu1 %v3062_v27  ;;  %v606_v40 = vand.u32 2147483647, %v594_v26  ;;  %v3610_v48 = vmax.f32 %v617_v43, 0.0 }
 0x140   : > { %v338_v28 = vpop.f32.mrb[9].mxu0  ;;  %3065 = vmatpush3.bf16.msra.mxu1 %v3062_v27  ;;  %v615_v27 = vsub.f32 1.0, %v603_v62 }
 0x141   : > { %v3066_v29 = vpack.c.bf16 %v2794_v24, %v338_v28  ;;  %v616_v28 = vsub.f32 1.0, %v604_v11 }
 0x142   : > { %v3602_v42 = vmax.f32 %v615_v27, 0.0 }
 0x143   : > { %v2797_v45 = vpop.f32.mrb[10].mxu0  ;;  %3067 = vmatprep.subr.bf16.mxu1 %v3066_v29  ;;  %v3606_v46 = vmax.f32 %v616_v28, 0.0 }
 0x144   : > { %v348_v47 = vpop.f32.mrb[11].mxu0  ;;  %3069 = vmatpush3.bf16.msra.mxu1 %v3066_v29 }
 0x145   : > { %v3070_v50 = vpack.c.bf16 %v2797_v45, %v348_v47  ;;  %v597_v45 = vsub.f32 %v585_v23, %v3340_v4  ;;  %v618_v47 = vsub.f32 1.0, %v606_v40 }
 0x147   : > { %v2800_v55 = vpop.f32.mrb[12].mxu0  ;;  %3071 = vmatprep.subr.bf16.mxu1 %v3070_v50  ;;  %v609_v51 = vand.u32 2147483647, %v597_v45 }
 0x148   : > { %v358_v57 = vpop.f32.mrb[13].mxu0  ;;  %3073 = vmatpush3.bf16.msra.mxu1 %v3070_v50  ;;  %v619_v50 = vsub.f32 1.0, %v607_v44 }
 0x149   : > { %v3074_v5 = vpack.c.bf16 %v2800_v55, %v358_v57  ;;  %v3613_v55 = vmax.f32 %v618_v47, 0.0  ;;  %v621_v56 = vsub.f32 1.0, %v609_v51 }
 0x14a   : > { %v3616_v4 = vmax.f32 %v619_v50, 0.0 }
 0x14b   : > { %v2803_v60 = vpop.f32.mrb[14].mxu0  ;;  %3075 = vmatprep.subr.bf16.mxu1 %v3074_v5 }
 0x14c   : > { %v368_v49 = vpop.f32.mrb[15].mxu0  ;;  %3077 = vmatpush3.bf16.msra.mxu1 %v3074_v5  ;;  %v3622_v5 = vmax.f32 %v621_v56, 0.0 }
 0x14d   : > { %v3078_v25 = vpack.c.bf16 %v2803_v60, %v368_v49 }
 0x14f   : > { %v2806_v9 = vpop.f32.mrb[16].mxu0  ;;  %3079 = vmatprep.subr.bf16.mxu1 %v3078_v25 }
 0x150   : > { %v378_v12 = vpop.f32.mrb[17].mxu0  ;;  %3081 = vmatpush3.bf16.msra.mxu1 %v3078_v25 }
 0x151   : > { %v3082_v24 = vpack.c.bf16 %v2806_v9, %v378_v12 }
 0x153   : > { %v2809_v13 = vpop.f32.mrb[18].mxu0  ;;  %2885 = vmatmul.mubr.f32.vlgmr.msra.gmra.mrb[0].mxu1 %v3591_v1  ;;  %3083 = vmatprep.subr.bf16.mxu1 %v3082_v24 }
 0x154   : > { %v388_v29 = vpop.f32.mrb[19].mxu0  ;;  %3085 = vmatpush3.bf16.msra.mxu1 %v3082_v24  ;;  %2887 = vmatprep.mubr.f32.mxu1 %v3593_v2 }
 0x155   : > { %v3086_v15 = vpack.c.bf16 %v2809_v13, %v388_v29 }
 0x157   : > { %v2812_v30 = vpop.f32.mrb[20].mxu0  ;;  %3087 = vmatprep.subr.bf16.mxu1 %v3086_v15  ;;  %2888 = vmatmul.mubr.f32.gmra.mrb[2].mxu1 %v3597_v39 }
 0x158   : > { %v398_v32 = vpop.f32.mrb[21].mxu0  ;;  %3089 = vmatpush3.bf16.msra.mxu1 %v3086_v15  ;;  %2890 = vmatprep.mubr.f32.mxu1 %v3602_v42 }
 0x159   : > { %v3090_v53 = vpack.c.bf16 %v2812_v30, %v398_v32  ;;  %v3656_v32 = vstv %s44_s15 }
 0x15b   : > { %v2815_v54 = vpop.f32.mrb[22].mxu0  ;;  %3091 = vmatprep.subr.bf16.mxu1 %v3090_v53  ;;  %2891 = vmatmul.mubr.f32.gmra.mrb[4].mxu1 %v3606_v46 }
 0x15c   : > { %v408_v33 = vpop.f32.mrb[23].mxu0  ;;  %3093 = vmatpush3.bf16.msra.mxu1 %v3090_v53  ;;  %2893 = vmatprep.mubr.f32.mxu1 %v3610_v48 }
 0x15d   : > { %v3094_v57 = vpack.c.bf16 %v2815_v54, %v408_v33 }
 0x15f   : > { %v2818_v19 = vpop.f32.mrb[24].mxu0  ;;  %3095 = vmatprep.subr.bf16.mxu1 %v3094_v57  ;;  %2894 = vmatmul.mubr.f32.gmra.mrb[6].mxu1 %v3613_v55 }
 0x160   : > { %v418_v3 = vpop.f32.mrb[25].mxu0  ;;  %3097 = vmatpush3.bf16.msra.mxu1 %v3094_v57  ;;  %2896 = vmatprep.mubr.f32.mxu1 %v3616_v4 }
 0x161   : > { %v3098_v8 = vpack.c.bf16 %v2818_v19, %v418_v3 }
 0x163   : > { %v2821_v20 = vpop.f32.mrb[26].mxu0  ;;  %3099 = vmatprep.subr.bf16.mxu1 %v3098_v8  ;;  %2897 = vmatmul.mubr.f32.gmra.mrb[8].mxu1 %v3619_v34 }
 0x164   : > { %v428_v60 = vpop.f32.mrb[27].mxu0  ;;  %3101 = vmatpush3.bf16.msra.mxu1 %v3098_v8  ;;  %2899 = vmatprep.mubr.f32.mxu1 %v3622_v5 }
 0x165   : > { %v3102_v61 = vpack.c.bf16 %v2821_v20, %v428_v60 }
 0x167   : > { %v2824_v37 = vpop.f32.mrb[28].mxu0  ;;  %3103 = vmatprep.subr.bf16.mxu1 %v3102_v61  ;;  %2900 = vmatmul.mubr.f32.gmra.mrb[10].mxu1 %v3625_v59 }
 0x168   : > { %v438_v21 = vpop.f32.mrb[29].mxu0  ;;  %3105 = vmatpush3.bf16.msra.mxu1 %v3102_v61  ;;  %2934 = vmatprep.mubr.f32.mxu1 %v3542_v36 }
 0x169   : > { %v3106_v35 = vpack.c.bf16 %v2824_v37, %v438_v21 }
 0x16b   : > { %v2827_v49 = vpop.f32.mrb[30].mxu0  ;;  %3107 = vmatprep.subr.bf16.mxu1 %v3106_v35 }
 0x16c   : > { %v448_v62 = vpop.f32.mrb[31].mxu0  ;;  %3109 = vmatpush3.bf16.msra.mxu1 %v3106_v35 }
 0x16d   : > { %v3110_v63 = vpack.c.bf16 %v2827_v49, %v448_v62 }
 0x16f   : > { %v2830_v0 = vpop.f32.mrb[32].mxu0  ;;  %3111 = vmatprep.subr.bf16.mxu1 %v3110_v63 }
 0x170   : > { %v458_v10 = vpop.f32.mrb[33].mxu0  ;;  %3113 = vmatpush3.bf16.msra.mxu1 %v3110_v63 }
 0x171   : > { %v3114_v25 = vpack.c.bf16 %v2830_v0, %v458_v10 }
 0x173   : > { %v2833_v7 = vpop.f32.mrb[34].mxu0  ;;  %2935 = vmatmul.mubr.f32.vlgmr.msra.gmra.mrb[12].mxu1 %v3591_v1  ;;  %3115 = vmatprep.subr.bf16.mxu1 %v3114_v25 }
 0x174   : > { %v468_v9 = vpop.f32.mrb[35].mxu0  ;;  %3117 = vmatpush3.bf16.msra.mxu1 %v3114_v25  ;;  %2937 = vmatprep.mubr.f32.mxu1 %v3593_v2 }
 0x175   : > { %v3118_v11 = vpack.c.bf16 %v2833_v7, %v468_v9 }
 0x177   : > { %v2836_v26 = vpop.f32.mrb[36].mxu0  ;;  %2938 = vmatmul.mubr.f32.gmra.mrb[14].mxu1 %v3597_v39  ;;  %3119 = vmatprep.subr.bf16.mxu1 %v3118_v11 }
 0x178   : > { %v478_v31 = vpop.f32.mrb[37].mxu0  ;;  %3121 = vmatpush3.bf16.msra.mxu1 %v3118_v11  ;;  %2940 = vmatprep.mubr.f32.mxu1 %v3602_v42 }
 0x179   : > { %v3122_v52 = vpack.c.bf16 %v2836_v26, %v478_v31 }
 0x17b   : > { %v2839_v12 = vpop.f32.mrb[38].mxu0  ;;  %2941 = vmatmul.mubr.f32.gmra.mrb[16].mxu1 %v3606_v46  ;;  %3123 = vmatprep.subr.bf16.mxu1 %v3122_v52 }
 0x17c   : > { %v488_v27 = vpop.f32.mrb[39].mxu0  ;;  %3125 = vmatpush3.bf16.msra.mxu1 %v3122_v52  ;;  %2943 = vmatprep.mubr.f32.mxu1 %v3610_v48 }
 0x17d   : > { %v3126_v16 = vpack.c.bf16 %v2839_v12, %v488_v27 }
 0x17f   : > { %v2842_v22 = vpop.f32.mrb[40].mxu0  ;;  %2944 = vmatmul.mubr.f32.gmra.mrb[18].mxu1 %v3613_v55  ;;  %3127 = vmatprep.subr.bf16.mxu1 %v3126_v16 }
 0x180   : > { %v498_v23 = vpop.f32.mrb[41].mxu0  ;;  %3129 = vmatpush3.bf16.msra.mxu1 %v3126_v16  ;;  %2946 = vmatprep.mubr.f32.mxu1 %v3616_v4 }
 0x181   : > { %v3130_v24 = vpack.c.bf16 %v2842_v22, %v498_v23 }
 0x183   : > { %v2845_v13 = vpop.f32.mrb[42].mxu0  ;;  %2947 = vmatmul.mubr.f32.gmra.mrb[20].mxu1 %v3619_v34  ;;  %3131 = vmatprep.subr.bf16.mxu1 %v3130_v24 }
 0x184   : > { %v508_v28 = vpop.f32.mrb[43].mxu0  ;;  %3133 = vmatpush3.bf16.msra.mxu1 %v3130_v24  ;;  %2949 = vmatprep.mubr.f32.mxu1 %v3622_v5 }
 0x185   : > { %v3134_v40 = vpack.c.bf16 %v2845_v13, %v508_v28 }
 0x187   : > { %v2848_v41 = vpop.f32.mrb[44].mxu0  ;;  %2950 = vmatmul.mubr.f32.gmra.mrb[22].mxu1 %v3625_v59  ;;  %3135 = vmatprep.subr.bf16.mxu1 %v3134_v40 }
 0x188   : > { %v518_v14 = vpop.f32.mrb[45].mxu0  ;;  %3137 = vmatpush3.bf16.msra.mxu1 %v3134_v40  ;;  %2984 = vmatprep.mubr.f32.mxu1 %v3542_v36 }
 0x189   : > { %v3138_v29 = vpack.c.bf16 %v2848_v41, %v518_v14 }
 0x18b   : > { %v2851_v43 = vpop.f32.mrb[46].mxu0  ;;  %3139 = vmatprep.subr.bf16.mxu1 %v3138_v29 }
 0x18c   : > { %v528_v44 = vpop.f32.mrb[47].mxu0  ;;  %3141 = vmatpush3.bf16.msra.mxu1 %v3138_v29 }
 0x18d   : > { %v3142_v45 = vpack.c.bf16 %v2851_v43, %v528_v44 }
 0x18f   : > { %3143 = vmatprep.subr.bf16.mxu1 %v3142_v45 }
 0x190   : > { %3145 = vmatpush3.bf16.msra.mxu1 %v3142_v45 }
 0x193   : > { %2985 = vmatmul.mubr.f32.vlgmr.msra.gmra.mrb[24].mxu1 %v3591_v1 }
 0x194   : > { %2987 = vmatprep.mubr.f32.mxu1 %v3593_v2 }
 0x197   : > { %2988 = vmatmul.mubr.f32.gmra.mrb[26].mxu1 %v3597_v39 }
 0x198   : > { %2990 = vmatprep.mubr.f32.mxu1 %v3602_v42 }
 0x19b   : > { %2991 = vmatmul.mubr.f32.gmra.mrb[28].mxu1 %v3606_v46 }
 0x19c   : > { %2993 = vmatprep.mubr.f32.mxu1 %v3610_v48 }
 0x19f   : > { %2994 = vmatmul.mubr.f32.gmra.mrb[30].mxu1 %v3613_v55 }
 0x1a0   : > { %2996 = vmatprep.mubr.f32.mxu1 %v3616_v4 }
 0x1a3   : > { %2997 = vmatmul.mubr.f32.gmra.mrb[32].mxu1 %v3619_v34 }
 0x1a4   : > { %2999 = vmatprep.mubr.f32.mxu1 %v3622_v5 }
 0x1a7   : > { %3000 = vmatmul.mubr.f32.gmra.mrb[34].mxu1 %v3625_v59 }
 0x226   : > { %v2886_v36 = vpop.f32.mrb[0].mxu1 }
 0x227   : > { %v701_v1 = vpop.f32.mrb[1].mxu1  ;;  %v1012_v50 = vmul.f32 %v2886_v36, %v3656_v32 }
 0x228   : > { %v1011_v51 = vmul.f32 %v3656_v32, %v701_v1 }
 0x229   : > { %v1024_v55 = vmax.f32 %v1012_v50, 0.0 }
 0x22a   : > { %v2889_v2 = vpop.f32.mrb[2].mxu1  ;;  %v1023_v18 = vmax.f32 %v1011_v51, 0.0 }
 0x22b   : > { %v711_v39 = vpop.f32.mrb[3].mxu1  ;;  %v1014_v53 = vmul.f32 %v2889_v2, %v3656_v32  ;;  %v3665_v56 = vmin.f32 %v1024_v55, 1.0 }
 0x22c   : > { %v1013_v54 = vmul.f32 %v3656_v32, %v711_v39  ;;  %v3668_v34 = vmin.f32 %v1023_v18, 1.0 }
 0x22d   : > { %v1026_v38 = vmax.f32 %v1014_v53, 0.0  ;;  %v1120_v61 = vmul.f32 0.299, %v3665_v56 }
 0x22e   : > { %v2892_v15 = vpop.f32.mrb[4].mxu1  ;;  %v1025_v33 = vmax.f32 %v1013_v54, 0.0  ;;  %v1119_v49 = vmul.f32 0.299, %v3668_v34 }
 0x22f   : > { %v721_v42 = vpop.f32.mrb[5].mxu1  ;;  %v1016_v4 = vmul.f32 %v2892_v15, %v3656_v32  ;;  %v3671_v5 = vmin.f32 %v1026_v38, 1.0 }
 0x230   : > { %v1015_v57 = vmul.f32 %v3656_v32, %v721_v42  ;;  %v3674_v20 = vmin.f32 %v1025_v33, 1.0 }
 0x231   : > { %v1028_v59 = vmax.f32 %v1016_v4, 0.0  ;;  %v1122_v25 = vmul.f32 0.299, %v3671_v5 }
 0x232   : > { %v2895_v30 = vpop.f32.mrb[6].mxu1  ;;  %v1027_v37 = vmax.f32 %v1015_v57, 0.0  ;;  %v1121_v26 = vmul.f32 0.299, %v3674_v20 }
 0x233   : > { %v731_v46 = vpop.f32.mrb[7].mxu1  ;;  %v1018_v62 = vmul.f32 %v2895_v30, %v3656_v32  ;;  %v3688_v31 = vmin.f32 %v1028_v59, 1.0 }
 0x234   : > { %v1017_v7 = vmul.f32 %v3656_v32, %v731_v46  ;;  %v3691_v27 = vmin.f32 %v1027_v37, 1.0 }
 0x235   : > { %v1030_v24 = vmax.f32 %v1018_v62, 0.0  ;;  %v1124_v45 = vmul.f32 0.299, %v3688_v31 }
 0x236   : > { %v2898_v47 = vpop.f32.mrb[8].mxu1  ;;  %v1029_v14 = vmax.f32 %v1017_v7, 0.0  ;;  %v1123_v39 = vmul.f32 0.299, %v3691_v27 }
 0x237   : > { %v741_v17 = vpop.f32.mrb[9].mxu1  ;;  %v1020_v36 = vmul.f32 %v2898_v47, %v3656_v32  ;;  %v3710_v50 = vmin.f32 %v1030_v24, 1.0 }
 0x238   : > { %v1019_v15 = vmul.f32 %v3656_v32, %v741_v17  ;;  %v3717_v55 = vmin.f32 %v1029_v14, 1.0 }
 0x239   : > { %v1032_v33 = vmax.f32 %v1020_v36, 0.0 }
 0x23a   : > { %v3654_v6 = vpop.f32.mrb[10].mxu1 }
 0x23b   : > { %v3658_v48 = vpop.f32.mrb[11].mxu1  ;;  %v1022_v4 = vmul.f32 %v3654_v6, %v3656_v32 }
 0x246   : > { %v2936_v19 = vpop.f32.mrb[12].mxu1 }
 0x247   : > { %v1048_v58 = vmul.f32 %v2936_v19, %v3656_v32  ;;  %v826_v3 = vpop.f32.mrb[13].mxu1 }
 0x248   : > { %v1047_v8 = vmul.f32 %v3656_v32, %v826_v3  ;;  %v1021_v3 = vmul.f32 %v3656_v32, %v3658_v48 }
 0x249   : > { %v1060_v60 = vmax.f32 %v1048_v58, 0.0  ;;  %v1031_v58 = vmax.f32 %v1019_v15, 0.0 }
 0x24a   : > { %v1059_v21 = vmax.f32 %v1047_v8, 0.0  ;;  %v2939_v35 = vpop.f32.mrb[14].mxu1 }
 0x24b   : > { %v3679_v63 = vmin.f32 %v1060_v60, 1.0  ;;  %v1050_v0 = vmul.f32 %v2939_v35, %v3656_v32  ;;  %v836_v10 = vpop.f32.mrb[15].mxu1 }
 0x24c   : > { %v3684_v9 = vmin.f32 %v1059_v21, 1.0  ;;  %v1049_v11 = vmul.f32 %v3656_v32, %v836_v10  ;;  %v3742_v10 = vmin.f32 %v1032_v33, 1.0 }
 0x24d   : > { %v1132_v52 = vmul.f32 0.587, %v3679_v63  ;;  %v1062_v12 = vmax.f32 %v1050_v0, 0.0 }
 0x24e   : > { %v1131_v16 = vmul.f32 0.587, %v3684_v9  ;;  %v1061_v22 = vmax.f32 %v1049_v11, 0.0  ;;  %v2942_v23 = vpop.f32.mrb[16].mxu1  ;;  %v1128_v36 = vmul.f32 0.299, %v3742_v10 }
 0x24f   : > { %v3694_v13 = vadd.f32 %v1132_v52, %v1120_v61  ;;  %v3696_v28 = vmin.f32 %v1062_v12, 1.0  ;;  %v1052_v40 = vmul.f32 %v2942_v23, %v3656_v32  ;;  %v846_v41 = vpop.f32.mrb[17].mxu1  ;;  %v1126_v61 = vmul.f32 0.299, %v3710_v50 }
 0x250   : > { %v3699_v29 = vadd.f32 %v1131_v16, %v1119_v49  ;;  %v3701_v43 = vmin.f32 %v1061_v22, 1.0  ;;  %v1051_v44 = vmul.f32 %v3656_v32, %v846_v41  ;;  %v1125_v49 = vmul.f32 0.299, %v3717_v55 }
 0x251   : > { %v1134_v1 = vmul.f32 0.587, %v3696_v28  ;;  %v1064_v2 = vmax.f32 %v1052_v40, 0.0  ;;  %v1033_v52 = vmax.f32 %v1021_v3, 0.0 }
 0x252   : > { %v1133_v42 = vmul.f32 0.587, %v3701_v43  ;;  %v1063_v30 = vmax.f32 %v1051_v44, 0.0  ;;  %v2945_v46 = vpop.f32.mrb[18].mxu1 }
 0x253   : > { %v3712_v51 = vadd.f32 %v1134_v1, %v1122_v25  ;;  %v3714_v53 = vmin.f32 %v1064_v2, 1.0  ;;  %v1054_v54 = vmul.f32 %v2945_v46, %v3656_v32  ;;  %v856_v47 = vpop.f32.mrb[19].mxu1  ;;  %v1034_v25 = vmax.f32 %v1022_v4, 0.0 }
 0x254   : > { %v3719_v18 = vadd.f32 %v1133_v42, %v1121_v26  ;;  %v3721_v38 = vmin.f32 %v1063_v30, 1.0  ;;  %v1053_v17 = vmul.f32 %v3656_v32, %v856_v47  ;;  %v3745_v26 = vmin.f32 %v1031_v58, 1.0 }
 0x255   : > { %v1136_v57 = vmul.f32 0.587, %v3714_v53  ;;  %v1066_v19 = vmax.f32 %v1054_v54, 0.0  ;;  %v3759_v1 = vmin.f32 %v1034_v25, 1.0  ;;  %v3763_v42 = vmin.f32 %v1033_v52, 1.0 }
 0x256   : > { %v1135_v8 = vmul.f32 0.587, %v3721_v38  ;;  %v1065_v59 = vmax.f32 %v1053_v17, 0.0  ;;  %v2948_v60 = vpop.f32.mrb[20].mxu1  ;;  %v1127_v15 = vmul.f32 0.299, %v3745_v26 }
 0x257   : > { %v3731_v37 = vadd.f32 %v1136_v57, %v1124_v45  ;;  %v3733_v21 = vmin.f32 %v1066_v19, 1.0  ;;  %v1056_v35 = vmul.f32 %v2948_v60, %v3656_v32  ;;  %v866_v6 = vpop.f32.mrb[21].mxu1  ;;  %v1130_v4 = vmul.f32 0.299, %v3759_v1 }
 0x258   : > { %v3737_v62 = vadd.f32 %v1135_v8, %v1123_v39  ;;  %v3739_v0 = vmin.f32 %v1065_v59, 1.0  ;;  %v1055_v48 = vmul.f32 %v3656_v32, %v866_v6  ;;  %v1129_v19 = vmul.f32 0.299, %v3763_v42 }
 0x259   : > { %v1138_v7 = vmul.f32 0.587, %v3733_v21  ;;  %v1068_v11 = vmax.f32 %v1056_v35, 0.0 }
 0x25a   : > { %v1137_v12 = vmul.f32 0.587, %v3739_v0  ;;  %v1067_v16 = vmax.f32 %v1055_v48, 0.0  ;;  %v2951_v22 = vpop.f32.mrb[22].mxu1 }
 0x25b   : > { %v3748_v23 = vadd.f32 %v1138_v7, %v1126_v61  ;;  %v3750_v24 = vmin.f32 %v1068_v11, 1.0  ;;  %v1058_v40 = vmul.f32 %v2951_v22, %v3656_v32  ;;  %v876_v41 = vpop.f32.mrb[23].mxu1 }
 0x25c   : > { %v3753_v14 = vadd.f32 %v1137_v12, %v1125_v49  ;;  %v3755_v44 = vmin.f32 %v1067_v16, 1.0  ;;  %v1057_v45 = vmul.f32 %v3656_v32, %v876_v41 }
 0x25d   : > { %v1140_v2 = vmul.f32 0.587, %v3750_v24  ;;  %v1070_v39 = vmax.f32 %v1058_v40, 0.0 }
 0x25e   : > { %v1139_v30 = vmul.f32 0.587, %v3755_v44  ;;  %v1069_v46 = vmax.f32 %v1057_v45, 0.0 }
 0x25f   : > { %v3766_v54 = vadd.f32 %v1140_v2, %v1128_v36  ;;  %v3768_v47 = vmin.f32 %v1070_v39, 1.0 }
 0x260   : > { %v3770_v17 = vadd.f32 %v1139_v30, %v1127_v15  ;;  %v3772_v33 = vmin.f32 %v1069_v46, 1.0 }
 0x261   : > { %v1142_v57 = vmul.f32 0.587, %v3768_v47 }
 0x262   : > { %v1141_v58 = vmul.f32 0.587, %v3772_v33 }
 0x263   : > { %v3778_v3 = vadd.f32 %v1142_v57, %v1130_v4 }
 0x264   : > { %v3780_v8 = vadd.f32 %v1141_v58, %v1129_v19 }
 0x266   : > { %v2986_v59 = vpop.f32.mrb[24].mxu1 }
 0x267   : > { %v1084_v60 = vmul.f32 %v2986_v59, %v3656_v32  ;;  %v951_v61 = vpop.f32.mrb[25].mxu1 }
 0x268   : > { %v1083_v35 = vmul.f32 %v3656_v32, %v951_v61 }
 0x269   : > { %v1096_v6 = vmax.f32 %v1084_v60, 0.0 }
 0x26a   : > { %v1095_v49 = vmax.f32 %v1083_v35, 0.0  ;;  %v2989_v48 = vpop.f32.mrb[26].mxu1 }
 0x26b   : > { %v3784_v25 = vmin.f32 %v1096_v6, 1.0  ;;  %v1086_v7 = vmul.f32 %v2989_v48, %v3656_v32  ;;  %v961_v11 = vpop.f32.mrb[27].mxu1 }
 0x26c   : > { %v3787_v52 = vmin.f32 %v1095_v49, 1.0  ;;  %v1085_v12 = vmul.f32 %v3656_v32, %v961_v11 }
 0x26d   : > { %v1156_v16 = vmul.f32 0.114, %v3784_v25  ;;  %v1098_v22 = vmax.f32 %v1086_v7, 0.0 }
 0x26e   : > { %v1155_v40 = vmul.f32 0.114, %v3787_v52  ;;  %v1097_v41 = vmax.f32 %v1085_v12, 0.0  ;;  %v2992_v45 = vpop.f32.mrb[28].mxu1 }
 0x26f   : > { %v1168_v36 = vadd.f32 %v1156_v16, %v3694_v13  ;;  %v3793_v2 = vmin.f32 %v1098_v22, 1.0  ;;  %v1088_v39 = vmul.f32 %v2992_v45, %v3656_v32  ;;  %v971_v15 = vpop.f32.mrb[29].mxu1 }
 0x270   : > { %v1167_v30 = vadd.f32 %v1155_v40, %v3699_v29  ;;  %v3797_v46 = vmin.f32 %v1097_v41, 1.0  ;;  %v1087_v4 = vmul.f32 %v3656_v32, %v971_v15 }
 0x271   : > { %v1158_v57 = vmul.f32 0.114, %v3793_v2  ;;  %v1100_v19 = vmax.f32 %v1088_v39, 0.0 }
 0x272   : > { %v1179_v58 = vadd.f32 %v1168_v36, %v1167_v30  ;;  %v1157_v59 = vmul.f32 0.114, %v3797_v46  ;;  %v1099_v60 = vmax.f32 %v1087_v4, 0.0  ;;  %v2995_v61 = vpop.f32.mrb[30].mxu1 }
 0x273   : > { %v1170_v13 = vadd.f32 %v1158_v57, %v3712_v51  ;;  %v3803_v35 = vmin.f32 %v1100_v19, 1.0  ;;  %v1090_v6 = vmul.f32 %v2995_v61, %v3656_v32  ;;  %v981_v49 = vpop.f32.mrb[31].mxu1 }
 0x274   : > { %v1169_v29 = vadd.f32 %v1157_v59, %v3719_v18  ;;  %v3807_v48 = vmin.f32 %v1099_v60, 1.0  ;;  %v1089_v7 = vmul.f32 %v3656_v32, %v981_v49 }
 0x275   : > { %v1160_v11 = vmul.f32 0.114, %v3803_v35  ;;  %v1102_v12 = vmax.f32 %v1090_v6, 0.0 }
 0x276   : > { %v1180_v16 = vadd.f32 %v1179_v58, %v1169_v29  ;;  %v1159_v22 = vmul.f32 0.114, %v3807_v48  ;;  %v1101_v40 = vmax.f32 %v1089_v7, 0.0  ;;  %v2998_v41 = vpop.f32.mrb[32].mxu1 }
 0x277   : > { %v1172_v51 = vadd.f32 %v1160_v11, %v3731_v37  ;;  %v3813_v45 = vmin.f32 %v1102_v12, 1.0  ;;  %v1092_v36 = vmul.f32 %v2998_v41, %v3656_v32  ;;  %v991_v39 = vpop.f32.mrb[33].mxu1 }
 0x278   : > { %v1171_v18 = vadd.f32 %v1159_v22, %v3737_v62  ;;  %v1181_v15 = vadd.f32 %v1180_v16, %v1170_v13  ;;  %v3817_v30 = vmin.f32 %v1101_v40, 1.0  ;;  %v1091_v4 = vmul.f32 %v3656_v32, %v991_v39 }
 0x279   : > { %v1162_v57 = vmul.f32 0.114, %v3813_v45  ;;  %v1104_v19 = vmax.f32 %v1092_v36, 0.0 }
 0x27a   : > { %v1182_v58 = vadd.f32 %v1181_v15, %v1171_v18  ;;  %v1161_v59 = vmul.f32 0.114, %v3817_v30  ;;  %v1103_v60 = vmax.f32 %v1091_v4, 0.0  ;;  %v3001_v37 = vpop.f32.mrb[34].mxu1 }
 0x27b   : > { %v1174_v61 = vadd.f32 %v1162_v57, %v3748_v23  ;;  %v3823_v6 = vmin.f32 %v1104_v19, 1.0  ;;  %v1094_v49 = vmul.f32 %v3001_v37, %v3656_v32  ;;  %v1001_v62 = vpop.f32.mrb[35].mxu1 }
 0x27c   : > { %v1173_v13 = vadd.f32 %v1161_v59, %v3753_v14  ;;  %v1183_v29 = vadd.f32 %v1182_v58, %v1172_v51  ;;  %v3827_v7 = vmin.f32 %v1103_v60, 1.0  ;;  %v1093_v11 = vmul.f32 %v3656_v32, %v1001_v62 }
 0x27d   : > { %v1164_v12 = vmul.f32 0.114, %v3823_v6  ;;  %v1106_v16 = vmax.f32 %v1094_v49, 0.0 }
 0x27e   : > { %v1184_v22 = vadd.f32 %v1183_v29, %v1173_v13  ;;  %v1163_v40 = vmul.f32 0.114, %v3827_v7  ;;  %v1105_v41 = vmax.f32 %v1093_v11, 0.0  ;;  %v3849_v13 = vstv %s1421_s20 }
 0x27f   : > { %v1176_v23 = vadd.f32 %v1164_v12, %v3766_v54  ;;  %v3833_v36 = vmin.f32 %v1106_v16, 1.0 }
 0x280   : > { %v1175_v39 = vadd.f32 %v1163_v40, %v3770_v17  ;;  %v3836_v18 = vmin.f32 %v1105_v41, 1.0  ;;  %v1185_v14 = vadd.f32 %v1184_v22, %v1174_v61 }
 0x281   : > { %v1166_v51 = vmul.f32 0.114, %v3833_v36 }
 0x282   : > { %v1165_v32 = vmul.f32 0.114, %v3836_v18  ;;  %v1186_v15 = vadd.f32 %v1185_v14, %v1175_v39 }
 0x283   : > { %v1178_v4 = vadd.f32 %v1166_v51, %v3778_v3  ;;  %v1200_v3 = vstv %s3844_s18 }
 0x284   : > { %v1177_v57 = vadd.f32 %v1165_v32, %v3780_v8  ;;  %v1187_v19 = vadd.f32 %v1186_v15, %v1176_v23  ;;  %v3847_v8 = vstv %s48_s19  ;;  %v1202_v29 = vmul.f32 %v1200_v3, %v3665_v56 }
 0x285   : > { %v1201_v11 = vmul.f32 %v1200_v3, %v3668_v34  ;;  %v1204_v12 = vmul.f32 %v1200_v3, %v3671_v5  ;;  %v1203_v16 = vmul.f32 %v1200_v3, %v3674_v20  ;;  %v1206_v22 = vmul.f32 %v1200_v3, %v3688_v31 }
 0x286   : > { %v1188_v54 = vadd.f32 %v1187_v19, %v1177_v57  ;;  %v1205_v40 = vmul.f32 %v1200_v3, %v3691_v27  ;;  %v1208_v41 = vmul.f32 %v1200_v3, %v3710_v50  ;;  %v1207_v23 = vmul.f32 %v1200_v3, %v3717_v55 }
 0x287   : > { %v1210_v39 = vmul.f32 %v1200_v3, %v3742_v10  ;;  %v1209_v14 = vmul.f32 %v1200_v3, %v3745_v26  ;;  %v1212_v56 = vmul.f32 %v1200_v3, %v3759_v1  ;;  %v1211_v34 = vmul.f32 %v1200_v3, %v3763_v42 }
 0x288   : > { %v1189_v58 = vadd.f32 %v1188_v54, %v1178_v4  ;;  %v3864_v5 = vmul.f32 %v1200_v3, %v3679_v63  ;;  %v3868_v20 = vmul.f32 %v1200_v3, %v3684_v9  ;;  %v3871_v31 = vmul.f32 %v1200_v3, %v3696_v28 }
 0x289   : > { %v3874_v27 = vmul.f32 %v1200_v3, %v3701_v43  ;;  %v3877_v50 = vmul.f32 %v1200_v3, %v3714_v53  ;;  %v1256_v55 = vmul.f32 %v1200_v3, %v3721_v38  ;;  %v3881_v10 = vmul.f32 %v1200_v3, %v3733_v21 }
 0x28a   : > { %1190 = vadd.xlane.f32.xlu0 %v1189_v58  ;;  %v1258_v63 = vmul.f32 %v1200_v3, %v3739_v0  ;;  %v3885_v9 = vmul.f32 %v1200_v3, %v3750_v24  ;;  %v1260_v28 = vmul.f32 %v1200_v3, %v3755_v44  ;;  %v3889_v43 = vmul.f32 %v1200_v3, %v3768_v47 }
 0x28b   : > { %v1262_v53 = vmul.f32 %v1200_v3, %v3772_v33  ;;  %v3893_v26 = vmul.f32 %v1200_v3, %v3784_v25  ;;  %v3896_v38 = vmul.f32 %v1200_v3, %v3787_v52  ;;  %v3899_v21 = vmul.f32 %v1200_v3, %v3793_v2 }
 0x28c   : > { %v3902_v0 = vmul.f32 %v1200_v3, %v3797_v46  ;;  %v3905_v24 = vmul.f32 %v1200_v3, %v3803_v35  ;;  %v3908_v44 = vmul.f32 %v1200_v3, %v3807_v48  ;;  %v3911_v1 = vmul.f32 %v1200_v3, %v3813_v45 }
 0x28d   : > { %v3914_v42 = vmul.f32 %v1200_v3, %v3817_v30  ;;  %v3917_v47 = vmul.f32 %v1200_v3, %v3823_v6  ;;  %v3920_v33 = vmul.f32 %v1200_v3, %v3827_v7  ;;  %v3923_v25 = vmul.f32 %v1200_v3, %v3833_v36 }
 0x28e   : > { %v3926_v52 = vmul.f32 %v1200_v3, %v3836_v18 }
 0x317   : > { %v1191_v59 = vpop.xlane.xlu0 %1190 }
 0x318   : > { %v1192_v17 = vrot.slane %v1191_v59, 4 }
 0x31a   : > { %v1193_v60 = vadd.f32 %v1192_v17, %v1191_v59 }
 0x31c   : > { %v1194_v37 = vrot.slane %v1193_v60, 2 }
 0x31e   : > { %v1195_v61 = vadd.f32 %v1194_v37, %v1193_v60 }
 0x320   : > { %v1196_v49 = vrot.slane %v1195_v61, 1 }
 0x322   : > { %v1197_v62 = vadd.f32 %v1196_v49, %v1195_v61 }
 0x324   : > { %3146 = vpush %v1197_v62 }
 0x355   : > { %s3147_s22 = spop %3146 }
 0x356   : > { %s1199_s23 = smul.f32 0.000108506945, %s3147_s22 }
 0x358   : > { %s1214_s24 = smul.f32 %s1213_s21, %s1199_s23 }
 0x35a   : > { %v3928_v2 = vstv %s1214_s24 }
 0x35b   : > { %v1216_v46 = vadd.f32 %v3928_v2, %v1201_v11  ;;  %v1217_v35 = vadd.f32 %v3928_v2, %v1202_v29  ;;  %v1218_v48 = vadd.f32 %v3928_v2, %v1203_v16  ;;  %v1219_v45 = vadd.f32 %v3928_v2, %v1204_v12 }
 0x35c   : > { %v1220_v30 = vadd.f32 %v3928_v2, %v1205_v40  ;;  %v1221_v6 = vadd.f32 %v3928_v2, %v1206_v22  ;;  %v1222_v7 = vadd.f32 %v3928_v2, %v1207_v23  ;;  %v1223_v36 = vadd.f32 %v3928_v2, %v1208_v41 }
 0x35d   : > { %v1224_v18 = vadd.f32 %v3928_v2, %v1209_v14  ;;  %v1225_v51 = vadd.f32 %v3928_v2, %v1210_v39  ;;  %v1226_v32 = vadd.f32 %v3928_v2, %v1211_v34  ;;  %v1227_v15 = vadd.f32 %v3928_v2, %v1212_v56 }
 0x35e   : > { %v1228_v4 = vmax.f32 %v1216_v46, 0.0  ;;  %v1229_v57 = vmax.f32 %v1217_v35, 0.0  ;;  %v1230_v19 = vmax.f32 %v1218_v48, 0.0  ;;  %v1231_v54 = vmax.f32 %v1219_v45, 0.0 }
 0x35f   : > { %v1232_v58 = vmax.f32 %v1220_v30, 0.0  ;;  %v1233_v59 = vmax.f32 %v1221_v6, 0.0  ;;  %v1234_v17 = vmax.f32 %v1222_v7, 0.0  ;;  %v1235_v60 = vmax.f32 %v1223_v36, 0.0 }
 0x360   : > { %v1236_v37 = vmax.f32 %v1224_v18, 0.0  ;;  %v1237_v61 = vmax.f32 %v1225_v51, 0.0  ;;  %v1238_v49 = vmax.f32 %v1226_v32, 0.0  ;;  %v1239_v62 = vmax.f32 %v1227_v15, 0.0 }
 0x361   : > { %v3942_v3 = vmin.f32 %v1228_v4, 1.0  ;;  %v3944_v29 = vmin.f32 %v1229_v57, 1.0  ;;  %v3946_v11 = vmin.f32 %v1230_v19, 1.0  ;;  %v3948_v12 = vmin.f32 %v1231_v54, 1.0 }
 0x362   : > { %v3950_v16 = vmin.f32 %v1232_v58, 1.0  ;;  %v3952_v22 = vmin.f32 %v1233_v59, 1.0  ;;  %v3954_v40 = vmin.f32 %v1234_v17, 1.0  ;;  %v3956_v41 = vmin.f32 %v1235_v60, 1.0 }
 0x363   : > { %v3958_v23 = vmin.f32 %v1236_v37, 1.0  ;;  %v3960_v39 = vmin.f32 %v1237_v61, 1.0  ;;  %v3962_v14 = vmin.f32 %v1238_v49, 1.0  ;;  %v3964_v56 = vmin.f32 %v1239_v62, 1.0 }
 0x364   : > { %v1264_v34 = vadd.f32 %v3868_v20, %v3928_v2  ;;  %v1265_v46 = vadd.f32 %v3864_v5, %v3928_v2  ;;  %v1266_v35 = vadd.f32 %v3874_v27, %v3928_v2  ;;  %v1267_v48 = vadd.f32 %v3871_v31, %v3928_v2 }
 0x365   : > { %v1268_v45 = vadd.f32 %v1256_v55, %v3928_v2  ;;  %v1269_v30 = vadd.f32 %v3877_v50, %v3928_v2  ;;  %v1270_v6 = vadd.f32 %v1258_v63, %v3928_v2  ;;  %v1271_v7 = vadd.f32 %v3881_v10, %v3928_v2 }
 0x366   : > { %v1272_v20 = vadd.f32 %v1260_v28, %v3928_v2  ;;  %v1273_v5 = vadd.f32 %v3885_v9, %v3928_v2  ;;  %v1274_v27 = vadd.f32 %v1262_v53, %v3928_v2  ;;  %v1275_v31 = vadd.f32 %v3889_v43, %v3928_v2 }
 0x367   : > { %v1276_v36 = vmax.f32 %v1264_v34, 0.0  ;;  %v1277_v55 = vmax.f32 %v1265_v46, 0.0  ;;  %v1278_v18 = vmax.f32 %v1266_v35, 0.0  ;;  %v1279_v51 = vmax.f32 %v1267_v48, 0.0 }
 0x368   : > { %v1280_v50 = vmax.f32 %v1268_v45, 0.0  ;;  %v1281_v32 = vmax.f32 %v1269_v30, 0.0  ;;  %v1282_v63 = vmax.f32 %v1270_v6, 0.0  ;;  %v1283_v15 = vmax.f32 %v1271_v7, 0.0 }
 0x369   : > { %v1284_v4 = vmax.f32 %v1272_v20, 0.0  ;;  %v1285_v10 = vmax.f32 %v1273_v5, 0.0  ;;  %v1286_v57 = vmax.f32 %v1274_v27, 0.0  ;;  %v1287_v28 = vmax.f32 %v1275_v31, 0.0 }
 0x36a   : > { %v3986_v19 = vmin.f32 %v1276_v36, 1.0  ;;  %v3988_v9 = vmin.f32 %v1277_v55, 1.0  ;;  %v3990_v53 = vmin.f32 %v1278_v18, 1.0  ;;  %v3992_v54 = vmin.f32 %v1279_v51, 1.0 }
 0x36b   : > { %v3994_v43 = vmin.f32 %v1280_v50, 1.0  ;;  %v3996_v58 = vmin.f32 %v1281_v32, 1.0  ;;  %v3998_v59 = vmin.f32 %v1282_v63, 1.0  ;;  %v4000_v17 = vmin.f32 %v1283_v15, 1.0 }
 0x36c   : > { %5773 = vst [vmem:[#allocation11_spill] sm:$0xff] %v3986_v19  ;;  %5774 = vst [vmem:[#allocation12_spill] sm:$0xff] %v3988_v9  ;;  %v4002_v60 = vmin.f32 %v1284_v4, 1.0  ;;  %v4004_v37 = vmin.f32 %v1285_v10, 1.0  ;;  %v4006_v61 = vmin.f32 %v1286_v57, 1.0  ;;  %v4008_v49 = vmin.f32 %v1287_v28, 1.0 }
 0x36d   : > { %5775 = vst [vmem:[#allocation13_spill] sm:$0xff] %v3990_v53  ;;  %5776 = vst [vmem:[#allocation14_spill] sm:$0xff] %v3992_v54  ;;  %v1312_v62 = vadd.f32 %v3896_v38, %v3928_v2  ;;  %v1313_v34 = vadd.f32 %v3893_v26, %v3928_v2  ;;  %v1314_v46 = vadd.f32 %v3902_v0, %v3928_v2  ;;  %v1348_v57 = vmul.f32 0.299, %v3942_v3 }
 0x36e   : > { %5777 = vst [vmem:[#allocation15_spill] sm:$0xff] %v3994_v43  ;;  %5778 = vst [vmem:[#allocation16_spill] sm:$0xff] %v3996_v58  ;;  %v1315_v35 = vadd.f32 %v3899_v21, %v3928_v2  ;;  %v1316_v48 = vadd.f32 %v3908_v44, %v3928_v2  ;;  %v1317_v45 = vadd.f32 %v3905_v24, %v3928_v2  ;;  %v1349_v28 = vmul.f32 0.299, %v3944_v29 }
 0x36f   : > { %5779 = vst [vmem:[#allocation17_spill] sm:$0xff] %v3998_v59  ;;  %5780 = vst [vmem:[#allocation18_spill] sm:$0xff] %v4000_v17  ;;  %v1318_v30 = vadd.f32 %v3914_v42, %v3928_v2  ;;  %v1319_v38 = vadd.f32 %v3911_v1, %v3928_v2  ;;  %v1320_v26 = vadd.f32 %v3920_v33, %v3928_v2  ;;  %v1324_v6 = vmax.f32 %v1312_v62, 0.0 }
 0x370   : > { %5781 = vst [vmem:[#allocation19_spill] sm:$0xff] %v4002_v60  ;;  %5782 = vst [vmem:[#allocation20_spill] sm:$0xff] %v4006_v61  ;;  %v1321_v0 = vadd.f32 %v3917_v47, %v3928_v2  ;;  %v1322_v21 = vadd.f32 %v3926_v52, %v3928_v2  ;;  %v1323_v44 = vadd.f32 %v3923_v25, %v3928_v2  ;;  %v1325_v24 = vmax.f32 %v1313_v34, 0.0 }
 0x371   : > { %v1326_v7 = vmax.f32 %v1314_v46, 0.0  ;;  %v1327_v20 = vmax.f32 %v1315_v35, 0.0  ;;  %v1328_v42 = vmax.f32 %v1316_v48, 0.0  ;;  %v1329_v5 = vmax.f32 %v1317_v45, 0.0 }
 0x372   : > { %v1330_v27 = vmax.f32 %v1318_v30, 0.0  ;;  %v1331_v1 = vmax.f32 %v1319_v38, 0.0  ;;  %v1332_v31 = vmax.f32 %v1320_v26, 0.0  ;;  %v1333_v36 = vmax.f32 %v1321_v0, 0.0 }
 0x373   : > { %v1334_v33 = vmax.f32 %v1322_v21, 0.0  ;;  %v1335_v55 = vmax.f32 %v1323_v44, 0.0  ;;  %v4034_v18 = vmin.f32 %v1324_v6, 1.0  ;;  %v4036_v47 = vmin.f32 %v1325_v24, 1.0 }
 0x374   : > { %v4038_v52 = vmin.f32 %v1326_v7, 1.0  ;;  %v4040_v51 = vmin.f32 %v1327_v20, 1.0  ;;  %v4042_v25 = vmin.f32 %v1328_v42, 1.0  ;;  %v4044_v2 = vmin.f32 %v1329_v5, 1.0 }
 0x375   : > { %v4046_v50 = vmin.f32 %v1330_v27, 1.0  ;;  %v4048_v32 = vmin.f32 %v1331_v1, 1.0  ;;  %v4050_v63 = vmin.f32 %v1332_v31, 1.0  ;;  %v4052_v15 = vmin.f32 %v1333_v36, 1.0 }
 0x376   : > { %v4054_v4 = vmin.f32 %v1334_v33, 1.0  ;;  %v4056_v10 = vmin.f32 %v1335_v55, 1.0  ;;  %v1350_v62 = vmul.f32 0.299, %v3946_v11  ;;  %v4063_v34 = vmul.f32 %v3847_v8, %v3942_v3 }
 0x377   : > { %v1351_v46 = vmul.f32 0.299, %v3948_v12  ;;  %v1352_v35 = vmul.f32 0.299, %v3950_v16  ;;  %v1353_v48 = vmul.f32 0.299, %v3952_v22  ;;  %v4070_v45 = vmul.f32 %v3847_v8, %v3944_v29 }
 0x378   : > { %v1354_v30 = vmul.f32 0.299, %v3954_v40  ;;  %v1355_v38 = vmul.f32 0.299, %v3956_v41  ;;  %v1356_v26 = vmul.f32 0.299, %v3958_v23  ;;  %v4077_v3 = vmul.f32 %v3847_v8, %v3946_v11 }
 0x379   : > { %v1357_v0 = vmul.f32 0.299, %v3960_v39  ;;  %v1358_v21 = vmul.f32 0.299, %v3962_v14  ;;  %v1359_v44 = vmul.f32 0.299, %v3964_v56  ;;  %v4084_v29 = vmul.f32 %v3847_v8, %v3948_v12 }
 0x37a   : > { %v1360_v6 = vmul.f32 0.587, %v3986_v19  ;;  %v1361_v24 = vmul.f32 0.587, %v3988_v9  ;;  %v1362_v7 = vmul.f32 0.587, %v3990_v53  ;;  %v4091_v11 = vmul.f32 %v3847_v8, %v3950_v16 }
 0x37b   : > { %v1363_v20 = vmul.f32 0.587, %v3992_v54  ;;  %v1364_v42 = vmul.f32 0.587, %v3994_v43  ;;  %v1365_v5 = vmul.f32 0.587, %v3996_v58  ;;  %v4098_v12 = vmul.f32 %v3847_v8, %v3952_v22 }
 0x37c   : > { %5783 = vst [vmem:[#allocation21_spill] sm:$0xff] %v4091_v11  ;;  %v1366_v27 = vmul.f32 0.587, %v3998_v59  ;;  %v1367_v1 = vmul.f32 0.587, %v4000_v17  ;;  %v1372_v36 = vadd.f32 %v1360_v6, %v1348_v57  ;;  %v1373_v43 = vadd.f32 %v1361_v24, %v1349_v28 }
 0x37d   : > { %5784 = vst [vmem:[#allocation22_spill] sm:$0xff] %v4098_v12  ;;  %v1368_v31 = vmul.f32 0.587, %v4002_v60  ;;  %v1369_v16 = vmul.f32 0.587, %v4004_v37  ;;  %v1374_v54 = vadd.f32 %v1362_v7, %v1350_v62  ;;  %v1375_v58 = vadd.f32 %v1363_v20, %v1351_v46 }
 0x37e   : > { %v1370_v33 = vmul.f32 0.587, %v4006_v61  ;;  %v1371_v55 = vmul.f32 0.587, %v4008_v49  ;;  %v1376_v53 = vadd.f32 %v1364_v42, %v1352_v35  ;;  %v1377_v9 = vadd.f32 %v1365_v5, %v1353_v48 }
 0x37f   : > { %v1378_v22 = vadd.f32 %v1366_v27, %v1354_v30  ;;  %v1379_v19 = vadd.f32 %v1367_v1, %v1355_v38  ;;  %v1380_v12 = vadd.f32 %v1368_v31, %v1356_v26  ;;  %v1381_v59 = vadd.f32 %v1369_v16, %v1357_v0 }
 0x380   : > { %v1382_v11 = vadd.f32 %v1370_v33, %v1358_v21  ;;  %v1383_v17 = vadd.f32 %v1371_v55, %v1359_v44  ;;  %v1384_v60 = vmul.f32 0.114, %v4034_v18  ;;  %v1385_v57 = vmul.f32 0.114, %v4036_v47 }
 0x381   : > { %v1386_v6 = vmul.f32 0.114, %v4038_v52  ;;  %v1387_v61 = vmul.f32 0.114, %v4040_v51  ;;  %v1388_v28 = vmul.f32 0.114, %v4042_v25  ;;  %v1415_v62 = vmul.f32 %v3847_v8, %v3954_v40 }
 0x382   : > { %v1389_v46 = vmul.f32 0.114, %v4044_v2  ;;  %v1390_v35 = vmul.f32 0.114, %v4046_v50  ;;  %v1391_v48 = vmul.f32 0.114, %v4048_v32  ;;  %v1396_v30 = vadd.f32 %v1384_v60, %v1372_v36 }
 0x383   : > { %v1392_v38 = vmul.f32 0.114, %v4050_v63  ;;  %v1393_v26 = vmul.f32 0.114, %v4052_v15  ;;  %v1394_v0 = vmul.f32 0.114, %v4054_v4  ;;  %v1397_v21 = vadd.f32 %v1385_v57, %v1373_v43 }
 0x384   : > { %v1395_v44 = vmul.f32 0.114, %v4056_v10  ;;  %v1398_v24 = vadd.f32 %v1386_v6, %v1374_v54  ;;  %v1399_v7 = vadd.f32 %v1387_v61, %v1375_v58  ;;  %v1400_v20 = vadd.f32 %v1388_v28, %v1376_v53  ;;  %v5785_v57 = vld [vmem:[#allocation21_spill] sm:$0xff]  ;;  %v5786_v28 = vld [vmem:[#allocation22_spill] sm:$0xff] }
 0x385   : > { %v1401_v40 = vadd.f32 %v1389_v46, %v1377_v9  ;;  %v1402_v42 = vadd.f32 %v1390_v35, %v1378_v22  ;;  %v1403_v5 = vadd.f32 %v1391_v48, %v1379_v19  ;;  %v1404_v27 = vadd.f32 %v1392_v38, %v1380_v12 }
 0x386   : > { %v1405_v1 = vadd.f32 %v1393_v26, %v1381_v59  ;;  %v1406_v31 = vadd.f32 %v1394_v0, %v1382_v11  ;;  %v1407_v16 = vadd.f32 %v1395_v44, %v1383_v17  ;;  %v1416_v60 = vmul.f32 %v3847_v8, %v3956_v41 }
 0x387   : > { %v1417_v36 = vmul.f32 %v3847_v8, %v3958_v23  ;;  %v1418_v43 = vmul.f32 %v3847_v8, %v3960_v39  ;;  %v1419_v54 = vmul.f32 %v3847_v8, %v3962_v14  ;;  %v1420_v9 = vmul.f32 %v3847_v8, %v3964_v56 }
 0x388   : > { %v4131_v19 = vmul.f32 %v3849_v13, %v1396_v30  ;;  %v4134_v53 = vmul.f32 %v3849_v13, %v1397_v21  ;;  %v4137_v41 = vmul.f32 %v3849_v13, %v1398_v24  ;;  %v4140_v23 = vmul.f32 %v3849_v13, %v1399_v7 }
 0x389   : > { %v4143_v39 = vmul.f32 %v3849_v13, %v1400_v20  ;;  %v4146_v14 = vmul.f32 %v3849_v13, %v1401_v40  ;;  %v4149_v56 = vmul.f32 %v3849_v13, %v1402_v42  ;;  %v4152_v58 = vmul.f32 %v3849_v13, %v1403_v5 }
 0x38a   : > { %v4155_v59 = vmul.f32 %v3849_v13, %v1404_v27  ;;  %v4158_v17 = vmul.f32 %v3849_v13, %v1405_v1  ;;  %v4161_v61 = vmul.f32 %v3849_v13, %v1406_v31  ;;  %v4164_v11 = vmul.f32 %v3849_v13, %v1407_v16 }
 0x38b   : > { %v1435_v12 = vadd.f32 %v4131_v19, %v4063_v34  ;;  %v1436_v33 = vadd.f32 %v4134_v53, %v4070_v45  ;;  %v1437_v55 = vadd.f32 %v4137_v41, %v4077_v3  ;;  %v1438_v22 = vadd.f32 %v4140_v23, %v4084_v29 }
 0x38c   : > { %v1439_v6 = vadd.f32 %v4143_v39, %v5785_v57  ;;  %v1440_v46 = vadd.f32 %v4146_v14, %v5786_v28  ;;  %v1441_v13 = vadd.f32 %v4149_v56, %v1415_v62  ;;  %v1442_v35 = vadd.f32 %v4152_v58, %v1416_v60 }
 0x38d   : > { %v1443_v34 = vadd.f32 %v4155_v59, %v1417_v36  ;;  %v1444_v45 = vadd.f32 %v4158_v17, %v1418_v43  ;;  %v1445_v48 = vadd.f32 %v4161_v61, %v1419_v54  ;;  %v1446_v3 = vadd.f32 %v4164_v11, %v1420_v9 }
 0x38e   : > { %v1447_v30 = vmax.f32 %v1435_v12, 0.0  ;;  %v1448_v29 = vmax.f32 %v1436_v33, 0.0  ;;  %v1449_v38 = vmax.f32 %v1437_v55, 0.0  ;;  %v1450_v26 = vmax.f32 %v1438_v22, 0.0  ;;  %v5793_v33 = vld [vmem:[#allocation11_spill] sm:$0xff]  ;;  %v5794_v22 = vld [vmem:[#allocation12_spill] sm:$0xff] }
 0x38f   : > { %v1451_v0 = vmax.f32 %v1439_v6, 0.0  ;;  %v1452_v21 = vmax.f32 %v1440_v46, 0.0  ;;  %v1453_v44 = vmax.f32 %v1441_v13, 0.0  ;;  %v1454_v24 = vmax.f32 %v1442_v35, 0.0  ;;  %v5795_v6 = vld [vmem:[#allocation13_spill] sm:$0xff]  ;;  %v5796_v46 = vld [vmem:[#allocation14_spill] sm:$0xff] }
 0x390   : > { %v1455_v7 = vmax.f32 %v1443_v34, 0.0  ;;  %v1456_v62 = vmax.f32 %v1444_v45, 0.0  ;;  %v1457_v20 = vmax.f32 %v1445_v48, 0.0  ;;  %v1458_v40 = vmax.f32 %v1446_v3, 0.0  ;;  %v5797_v35 = vld [vmem:[#allocation15_spill] sm:$0xff]  ;;  %v5798_v45 = vld [vmem:[#allocation16_spill] sm:$0xff] }
 0x391   : > { %v4184_v42 = vmin.f32 %v1447_v30, 1.0  ;;  %v4186_v5 = vmin.f32 %v1448_v29, 1.0  ;;  %v4188_v27 = vmin.f32 %v1449_v38, 1.0  ;;  %v4190_v1 = vmin.f32 %v1450_v26, 1.0  ;;  %v5799_v3 = vld [vmem:[#allocation17_spill] sm:$0xff]  ;;  %v5800_v29 = vld [vmem:[#allocation18_spill] sm:$0xff] }
 0x392   : > { %v4192_v31 = vmin.f32 %v1451_v0, 1.0  ;;  %v4194_v16 = vmin.f32 %v1452_v21, 1.0  ;;  %v4196_v60 = vmin.f32 %v1453_v44, 1.0  ;;  %v4198_v36 = vmin.f32 %v1454_v24, 1.0  ;;  %v5801_v26 = vld [vmem:[#allocation19_spill] sm:$0xff]  ;;  %v5802_v44 = vld [vmem:[#allocation20_spill] sm:$0xff] }
 0x393   : > { %v4200_v43 = vmin.f32 %v1455_v7, 1.0  ;;  %v4202_v54 = vmin.f32 %v1456_v62, 1.0  ;;  %v4204_v9 = vmin.f32 %v1457_v20, 1.0  ;;  %v4206_v12 = vmin.f32 %v1458_v40, 1.0 }
 0x394   : > { %5787 = vst [vmem:[#allocation21_spill] sm:$0xff] %v4196_v60  ;;  %5788 = vst [vmem:[#allocation22_spill] sm:$0xff] %v4198_v36  ;;  %v1471_v55 = vmul.f32 %v3847_v8, %v5793_v33  ;;  %v1472_v57 = vmul.f32 %v3847_v8, %v5794_v22  ;;  %v1473_v28 = vmul.f32 %v3847_v8, %v5795_v6 }
 0x395   : > { %5789 = vst [vmem:[#allocation23_spill] sm:$0xff] %v4200_v43  ;;  %5790 = vst [vmem:[#allocation24_spill] sm:$0xff] %v4202_v54  ;;  %v1474_v13 = vmul.f32 %v3847_v8, %v5796_v46  ;;  %v1475_v34 = vmul.f32 %v3847_v8, %v5797_v35  ;;  %v1476_v48 = vmul.f32 %v3847_v8, %v5798_v45 }
 0x396   : > { %5791 = vst [vmem:[#allocation25_spill] sm:$0xff] %v4204_v9  ;;  %5792 = vst [vmem:[#allocation26_spill] sm:$0xff] %v4206_v12  ;;  %v1477_v30 = vmul.f32 %v3847_v8, %v5799_v3  ;;  %v1478_v38 = vmul.f32 %v3847_v8, %v5800_v29  ;;  %v1479_v0 = vmul.f32 %v3847_v8, %v5801_v26 }
 0x397   : > { %v1480_v21 = vmul.f32 %v3847_v8, %v4004_v37  ;;  %v1481_v24 = vmul.f32 %v3847_v8, %v5802_v44  ;;  %v1482_v7 = vmul.f32 %v3847_v8, %v4008_v49  ;;  %v1483_v62 = vadd.f32 %v1471_v55, %v4131_v19 }
 0x398   : > { %v1484_v20 = vadd.f32 %v1472_v57, %v4134_v53  ;;  %v1485_v40 = vadd.f32 %v1473_v28, %v4137_v41  ;;  %v1486_v33 = vadd.f32 %v1474_v13, %v4140_v23  ;;  %v1487_v22 = vadd.f32 %v1475_v34, %v4143_v39 }
 0x399   : > { %v1488_v6 = vadd.f32 %v1476_v48, %v4146_v14  ;;  %v1489_v37 = vadd.f32 %v1477_v30, %v4149_v56  ;;  %v1490_v46 = vadd.f32 %v1478_v38, %v4152_v58  ;;  %v1491_v35 = vadd.f32 %v1479_v0, %v4155_v59 }
 0x39a   : > { %v1492_v49 = vadd.f32 %v1480_v21, %v4158_v17  ;;  %v1493_v55 = vadd.f32 %v1481_v24, %v4161_v61  ;;  %v1494_v57 = vadd.f32 %v1482_v7, %v4164_v11  ;;  %v1495_v45 = vmax.f32 %v1483_v62, 0.0 }
 0x39b   : > { %v1496_v28 = vmax.f32 %v1484_v20, 0.0  ;;  %v1497_v3 = vmax.f32 %v1485_v40, 0.0  ;;  %v1498_v13 = vmax.f32 %v1486_v33, 0.0  ;;  %v1499_v29 = vmax.f32 %v1487_v22, 0.0 }
 0x39c   : > { %v1500_v34 = vmax.f32 %v1488_v6, 0.0  ;;  %v1501_v26 = vmax.f32 %v1489_v37, 0.0  ;;  %v1502_v48 = vmax.f32 %v1490_v46, 0.0  ;;  %v1503_v44 = vmax.f32 %v1491_v35, 0.0 }
 0x39d   : > { %v1504_v30 = vmax.f32 %v1492_v49, 0.0  ;;  %v1505_v12 = vmax.f32 %v1493_v55, 0.0  ;;  %v1506_v38 = vmax.f32 %v1494_v57, 0.0  ;;  %v4244_v9 = vmin.f32 %v1495_v45, 1.0 }
 0x39e   : > { %v4246_v0 = vmin.f32 %v1496_v28, 1.0  ;;  %v4248_v21 = vmin.f32 %v1497_v3, 1.0  ;;  %v4250_v24 = vmin.f32 %v1498_v13, 1.0  ;;  %v4252_v7 = vmin.f32 %v1499_v29, 1.0 }
 0x39f   : > { %5803 = vst [vmem:[#allocation11_spill] sm:$0xff] %v4244_v9  ;;  %v4254_v62 = vmin.f32 %v1500_v34, 1.0  ;;  %v4256_v20 = vmin.f32 %v1501_v26, 1.0  ;;  %v4258_v40 = vmin.f32 %v1502_v48, 1.0  ;;  %v4260_v33 = vmin.f32 %v1503_v44, 1.0 }
 0x3a0   : > { %5804 = vst [vmem:[#allocation12_spill] sm:$0xff] %v4246_v0  ;;  %5805 = vst [vmem:[#allocation13_spill] sm:$0xff] %v4248_v21  ;;  %v4262_v22 = vmin.f32 %v1504_v30, 1.0  ;;  %v4264_v6 = vmin.f32 %v1505_v12, 1.0  ;;  %v4266_v37 = vmin.f32 %v1506_v38, 1.0  ;;  %v1519_v46 = vmul.f32 %v3847_v8, %v4034_v18 }
 0x3a1   : > { %5806 = vst [vmem:[#allocation14_spill] sm:$0xff] %v4250_v24  ;;  %5807 = vst [vmem:[#allocation15_spill] sm:$0xff] %v4252_v7  ;;  %v1520_v35 = vmul.f32 %v3847_v8, %v4036_v47  ;;  %v1521_v49 = vmul.f32 %v3847_v8, %v4038_v52  ;;  %v1522_v55 = vmul.f32 %v3847_v8, %v4040_v51 }
 0x3a2   : > { %5808 = vst [vmem:[#allocation16_spill] sm:$0xff] %v4254_v62  ;;  %5809 = vst [vmem:[#allocation17_spill] sm:$0xff] %v4256_v20  ;;  %v1523_v57 = vmul.f32 %v3847_v8, %v4042_v25  ;;  %v1524_v12 = vmul.f32 %v3847_v8, %v4044_v2  ;;  %v1525_v45 = vmul.f32 %v3847_v8, %v4046_v50 }
 0x3a3   : > { %5810 = vst [vmem:[#allocation18_spill] sm:$0xff] %v4258_v40  ;;  %5811 = vst [vmem:[#allocation19_spill] sm:$0xff] %v4260_v33  ;;  %v1526_v18 = vmul.f32 %v3847_v8, %v4048_v32  ;;  %v1527_v47 = vmul.f32 %v3847_v8, %v4050_v63  ;;  %v1528_v52 = vmul.f32 %v3847_v8, %v4052_v15 }
 0x3a4   : > { %5812 = vst [vmem:[#allocation20_spill] sm:$0xff] %v4262_v22  ;;  %5813 = vst [vmem:[#allocation27_spill] sm:$0xff] %v4264_v6  ;;  %v1529_v51 = vmul.f32 %v3847_v8, %v4054_v4  ;;  %v1530_v25 = vmul.f32 %v3847_v8, %v4056_v10  ;;  %v1531_v2 = vadd.f32 %v1519_v46, %v4131_v19 }
 0x3a5   : > { %5814 = vst [vmem:[#allocation28_spill] sm:$0xff] %v4266_v37  ;;  %v1532_v28 = vadd.f32 %v1520_v35, %v4134_v53  ;;  %v1533_v50 = vadd.f32 %v1521_v49, %v4137_v41  ;;  %v1534_v32 = vadd.f32 %v1522_v55, %v4140_v23  ;;  %v1535_v3 = vadd.f32 %v1523_v57, %v4143_v39 }
 0x3a6   : > { %v1536_v63 = vadd.f32 %v1524_v12, %v4146_v14  ;;  %v1537_v15 = vadd.f32 %v1525_v45, %v4149_v56  ;;  %v1538_v13 = vadd.f32 %v1526_v18, %v4152_v58  ;;  %v1539_v4 = vadd.f32 %v1527_v47, %v4155_v59 }
 0x3a7   : > { %v1540_v8 = vadd.f32 %v1528_v52, %v4158_v17  ;;  %v1541_v10 = vadd.f32 %v1529_v51, %v4161_v61  ;;  %v1542_v19 = vadd.f32 %v1530_v25, %v4164_v11  ;;  %v1543_v53 = vmax.f32 %v1531_v2, 0.0 }
 0x3a8   : > { %v1544_v41 = vmax.f32 %v1532_v28, 0.0  ;;  %v1545_v29 = vmax.f32 %v1533_v50, 0.0  ;;  %v1546_v23 = vmax.f32 %v1534_v32, 0.0  ;;  %v1547_v34 = vmax.f32 %v1535_v3, 0.0  ;;  %v5815_v3 = vld [vmem:[#allocation25_spill] sm:$0xff] }
 0x3a9   : > { %v1548_v39 = vmax.f32 %v1536_v63, 0.0  ;;  %v1549_v26 = vmax.f32 %v1537_v15, 0.0  ;;  %v1550_v14 = vmax.f32 %v1538_v13, 0.0  ;;  %v1551_v48 = vmax.f32 %v1539_v4, 0.0  ;;  %v5816_v15 = vld [vmem:[#allocation26_spill] sm:$0xff] }
 0x3aa   : > { %v1552_v56 = vmax.f32 %v1540_v8, 0.0  ;;  %v1553_v44 = vmax.f32 %v1541_v10, 0.0  ;;  %v1554_v58 = vmax.f32 %v1542_v19, 0.0  ;;  %v4304_v30 = vmin.f32 %v1543_v53, 1.0 }
 0x3ab   : > { %v4306_v59 = vmin.f32 %v1544_v41, 1.0  ;;  %v4308_v17 = vmin.f32 %v1545_v29, 1.0  ;;  %v4310_v61 = vmin.f32 %v1546_v23, 1.0  ;;  %v4312_v11 = vmin.f32 %v1547_v34, 1.0 }
 0x3ac   : > { %v4314_v38 = vmin.f32 %v1548_v39, 1.0  ;;  %v4316_v46 = vmin.f32 %v1549_v26, 1.0  ;;  %v4318_v35 = vmin.f32 %v1550_v14, 1.0  ;;  %v4320_v49 = vmin.f32 %v1551_v48, 1.0 }
 0x3ad   : > { %v4322_v55 = vmin.f32 %v1552_v56, 1.0  ;;  %v4324_v57 = vmin.f32 %v1553_v44, 1.0  ;;  %v4326_v12 = vmin.f32 %v1554_v58, 1.0  ;;  %v1567_v45 = vmax.f32 %v4184_v42, %v4244_v9 }
 0x3ae   : > { %v1568_v18 = vmax.f32 %v4186_v5, %v4246_v0  ;;  %v1569_v47 = vmax.f32 %v4188_v27, %v4248_v21  ;;  %v1570_v52 = vmax.f32 %v4190_v1, %v4250_v24  ;;  %v1571_v51 = vmax.f32 %v4192_v31, %v4252_v7 }
 0x3af   : > { %v1572_v25 = vmax.f32 %v4194_v16, %v4254_v62  ;;  %v1573_v2 = vmax.f32 %v4196_v60, %v4256_v20  ;;  %v1574_v28 = vmax.f32 %v4198_v36, %v4258_v40  ;;  %v1575_v50 = vmax.f32 %v4200_v43, %v4260_v33 }
 0x3b0   : > { %v1576_v32 = vmax.f32 %v4202_v54, %v4262_v22  ;;  %v1577_v63 = vmax.f32 %v5815_v3, %v4264_v6  ;;  %v1578_v13 = vmax.f32 %v5816_v15, %v4266_v37  ;;  %v4353_v4 = vmax.f32 %v1567_v45, %v4304_v30 }
 0x3b1   : > { %v4356_v8 = vmax.f32 %v1568_v18, %v4306_v59  ;;  %v4359_v10 = vmax.f32 %v1569_v47, %v4308_v17  ;;  %v4362_v19 = vmax.f32 %v1570_v52, %v4310_v61  ;;  %v4365_v53 = vmax.f32 %v1571_v51, %v4312_v11 }
 0x3b2   : > { %5817 = vst [vmem:[#allocation29_spill] sm:$0xff] %v4353_v4  ;;  %v4368_v41 = vmax.f32 %v1572_v25, %v4314_v38  ;;  %v4371_v29 = vmax.f32 %v1573_v2, %v4316_v46  ;;  %v4374_v23 = vmax.f32 %v1574_v28, %v4318_v35  ;;  %v4377_v34 = vmax.f32 %v1575_v50, %v4320_v49 }
 0x3b3   : > { %5818 = vst [vmem:[#allocation30_spill] sm:$0xff] %v4356_v8  ;;  %5819 = vst [vmem:[#allocation31_spill] sm:$0xff] %v4359_v10  ;;  %v4380_v39 = vmax.f32 %v1576_v32, %v4322_v55  ;;  %v4383_v26 = vmax.f32 %v1577_v63, %v4324_v57  ;;  %v4386_v14 = vmax.f32 %v1578_v13, %v4326_v12 }
 0x3b4   : > { %5820 = vst [vmem:[#allocation32_spill] sm:$0xff] %v4362_v19  ;;  %5821 = vst [vmem:[#allocation33_spill] sm:$0xff] %v4365_v53  ;;  %v1591_v48 = vmin.f32 %v4184_v42, %v4244_v9  ;;  %v1592_v56 = vmin.f32 %v4186_v5, %v4246_v0  ;;  %v1593_v44 = vmin.f32 %v4188_v27, %v4248_v21 }
 0x3b5   : > { %5822 = vst [vmem:[#allocation34_spill] sm:$0xff] %v4368_v41  ;;  %5823 = vst [vmem:[#allocation35_spill] sm:$0xff] %v4371_v29  ;;  %v1594_v58 = vmin.f32 %v4190_v1, %v4250_v24  ;;  %v1595_v45 = vmin.f32 %v4192_v31, %v4252_v7  ;;  %v1596_v18 = vmin.f32 %v4194_v16, %v4254_v62 }
 0x3b6   : > { %5824 = vst [vmem:[#allocation36_spill] sm:$0xff] %v4374_v23  ;;  %5825 = vst [vmem:[#allocation37_spill] sm:$0xff] %v4377_v34  ;;  %v1597_v47 = vmin.f32 %v4196_v60, %v4256_v20  ;;  %v1598_v52 = vmin.f32 %v4198_v36, %v4258_v40  ;;  %v1599_v51 = vmin.f32 %v4200_v43, %v4260_v33 }
 0x3b7   : > { %5826 = vst [vmem:[#allocation38_spill] sm:$0xff] %v4380_v39  ;;  %5827 = vst [vmem:[#allocation39_spill] sm:$0xff] %v4383_v26  ;;  %v1600_v25 = vmin.f32 %v4202_v54, %v4262_v22  ;;  %v1601_v2 = vmin.f32 %v5815_v3, %v4264_v6  ;;  %v1602_v28 = vmin.f32 %v5816_v15, %v4266_v37 }
 0x3b8   : > { %5828 = vst [vmem:[#allocation40_spill] sm:$0xff] %v4386_v14  ;;  %v1603_v50 = vmin.f32 %v1591_v48, %v4304_v30  ;;  %v1604_v32 = vmin.f32 %v1592_v56, %v4306_v59  ;;  %v1605_v63 = vmin.f32 %v1593_v44, %v4308_v17  ;;  %v1606_v13 = vmin.f32 %v1594_v58, %v4310_v61 }
 0x3b9   : > { %v1607_v36 = vmin.f32 %v1595_v45, %v4312_v11  ;;  %v1608_v43 = vmin.f32 %v1596_v18, %v4314_v38  ;;  %v1609_v54 = vmin.f32 %v1597_v47, %v4316_v46  ;;  %v1610_v60 = vmin.f32 %v1598_v52, %v4318_v35 }
 0x3ba   : > { %v1611_v3 = vmin.f32 %v1599_v51, %v4320_v49  ;;  %v1612_v15 = vmin.f32 %v1600_v25, %v4322_v55  ;;  %v1613_v48 = vmin.f32 %v1601_v2, %v4324_v57  ;;  %v1614_v56 = vmin.f32 %v1602_v28, %v4326_v12 }
 0x3bb   : > { %v4425_v44 = vsub.f32 %v4353_v4, %v1603_v50  ;;  %v4428_v58 = vsub.f32 %v4356_v8, %v1604_v32  ;;  %v4431_v45 = vsub.f32 %v4359_v10, %v1605_v63  ;;  %v4434_v18 = vsub.f32 %v4362_v19, %v1606_v13 }
 0x3bc   : > { %v4437_v47 = vsub.f32 %v4365_v53, %v1607_v36  ;;  %v4440_v52 = vsub.f32 %v4368_v41, %v1608_v43  ;;  %v4444_v51 = vsub.f32 %v4371_v29, %v1609_v54  ;;  %v4447_v25 = vsub.f32 %v4374_v23, %v1610_v60 }
 0x3bd   : > { %5829 = vst [vmem:[#allocation41_spill] sm:$0xff] %v4425_v44  ;;  %5830 = vst [vmem:[#allocation42_spill] sm:$0xff] %v4428_v58  ;;  %vm5708_vm2 = vcmp.gt.f32.partialorder %v4425_v44, 0.0  ;;  %v4450_v2 = vsub.f32 %v4377_v34, %v1611_v3  ;;  %vm5707_vm3 = vcmp.gt.f32.partialorder %v4428_v58, 0.0  ;;  %v4454_v28 = vsub.f32 %v4380_v39, %v1612_v15  ;;  %v5847_v39 = vld [vmem:[#allocation21_spill] sm:$0xff] }
 0x3be   : > { %5831 = vst [vmem:[#allocation43_spill] sm:$0xff] %v4431_v45  ;;  %5832 = vst [vmem:[#allocation44_spill] sm:$0xff] %v4434_v18  ;;  %v4457_v36 = vsub.f32 %v4383_v26, %v1613_v48  ;;  %vm5706_vm4 = vcmp.gt.f32.partialorder %v4431_v45, 0.0  ;;  %v4462_v43 = vsub.f32 %v4386_v14, %v1614_v56  ;;  %vm5705_vm5 = vcmp.gt.f32.partialorder %v4434_v18, 0.0 }
 0x3bf   : > { %5833 = vst [vmem:[#allocation45_spill] sm:$0xff] %v4437_v47  ;;  %5834 = vst [vmem:[#allocation46_spill] sm:$0xff] %v4440_v52  ;;  %v1639_v60 = vsel %vm5708_vm2, %v4425_v44, 1.0  ;;  %vm5702_vm6 = vcmp.gt.f32.partialorder %v4437_v47, 0.0  ;;  %vm5701_vm7 = vcmp.gt.f32.partialorder %v4440_v52, 0.0  ;;  %v1640_v54 = vsel %vm5707_vm3, %v4428_v58, 1.0 }
 0x3c0   : > { %5835 = vst [vmem:[#allocation47_spill] sm:$0xff] %v4444_v51  ;;  %5836 = vst [vmem:[#allocation48_spill] sm:$0xff] %v4447_v25  ;;  %vm5700_vm8 = vcmp.gt.f32.partialorder %v4444_v51, 0.0  ;;  %vm5697_vm9 = vcmp.gt.f32.partialorder %v4447_v25, 0.0  ;;  %vm5690_vm10 = vcmp.gt.f32.partialorder %v4450_v2, 0.0  ;;  %v1641_v3 = vsel %vm5706_vm4, %v4431_v45, 1.0 }
 0x3c1   : > { %5837 = vst [vmem:[#allocation49_spill] sm:$0xff] %v4450_v2  ;;  %5838 = vst [vmem:[#allocation50_spill] sm:$0xff] %v4454_v28  ;;  %vm5687_vm11 = vcmp.gt.f32.partialorder %v4454_v28, 0.0  ;;  %vm5684_vm12 = vcmp.gt.f32.partialorder %v4457_v36, 0.0  ;;  %v1642_v15 = vsel %vm5705_vm5, %v4434_v18, 1.0  ;;  %3161 = vrcp.f32 %v1639_v60 }
 0x3c2   : > { %5839 = vst [vmem:[#allocation51_spill] sm:$0xff] %v4457_v36  ;;  %5840 = vst [vmem:[#allocation52_spill] sm:$0xff] %v4462_v43  ;;  %vm5681_vm13 = vcmp.gt.f32.partialorder %v4462_v43, 0.0  ;;  %v1643_v50 = vsel %vm5702_vm6, %v4437_v47, 1.0  ;;  %3163 = vrcp.f32 %v1640_v54  ;;  %v1644_v32 = vsel %vm5701_vm7, %v4440_v52, 1.0 }
 0x3c3   : > { %v1645_v63 = vsel %vm5700_vm8, %v4444_v51, 1.0  ;;  %v1646_v13 = vsel %vm5697_vm9, %v4447_v25, 1.0  ;;  %3165 = vrcp.f32 %v1641_v3  ;;  %v1647_v48 = vsel %vm5690_vm10, %v4450_v2, 1.0 }
 0x3c4   : > { %v1648_v56 = vsel %vm5687_vm11, %v4454_v28, 1.0  ;;  %v1649_v60 = vsel %vm5684_vm12, %v4457_v36, 1.0  ;;  %3167 = vrcp.f32 %v1642_v15  ;;  %v1687_v54 = vsub.f32 %v4244_v9, %v4304_v30 }
 0x3c5   : > { %3169 = vrcp.f32 %v1643_v50  ;;  %v1688_v3 = vsub.f32 %v4246_v0, %v4306_v59  ;;  %v1689_v2 = vsub.f32 %v4248_v21, %v4308_v17  ;;  %v1690_v28 = vsub.f32 %v4250_v24, %v4310_v61 }
 0x3c6   : > { %3171 = vrcp.f32 %v1644_v32  ;;  %v1691_v25 = vsub.f32 %v4252_v7, %v4312_v11  ;;  %v1692_v15 = vsub.f32 %v4254_v62, %v4314_v38  ;;  %v1693_v50 = vsub.f32 %v4256_v20, %v4316_v46 }
 0x3c7   : > { %3173 = vrcp.f32 %v1645_v63  ;;  %v1694_v36 = vsub.f32 %v4258_v40, %v4318_v35  ;;  %v1695_v51 = vsub.f32 %v4260_v33, %v4320_v49  ;;  %v1696_v32 = vsub.f32 %v4262_v22, %v4322_v55 }
 0x3c8   : > { %3175 = vrcp.f32 %v1646_v13  ;;  %v1697_v52 = vsub.f32 %v4264_v6, %v4324_v57  ;;  %v1698_v47 = vsub.f32 %v4266_v37, %v4326_v12  ;;  %v1650_v63 = vsel %vm5681_vm13, %v4462_v43, 1.0 }
 0x3c9   : > { %3177 = vrcp.f32 %v1647_v48  ;;  %v4545_v44 = vstv %s1880_s27 }
 0x3ca   : > { %3179 = vrcp.f32 %v1648_v56  ;;  %5842 = vst [vmem:[#allocation54_spill] sm:$0xff] %v4545_v44 }
 0x3cb   : > { %v4536_v18 = vpop.eup %3161  ;;  %3181 = vrcp.f32 %v1649_v60 }
 0x3cc   : > { %v4538_v13 = vpop.eup %3163  ;;  %3183 = vrcp.f32 %v1650_v63  ;;  %v4541_v45 = vmul.f32 %v4536_v18, %v1687_v54 }
 0x3cd   : > { %v4543_v58 = vpop.eup %3165  ;;  %v4548_v14 = vmul.f32 %v4538_v13, %v1688_v3 }
 0x3ce   : > { %5841 = vst [vmem:[#allocation53_spill] sm:$0xff] %v4541_v45  ;;  %v4554_v60 = vpop.eup %3167  ;;  %v4557_v63 = vmul.f32 %v4543_v58, %v1689_v2  ;;  %v1712_v54 = vmul.f32 0.16666667, %v4541_v45  ;;  %v5849_v2 = vld [vmem:[#allocation22_spill] sm:$0xff] }
 0x3cf   : > { %5843 = vst [vmem:[#allocation55_spill] sm:$0xff] %v4548_v14  ;;  %v4564_v44 = vpop.eup %3169  ;;  %v4567_v48 = vmul.f32 %v4554_v60, %v1690_v28  ;;  %v1713_v56 = vmul.f32 0.16666667, %v4548_v14  ;;  %v5907_v14 = vld [vmem:[#allocation37_spill] sm:$0xff]  ;;  %v5909_v45 = vld [vmem:[#allocation38_spill] sm:$0xff] }
 0x3d0   : > { %5844 = vst [vmem:[#allocation56_spill] sm:$0xff] %v4557_v63  ;;  %v4574_v26 = vpop.eup %3171  ;;  %v4577_v43 = vmul.f32 %v4564_v44, %v1691_v25  ;;  %v1714_v3 = vmul.f32 0.16666667, %v4557_v63  ;;  %v1724_v6 = vfloor.f32 %v1712_v54 }
 0x3d1   : > { %5845 = vst [vmem:[#allocation57_spill] sm:$0xff] %v4567_v48  ;;  %v4582_v22 = vpop.eup %3173  ;;  %v4585_v34 = vmul.f32 %v4574_v26, %v1692_v15  ;;  %v1715_v37 = vmul.f32 0.16666667, %v4567_v48  ;;  %v1725_v33 = vfloor.f32 %v1713_v56 }
 0x3d2   : > { %5846 = vst [vmem:[#allocation58_spill] sm:$0xff] %v4577_v43  ;;  %v4590_v40 = vpop.eup %3175  ;;  %v4593_v25 = vmul.f32 %v4582_v22, %v1693_v50  ;;  %v1716_v54 = vmul.f32 0.16666667, %v4577_v43  ;;  %v1726_v29 = vfloor.f32 %v1714_v3  ;;  %v4596_v28 = vmul.f32 6.0, %v1724_v6  ;;  %v5905_v43 = vld [vmem:[#allocation36_spill] sm:$0xff] }
 0x3d3   : > { %5848 = vst [vmem:[#allocation21_spill] sm:$0xff] %v4585_v34  ;;  %v4598_v20 = vpop.eup %3177  ;;  %v4601_v15 = vmul.f32 %v4590_v40, %v1694_v36  ;;  %v1717_v56 = vmul.f32 0.16666667, %v4585_v34  ;;  %v1727_v41 = vfloor.f32 %v1715_v37  ;;  %v4604_v62 = vmul.f32 6.0, %v1725_v33  ;;  %v5903_v34 = vld [vmem:[#allocation35_spill] sm:$0xff] }
 0x3d4   : > { %5850 = vst [vmem:[#allocation22_spill] sm:$0xff] %v4593_v25  ;;  %5851 = vst [vmem:[#allocation59_spill] sm:$0xff] %v4596_v28  ;;  %v4606_v23 = vpop.eup %3179  ;;  %v4609_v50 = vmul.f32 %v4598_v20, %v1695_v51  ;;  %v1718_v53 = vmul.f32 0.16666667, %v4593_v25  ;;  %v1728_v3 = vfloor.f32 %v1716_v54  ;;  %v4612_v6 = vmul.f32 6.0, %v1726_v29  ;;  %v5901_v25 = vld [vmem:[#allocation34_spill] sm:$0xff] }
 0x3d5   : > { %5852 = vst [vmem:[#allocation60_spill] sm:$0xff] %v4601_v15  ;;  %5853 = vst [vmem:[#allocation61_spill] sm:$0xff] %v4604_v62  ;;  %v4614_v7 = vpop.eup %3181  ;;  %v4617_v36 = vmul.f32 %v4606_v23, %v1696_v32  ;;  %v1719_v19 = vmul.f32 0.16666667, %v4601_v15  ;;  %v1729_v37 = vfloor.f32 %v1717_v56  ;;  %v4620_v33 = vmul.f32 6.0, %v1727_v41  ;;  %v5899_v15 = vld [vmem:[#allocation33_spill] sm:$0xff] }
 0x3d6   : > { %5854 = vst [vmem:[#allocation62_spill] sm:$0xff] %v4609_v50  ;;  %5855 = vst [vmem:[#allocation63_spill] sm:$0xff] %v4612_v6  ;;  %v4622_v24 = vpop.eup %3183  ;;  %v4625_v51 = vmul.f32 %v4614_v7, %v1697_v52  ;;  %v1720_v10 = vmul.f32 0.16666667, %v4609_v50  ;;  %v1730_v54 = vfloor.f32 %v1718_v53  ;;  %v4628_v29 = vmul.f32 6.0, %v1728_v3  ;;  %v5898_v50 = vld [vmem:[#allocation15_spill] sm:$0xff] }
 0x3d7   : > { %5856 = vst [vmem:[#allocation64_spill] sm:$0xff] %v4614_v7  ;;  %5857 = vst [vmem:[#allocation65_spill] sm:$0xff] %v4617_v36  ;;  %v4631_v21 = vmul.f32 %v4622_v24, %v1698_v47  ;;  %v1721_v32 = vmul.f32 0.16666667, %v4617_v36  ;;  %v1731_v8 = vfloor.f32 %v1719_v19  ;;  %v4634_v0 = vmul.f32 6.0, %v1729_v37  ;;  %v5872_v47 = vld [vmem:[#allocation25_spill] sm:$0xff] }
 0x3d8   : > { %5858 = vst [vmem:[#allocation66_spill] sm:$0xff] %v4620_v33  ;;  %5859 = vst [vmem:[#allocation67_spill] sm:$0xff] %v4622_v24  ;;  %v1722_v41 = vmul.f32 0.16666667, %v4625_v51  ;;  %v1732_v56 = vfloor.f32 %v1720_v10  ;;  %v4637_v4 = vmul.f32 6.0, %v1730_v54  ;;  %vm1764_vm13 = vcmp.eq.f32.partialorder %v5899_v15, %v5898_v50  ;;  %v5906_v62 = vld [vmem:[#allocation19_spill] sm:$0xff] }
 0x3d9   : > { %5860 = vst [vmem:[#allocation68_spill] sm:$0xff] %v4625_v51  ;;  %5861 = vst [vmem:[#allocation69_spill] sm:$0xff] %v4628_v29  ;;  %v1723_v53 = vmul.f32 0.16666667, %v4631_v21  ;;  %v1733_v3 = vfloor.f32 %v1721_v32  ;;  %v4642_v9 = vmul.f32 6.0, %v1731_v8  ;;  %v5870_v32 = vld [vmem:[#allocation23_spill] sm:$0xff]  ;;  %v1812_v33 = vsub.f32 %v4192_v31, %v5898_v50 }
 0x3da   : > { %5862 = vst [vmem:[#allocation70_spill] sm:$0xff] %v4631_v21  ;;  %5863 = vst [vmem:[#allocation71_spill] sm:$0xff] %v4634_v0  ;;  %v1734_v24 = vfloor.f32 %v1722_v41  ;;  %v4646_v19 = vmul.f32 6.0, %v1732_v56  ;;  %v1780_v37 = vsub.f32 %v4320_v49, %v5870_v32  ;;  %v5871_v8 = vld [vmem:[#allocation24_spill] sm:$0xff]  ;;  %v1782_v56 = vsub.f32 %v4324_v57, %v5872_v47  ;;  %v5902_v0 = vld [vmem:[#allocation17_spill] sm:$0xff] }
 0x3db   : > { %5864 = vst [vmem:[#allocation72_spill] sm:$0xff] %v4637_v4  ;;  %5865 = vst [vmem:[#allocation73_spill] sm:$0xff] %v4642_v9  ;;  %v1735_v54 = vfloor.f32 %v1723_v53  ;;  %v4652_v7 = vmul.f32 6.0, %v1733_v3  ;;  %v5873_v9 = vld [vmem:[#allocation26_spill] sm:$0xff]  ;;  %v5876_v41 = vsub.f32 %v4308_v17, %v4188_v27  ;;  %v5880_v17 = vsub.f32 %v4316_v46, %v5847_v39  ;;  %v5900_v4 = vld [vmem:[#allocation16_spill] sm:$0xff] }
 0x3dc   : > { %5866 = vst [vmem:[#allocation74_spill] sm:$0xff] %v4646_v19  ;;  %v4658_v52 = vmul.f32 6.0, %v1734_v24  ;;  %v1781_v24 = vsub.f32 %v4322_v55, %v5871_v8  ;;  %v1783_v10 = vsub.f32 %v4326_v12, %v5873_v9  ;;  %v5875_v55 = vsub.f32 %v4306_v59, %v4186_v5  ;;  %v5895_v19 = vld [vmem:[#allocation31_spill] sm:$0xff]  ;;  %v5904_v29 = vld [vmem:[#allocation18_spill] sm:$0xff]  ;;  %v5908_v28 = vld [vmem:[#allocation20_spill] sm:$0xff] }
 0x3dd   : > { %5867 = vst [vmem:[#allocation75_spill] sm:$0xff] %v4652_v7  ;;  %v4666_v53 = vmul.f32 6.0, %v1735_v54  ;;  %v5874_v54 = vsub.f32 %v4304_v30, %v4184_v42  ;;  %v1786_v57 = vmul.f32 %v4543_v58, %v5876_v41  ;;  %v5877_v12 = vsub.f32 %v4310_v61, %v4190_v1 }
 0x3de   : > { %5868 = vst [vmem:[#allocation76_spill] sm:$0xff] %v4658_v52  ;;  %v1785_v7 = vmul.f32 %v4538_v13, %v5875_v55  ;;  %v5879_v59 = vsub.f32 %v4314_v38, %v4194_v16  ;;  %v1790_v41 = vmul.f32 %v4582_v22, %v5880_v17  ;;  %v5881_v61 = vsub.f32 %v4318_v35, %v5849_v2 }
 0x3df   : > { %5869 = vst [vmem:[#allocation77_spill] sm:$0xff] %v4666_v53  ;;  %v1784_v3 = vmul.f32 %v4536_v18, %v5874_v54  ;;  %v1787_v30 = vmul.f32 %v4554_v60, %v5877_v12  ;;  %v5878_v54 = vsub.f32 %v4312_v11, %v4192_v31  ;;  %v1792_v53 = vmul.f32 %v4598_v20, %v1780_v37  ;;  %v5883_v52 = vld [vmem:[#allocation67_spill] sm:$0xff] }
 0x3e0   : > { %v1789_v55 = vmul.f32 %v4574_v26, %v5879_v59  ;;  %v1791_v12 = vmul.f32 %v4590_v40, %v5881_v61  ;;  %v1793_v11 = vmul.f32 %v4606_v23, %v1781_v24  ;;  %v1795_v38 = vmul.f32 %v5883_v52, %v1783_v10 }
 0x3e1   : > { %v1788_v49 = vmul.f32 %v4564_v44, %v5878_v54  ;;  %v5882_v54 = vld [vmem:[#allocation64_spill] sm:$0xff]  ;;  %v4718_v51 = vadd.f32 2.0, %v1784_v3  ;;  %v4720_v59 = vadd.f32 2.0, %v1785_v7  ;;  %v4722_v46 = vadd.f32 2.0, %v1786_v57  ;;  %v5890_v3 = vld [vmem:[#allocation11_spill] sm:$0xff]  ;;  %v5891_v57 = vld [vmem:[#allocation29_spill] sm:$0xff] }
 0x3e2   : > { %v1794_v21 = vmul.f32 %v5882_v54, %v1782_v56  ;;  %v4724_v17 = vadd.f32 2.0, %v1787_v30  ;;  %v4728_v35 = vadd.f32 2.0, %v1789_v55  ;;  %v4730_v61 = vadd.f32 2.0, %v1790_v41  ;;  %v5892_v30 = vld [vmem:[#allocation12_spill] sm:$0xff]  ;;  %v5894_v55 = vld [vmem:[#allocation13_spill] sm:$0xff]  ;;  %v5896_v41 = vld [vmem:[#allocation14_spill] sm:$0xff] }
 0x3e3   : > { %v4726_v36 = vadd.f32 2.0, %v1788_v49  ;;  %v4732_v37 = vadd.f32 2.0, %v1791_v12  ;;  %v4734_v24 = vadd.f32 2.0, %v1792_v53  ;;  %v4736_v56 = vadd.f32 2.0, %v1793_v11  ;;  %v5893_v49 = vld [vmem:[#allocation30_spill] sm:$0xff]  ;;  %v5897_v12 = vld [vmem:[#allocation32_spill] sm:$0xff] }
 0x3e4   : > { %5884 = vst [vmem:[#allocation64_spill] sm:$0xff] %v4730_v61  ;;  %v4738_v10 = vadd.f32 2.0, %v1794_v21  ;;  %v4740_v7 = vadd.f32 2.0, %v1795_v38  ;;  %vm1760_vm14 = vcmp.eq.f32.partialorder %v5891_v57, %v5890_v3  ;;  %vm1761_vm15 = vcmp.eq.f32.partialorder %v5893_v49, %v5892_v30 }
 0x3e5   : > { %5885 = vst [vmem:[#allocation67_spill] sm:$0xff] %v4732_v37  ;;  %5886 = vst [vmem:[#allocation78_spill] sm:$0xff] %v4734_v24  ;;  %vm1762_vm0 = vcmp.eq.f32.partialorder %v5895_v19, %v5894_v55  ;;  %vm1763_vm1 = vcmp.eq.f32.partialorder %v5897_v12, %v5896_v41  ;;  %v1808_v53 = vsub.f32 %v4184_v42, %v5890_v3  ;;  %v5913_v24 = vld [vmem:[#allocation40_spill] sm:$0xff] }
 0x3e6   : > { %5887 = vst [vmem:[#allocation79_spill] sm:$0xff] %v4736_v56  ;;  %5888 = vst [vmem:[#allocation80_spill] sm:$0xff] %v4738_v10  ;;  %v1809_v21 = vsub.f32 %v4186_v5, %v5892_v30  ;;  %v1810_v11 = vsub.f32 %v4188_v27, %v5894_v55  ;;  %v1811_v38 = vsub.f32 %v4190_v1, %v5896_v41  ;;  %v5911_v10 = vld [vmem:[#allocation39_spill] sm:$0xff]  ;;  %v5912_v56 = vld [vmem:[#allocation28_spill] sm:$0xff] }
 0x3e7   : > { %5889 = vst [vmem:[#allocation81_spill] sm:$0xff] %v4740_v7  ;;  %vm1765_vm12 = vcmp.eq.f32.partialorder %v5901_v25, %v5900_v4  ;;  %vm1766_vm11 = vcmp.eq.f32.partialorder %v5903_v34, %v5902_v0  ;;  %vm1767_vm10 = vcmp.eq.f32.partialorder %v5905_v43, %v5904_v29  ;;  %v1813_v48 = vsub.f32 %v4194_v16, %v5900_v4  ;;  %v5910_v7 = vld [vmem:[#allocation27_spill] sm:$0xff]  ;;  %v5970_v55 = vld [vmem:[#allocation70_spill] sm:$0xff] }
 0x3e8   : > { %v1814_v6 = vsub.f32 %v5847_v39, %v5902_v0  ;;  %v1815_v63 = vsub.f32 %v5849_v2, %v5904_v29  ;;  %vm1768_vm9 = vcmp.eq.f32.partialorder %v5907_v14, %v5906_v62  ;;  %vm1769_vm8 = vcmp.eq.f32.partialorder %v5909_v45, %v5908_v28 }
 0x3e9   : > { %vm1770_vm7 = vcmp.eq.f32.partialorder %v5911_v10, %v5910_v7  ;;  %vm1771_vm6 = vcmp.eq.f32.partialorder %v5913_v24, %v5912_v56  ;;  %v1816_v37 = vsub.f32 %v5870_v32, %v5906_v62  ;;  %v1817_v0 = vsub.f32 %v5871_v8, %v5908_v28 }
 0x3ea   : > { %v1818_v29 = vsub.f32 %v5872_v47, %v5910_v7  ;;  %v1819_v61 = vsub.f32 %v5873_v9, %v5912_v56  ;;  %v1820_v28 = vmul.f32 %v4536_v18, %v1808_v53  ;;  %v1821_v62 = vmul.f32 %v4538_v13, %v1809_v21 }
 0x3eb   : > { %v1822_v7 = vmul.f32 %v4543_v58, %v1810_v11  ;;  %v1823_v56 = vmul.f32 %v4554_v60, %v1811_v38  ;;  %v1824_v18 = vmul.f32 %v4564_v44, %v1812_v33  ;;  %v1825_v13 = vmul.f32 %v4574_v26, %v1813_v48 }
 0x3ec   : > { %v1826_v58 = vmul.f32 %v4582_v22, %v1814_v6  ;;  %v1827_v60 = vmul.f32 %v4590_v40, %v1815_v63  ;;  %vm1683_vm5 = vcmp.eq.f32.partialorder %v5907_v14, %v5870_v32  ;;  %vm1684_vm4 = vcmp.eq.f32.partialorder %v5909_v45, %v5871_v8 }
 0x3ed   : > { %vm1685_vm3 = vcmp.eq.f32.partialorder %v5911_v10, %v5872_v47  ;;  %vm1686_vm2 = vcmp.eq.f32.partialorder %v5913_v24, %v5873_v9  ;;  %v1828_v44 = vmul.f32 %v4598_v20, %v1816_v37  ;;  %v1829_v26 = vmul.f32 %v4606_v23, %v1817_v0  ;;  %v5962_v37 = vld [vmem:[#allocation65_spill] sm:$0xff] }
 0x3ee   : > { %v1830_v22 = vmul.f32 %v5882_v54, %v1818_v29  ;;  %v1831_v40 = vmul.f32 %v5883_v52, %v1819_v61  ;;  %v1832_v48 = vadd.f32 4.0, %v1820_v28  ;;  %v1833_v63 = vadd.f32 4.0, %v1821_v62  ;;  %v5914_v29 = vld [vmem:[#allocation64_spill] sm:$0xff]  ;;  %v5918_v61 = vld [vmem:[#allocation78_spill] sm:$0xff]  ;;  %v5924_v30 = vld [vmem:[#allocation81_spill] sm:$0xff] }
 0x3ef   : > { %v1834_v6 = vadd.f32 4.0, %v1822_v7  ;;  %v1835_v33 = vadd.f32 4.0, %v1823_v56  ;;  %v1836_v53 = vadd.f32 4.0, %v1824_v18  ;;  %v1837_v21 = vadd.f32 4.0, %v1825_v13  ;;  %v5926_v18 = vld [vmem:[#allocation53_spill] sm:$0xff]  ;;  %v5927_v13 = vld [vmem:[#allocation59_spill] sm:$0xff] }
 0x3f0   : > { %v1838_v11 = vadd.f32 4.0, %v1826_v58  ;;  %v1839_v38 = vadd.f32 4.0, %v1827_v60  ;;  %v1840_v47 = vadd.f32 4.0, %v1828_v44  ;;  %v1841_v8 = vadd.f32 4.0, %v1829_v26  ;;  %v5930_v60 = vld [vmem:[#allocation55_spill] sm:$0xff]  ;;  %v5931_v44 = vld [vmem:[#allocation61_spill] sm:$0xff] }
 0x3f1   : > { %v1842_v32 = vadd.f32 4.0, %v1830_v22  ;;  %v1843_v9 = vadd.f32 4.0, %v1831_v40  ;;  %v1844_v0 = vsel %vm1760_vm14, %v4718_v51, %v1832_v48  ;;  %v1845_v62 = vsel %vm1761_vm15, %v4720_v59, %v1833_v63  ;;  %v5916_v59 = vld [vmem:[#allocation67_spill] sm:$0xff]  ;;  %v5938_v48 = vld [vmem:[#allocation57_spill] sm:$0xff]  ;;  %v5939_v63 = vld [vmem:[#allocation66_spill] sm:$0xff] }
 0x3f2   : > { %v1846_v20 = vsel %vm1762_vm0, %v4722_v46, %v1834_v6  ;;  %v1847_v23 = vsel %vm1763_vm1, %v4724_v17, %v1835_v33  ;;  %v1848_v28 = vsel %vm1764_vm13, %v4726_v36, %v1836_v53  ;;  %v1849_v51 = vsel %vm1765_vm12, %v4728_v35, %v1837_v21  ;;  %v5920_v36 = vld [vmem:[#allocation79_spill] sm:$0xff]  ;;  %v5922_v35 = vld [vmem:[#allocation80_spill] sm:$0xff]  ;;  %v5942_v33 = vld [vmem:[#allocation58_spill] sm:$0xff] }
 0x3f3   : > { %v1850_v54 = vsel %vm1766_vm11, %v5914_v29, %v1838_v11  ;;  %v1851_v17 = vsel %vm1767_vm10, %v5916_v59, %v1839_v38  ;;  %v1852_v50 = vsel %vm1768_vm9, %v5918_v61, %v1840_v47  ;;  %v1853_v4 = vsel %vm1769_vm8, %v5920_v36, %v1841_v8  ;;  %v5935_v22 = vld [vmem:[#allocation63_spill] sm:$0xff]  ;;  %v5943_v53 = vld [vmem:[#allocation69_spill] sm:$0xff]  ;;  %v5959_v46 = vld [vmem:[#allocation74_spill] sm:$0xff] }
 0x3f4   : > { %v1854_v3 = vsel %vm1770_vm7, %v5922_v35, %v1842_v32  ;;  %v1855_v41 = vsel %vm1771_vm6, %v5924_v30, %v1843_v9  ;;  %v5928_v58 = vsub.f32 %v5926_v18, %v5927_v13  ;;  %vm5929_vm9 = vcmp.eq.f32.partialorder %v5891_v57, %v4184_v42  ;;  %v5934_v32 = vld [vmem:[#allocation56_spill] sm:$0xff]  ;;  %v5946_v11 = vld [vmem:[#allocation21_spill] sm:$0xff]  ;;  %v5947_v38 = vld [vmem:[#allocation71_spill] sm:$0xff] }
 0x3f5   : > { %v5932_v8 = vsub.f32 %v5930_v60, %v5931_v44  ;;  %vm5933_vm8 = vcmp.eq.f32.partialorder %v5893_v49, %v4186_v5  ;;  %v5936_v40 = vsub.f32 %v5934_v32, %v5935_v22  ;;  %vm5937_vm6 = vcmp.eq.f32.partialorder %v5895_v19, %v4188_v27  ;;  %v5955_v52 = vld [vmem:[#allocation73_spill] sm:$0xff]  ;;  %v5963_v36 = vld [vmem:[#allocation75_spill] sm:$0xff]  ;;  %v5966_v35 = vld [vmem:[#allocation68_spill] sm:$0xff] }
 0x3f6   : > { %v1856_v47 = vsel %vm5929_vm9, %v5928_v58, %v1844_v0  ;;  %v5940_v6 = vsub.f32 %v5938_v48, %v5939_v63  ;;  %vm5941_vm7 = vcmp.eq.f32.partialorder %v5897_v12, %v4190_v1  ;;  %v5944_v21 = vsub.f32 %v5942_v33, %v5943_v53  ;;  %v5967_v7 = vld [vmem:[#allocation76_spill] sm:$0xff]  ;;  %v5971_v18 = vld [vmem:[#allocation77_spill] sm:$0xff]  ;;  %v5978_v32 = vld [vmem:[#allocation43_spill] sm:$0xff] }
 0x3f7   : > { %v1857_v26 = vsel %vm5933_vm8, %v5932_v8, %v1845_v62  ;;  %v1858_v9 = vsel %vm5937_vm6, %v5936_v40, %v1846_v20  ;;  %vm5945_vm10 = vcmp.eq.f32.partialorder %v5899_v15, %v4192_v31  ;;  %v5948_v0 = vsub.f32 %v5946_v11, %v5947_v38  ;;  %v5950_v62 = vld [vmem:[#allocation22_spill] sm:$0xff]  ;;  %v5951_v20 = vld [vmem:[#allocation72_spill] sm:$0xff]  ;;  %v5974_v60 = vld [vmem:[#allocation41_spill] sm:$0xff] }
 0x3f8   : > { %v1859_v42 = vsel %vm5941_vm7, %v5940_v6, %v1847_v23  ;;  %v1860_v5 = vsel %vm5945_vm10, %v5944_v21, %v1848_v28  ;;  %vm5949_vm11 = vcmp.eq.f32.partialorder %v5901_v25, %v4194_v16  ;;  %v5952_v29 = vsub.f32 %v5950_v62, %v5951_v20  ;;  %v5954_v23 = vld [vmem:[#allocation60_spill] sm:$0xff]  ;;  %v5958_v28 = vld [vmem:[#allocation62_spill] sm:$0xff]  ;;  %v5986_v53 = vld [vmem:[#allocation47_spill] sm:$0xff] }
 0x3f9   : > { %v1861_v27 = vsel %vm5949_vm11, %v5948_v0, %v1849_v51  ;;  %vm5953_vm12 = vcmp.eq.f32.partialorder %v5903_v34, %v5847_v39  ;;  %v5956_v59 = vsub.f32 %v5954_v23, %v5955_v52  ;;  %vm5957_vm13 = vcmp.eq.f32.partialorder %v5905_v43, %v5849_v2  ;;  %v5976_v8 = vld [vmem:[#allocation42_spill] sm:$0xff]  ;;  %v5980_v40 = vld [vmem:[#allocation44_spill] sm:$0xff]  ;;  %v5990_v11 = vld [vmem:[#allocation49_spill] sm:$0xff] }
 0x3fa   : > { %v1862_v1 = vsel %vm5953_vm12, %v5952_v29, %v1850_v54  ;;  %v5960_v61 = vsub.f32 %v5958_v28, %v5959_v46  ;;  %v5964_v56 = vsub.f32 %v5962_v37, %v5963_v36  ;;  %v5968_v30 = vsub.f32 %v5966_v35, %v5967_v7  ;;  %v5984_v6 = vld [vmem:[#allocation46_spill] sm:$0xff]  ;;  %v5988_v21 = vld [vmem:[#allocation48_spill] sm:$0xff]  ;;  %v5994_v0 = vld [vmem:[#allocation51_spill] sm:$0xff] }
 0x3fb   : > { %v1863_v31 = vsel %vm5957_vm13, %v5956_v59, %v1851_v17  ;;  %v5972_v13 = vsub.f32 %v5970_v55, %v5971_v18  ;;  %vm5977_vm14 = vcmp.gt.f32.partialorder %v5976_v8, 0.0  ;;  %vm5981_vm15 = vcmp.gt.f32.partialorder %v5980_v40, 0.0  ;;  %v5992_v38 = vld [vmem:[#allocation50_spill] sm:$0xff]  ;;  %v5996_v62 = vld [vmem:[#allocation52_spill] sm:$0xff] }
 0x3fc   : > { %v1864_v51 = vsel %vm1683_vm5, %v5960_v61, %v1852_v50  ;;  %v1865_v54 = vsel %vm1684_vm4, %v5964_v56, %v1853_v4  ;;  %v1866_v17 = vsel %vm1685_vm3, %v5968_v30, %v1854_v3  ;;  %vm5975_vm5 = vcmp.gt.f32.partialorder %v5974_v60, 0.0  ;;  %v5982_v3 = vld [vmem:[#allocation45_spill] sm:$0xff]  ;;  %v5998_v20 = vld [vmem:[#allocation54_spill] sm:$0xff] }
 0x3fd   : > { %v1867_v50 = vsel %vm1686_vm2, %v5972_v13, %v1855_v41  ;;  %v1868_v44 = vsel %vm5975_vm5, %v1856_v47, 0.0  ;;  %v1869_v4 = vsel %vm5977_vm14, %v1857_v26, 0.0  ;;  %vm5979_vm4 = vcmp.gt.f32.partialorder %v5978_v32, 0.0 }
 0x3fe   : > { %v1870_v22 = vsel %vm5979_vm4, %v1858_v9, 0.0  ;;  %v1871_v48 = vsel %vm5981_vm15, %v1859_v42, 0.0  ;;  %vm5983_vm3 = vcmp.gt.f32.partialorder %v5982_v3, 0.0  ;;  %vm5985_vm0 = vcmp.gt.f32.partialorder %v5984_v6, 0.0 }
 0x3ff   : > { %v1872_v63 = vsel %vm5983_vm3, %v1860_v5, 0.0  ;;  %v1873_v33 = vsel %vm5985_vm0, %v1861_v27, 0.0  ;;  %vm5987_vm2 = vcmp.gt.f32.partialorder %v5986_v53, 0.0  ;;  %vm5989_vm1 = vcmp.gt.f32.partialorder %v5988_v21, 0.0 }
 0x400   : > { %v1874_v41 = vsel %vm5987_vm2, %v1862_v1, 0.0  ;;  %v1875_v47 = vsel %vm5989_vm1, %v1863_v31, 0.0  ;;  %vm5991_vm9 = vcmp.gt.f32.partialorder %v5990_v11, 0.0  ;;  %vm5993_vm8 = vcmp.gt.f32.partialorder %v5992_v38, 0.0 }
 0x401   : > { %v1876_v26 = vsel %vm5991_vm9, %v1864_v51, 0.0  ;;  %v1877_v9 = vsel %vm5993_vm8, %v1865_v54, 0.0  ;;  %vm5995_vm6 = vcmp.gt.f32.partialorder %v5994_v0, 0.0  ;;  %vm5997_vm7 = vcmp.gt.f32.partialorder %v5996_v62, 0.0 }
 0x402   : > { %v1878_v42 = vsel %vm5995_vm6, %v1866_v17, 0.0  ;;  %v1879_v5 = vsel %vm5997_vm7, %v1867_v50, 0.0  ;;  %v1882_v27 = vadd.f32 %v5998_v20, %v1868_v44  ;;  %v1883_v29 = vadd.f32 %v5998_v20, %v1869_v4 }
 0x403   : > { %v1884_v1 = vadd.f32 %v5998_v20, %v1870_v22  ;;  %v1885_v23 = vadd.f32 %v5998_v20, %v1871_v48  ;;  %v1886_v52 = vadd.f32 %v5998_v20, %v1872_v63  ;;  %v1887_v59 = vadd.f32 %v5998_v20, %v1873_v33 }
 0x404   : > { %v1888_v31 = vadd.f32 %v5998_v20, %v1874_v41  ;;  %v1889_v28 = vadd.f32 %v5998_v20, %v1875_v47  ;;  %v1890_v46 = vadd.f32 %v5998_v20, %v1876_v26  ;;  %v1891_v61 = vadd.f32 %v5998_v20, %v1877_v9 }
 0x405   : > { %v1892_v16 = vadd.f32 %v5998_v20, %v1878_v42  ;;  %v1893_v51 = vadd.f32 %v5998_v20, %v1879_v5  ;;  %v1894_v37 = vmul.f32 0.16666667, %v1882_v27  ;;  %v1895_v36 = vmul.f32 0.16666667, %v1883_v29 }
 0x406   : > { %v1896_v56 = vmul.f32 0.16666667, %v1884_v1  ;;  %v1897_v39 = vmul.f32 0.16666667, %v1885_v23  ;;  %v1898_v54 = vmul.f32 0.16666667, %v1886_v52 }
 0x407   : > { %v1899_v35 = vmul.f32 0.16666667, %v1887_v59  ;;  %v1900_v7 = vmul.f32 0.16666667, %v1888_v31  ;;  %v1901_v30 = vmul.f32 0.16666667, %v1889_v28  ;;  %v1906_v17 = vfloor.f32 %v1894_v37 }
 0x408   : > { %v1902_v2 = vmul.f32 0.16666667, %v1890_v46  ;;  %v1903_v55 = vmul.f32 0.16666667, %v1891_v61  ;;  %v1904_v18 = vmul.f32 0.16666667, %v1892_v16  ;;  %v1907_v58 = vfloor.f32 %v1895_v36 }
 0x409   : > { %v1905_v13 = vmul.f32 0.16666667, %v1893_v51  ;;  %v1908_v50 = vfloor.f32 %v1896_v56  ;;  %v1909_v44 = vfloor.f32 %v1897_v39  ;;  %v1910_v4 = vfloor.f32 %v1898_v54 }
 0x40a   : > { %v1911_v22 = vfloor.f32 %v1899_v35  ;;  %v1912_v48 = vfloor.f32 %v1900_v7  ;;  %v1913_v63 = vfloor.f32 %v1901_v30  ;;  %v1914_v33 = vfloor.f32 %v1902_v2 }
 0x40b   : > { %v1915_v41 = vfloor.f32 %v1903_v55  ;;  %v1916_v47 = vfloor.f32 %v1904_v18  ;;  %v1917_v26 = vfloor.f32 %v1905_v13  ;;  %v1918_v9 = vmul.f32 6.0, %v1906_v17 }
 0x40c   : > { %v1919_v42 = vmul.f32 6.0, %v1907_v58  ;;  %v1920_v5 = vmul.f32 6.0, %v1908_v50  ;;  %v1921_v20 = vmul.f32 6.0, %v1909_v44  ;;  %v1922_v62 = vmul.f32 6.0, %v1910_v4 }
 0x40d   : > { %v1923_v37 = vmul.f32 6.0, %v1911_v22  ;;  %v1924_v0 = vmul.f32 6.0, %v1912_v48  ;;  %v1925_v38 = vmul.f32 6.0, %v1913_v63  ;;  %v1926_v11 = vmul.f32 6.0, %v1914_v33 }
 0x40e   : > { %v1927_v36 = vmul.f32 6.0, %v1915_v41  ;;  %v1928_v56 = vmul.f32 6.0, %v1916_v47  ;;  %v1929_v39 = vmul.f32 6.0, %v1917_v26  ;;  %v4982_v54 = vsub.f32 %v1882_v27, %v1918_v9 }
 0x40f   : > { %v4984_v35 = vsub.f32 %v1883_v29, %v1919_v42  ;;  %v4986_v7 = vsub.f32 %v1884_v1, %v1920_v5  ;;  %v4988_v30 = vsub.f32 %v1885_v23, %v1921_v20  ;;  %v4990_v2 = vsub.f32 %v1886_v52, %v1922_v62 }
 0x410   : > { %5999 = vst [vmem:[#allocation11_spill] sm:$0xff] %v4982_v54  ;;  %v4992_v17 = vsub.f32 %v1887_v59, %v1923_v37  ;;  %v4994_v55 = vsub.f32 %v1888_v31, %v1924_v0  ;;  %v4996_v18 = vsub.f32 %v1889_v28, %v1925_v38  ;;  %v4998_v13 = vsub.f32 %v1890_v46, %v1926_v11 }
 0x411   : > { %6000 = vst [vmem:[#allocation29_spill] sm:$0xff] %v4984_v35  ;;  %6001 = vst [vmem:[#allocation12_spill] sm:$0xff] %v4986_v7  ;;  %v5000_v58 = vsub.f32 %v1891_v61, %v1927_v36  ;;  %v5002_v27 = vsub.f32 %v1892_v16, %v1928_v56  ;;  %v5004_v29 = vsub.f32 %v1893_v51, %v1929_v39  ;;  %vm1942_vm10 = vcmp.gt.f32.partialorder %v5891_v57, 0.0 }
 0x412   : > { %6002 = vst [vmem:[#allocation30_spill] sm:$0xff] %v4988_v30  ;;  %6003 = vst [vmem:[#allocation13_spill] sm:$0xff] %v4990_v2  ;;  %vm1943_vm11 = vcmp.gt.f32.partialorder %v5893_v49, 0.0  ;;  %vm1944_vm12 = vcmp.gt.f32.partialorder %v5895_v19, 0.0  ;;  %vm1945_vm13 = vcmp.gt.f32.partialorder %v5897_v12, 0.0  ;;  %vm1946_vm5 = vcmp.gt.f32.partialorder %v5899_v15, 0.0 }
 0x413   : > { %6004 = vst [vmem:[#allocation31_spill] sm:$0xff] %v4992_v17  ;;  %6005 = vst [vmem:[#allocation14_spill] sm:$0xff] %v4994_v55  ;;  %vm1947_vm14 = vcmp.gt.f32.partialorder %v5901_v25, 0.0  ;;  %vm1948_vm4 = vcmp.gt.f32.partialorder %v5903_v34, 0.0  ;;  %vm1949_vm15 = vcmp.gt.f32.partialorder %v5905_v43, 0.0  ;;  %vm1950_vm3 = vcmp.gt.f32.partialorder %v5907_v14, 0.0 }
 0x414   : > { %6006 = vst [vmem:[#allocation32_spill] sm:$0xff] %v4996_v18  ;;  %6007 = vst [vmem:[#allocation15_spill] sm:$0xff] %v4998_v13  ;;  %vm1951_vm0 = vcmp.gt.f32.partialorder %v5909_v45, 0.0  ;;  %vm1952_vm2 = vcmp.gt.f32.partialorder %v5911_v10, 0.0  ;;  %vm1953_vm1 = vcmp.gt.f32.partialorder %v5913_v24, 0.0  ;;  %v1954_v11 = vsel %vm1942_vm10, %v5891_v57, 1.0 }
 0x415   : > { %6008 = vst [vmem:[#allocation33_spill] sm:$0xff] %v5000_v58  ;;  %6009 = vst [vmem:[#allocation16_spill] sm:$0xff] %v5002_v27  ;;  %v1955_v38 = vsel %vm1943_vm11, %v5893_v49, 1.0  ;;  %v1956_v0 = vsel %vm1944_vm12, %v5895_v19, 1.0  ;;  %v1957_v62 = vsel %vm1945_vm13, %v5897_v12, 1.0  ;;  %v1958_v1 = vsel %vm1946_vm5, %v5899_v15, 1.0 }
 0x416   : > { %6010 = vst [vmem:[#allocation34_spill] sm:$0xff] %v5004_v29  ;;  %v1959_v23 = vsel %vm1947_vm14, %v5901_v25, 1.0  ;;  %v1960_v52 = vsel %vm1948_vm4, %v5903_v34, 1.0  ;;  %v1961_v59 = vsel %vm1949_vm15, %v5905_v43, 1.0  ;;  %v1962_v31 = vsel %vm1950_vm3, %v5907_v14, 1.0 }
 0x417   : > { %v1963_v28 = vsel %vm1951_vm0, %v5909_v45, 1.0  ;;  %v1964_v46 = vsel %vm1952_vm2, %v5911_v10, 1.0  ;;  %v1965_v61 = vsel %vm1953_vm1, %v5913_v24, 1.0  ;;  %3185 = vrcp.f32 %v1954_v11 }
 0x418   : > { %v5055_v16 = vadd.f32 5.0, %v4982_v54  ;;  %3187 = vrcp.f32 %v1955_v38  ;;  %v5058_v51 = vadd.f32 5.0, %v4984_v35  ;;  %v5061_v50 = vadd.f32 5.0, %v4986_v7 }
 0x419   : > { %v5064_v44 = vadd.f32 5.0, %v4988_v30  ;;  %3189 = vrcp.f32 %v1956_v0  ;;  %v5067_v4 = vadd.f32 5.0, %v4990_v2  ;;  %v5070_v22 = vadd.f32 5.0, %v4992_v17 }
 0x41a   : > { %v5073_v48 = vadd.f32 5.0, %v4994_v55  ;;  %3191 = vrcp.f32 %v1957_v62  ;;  %v5076_v63 = vadd.f32 5.0, %v4996_v18  ;;  %v5079_v33 = vadd.f32 5.0, %v4998_v13 }
 0x41b   : > { %v5082_v41 = vadd.f32 5.0, %v5000_v58  ;;  %3193 = vrcp.f32 %v1958_v1  ;;  %v5085_v47 = vadd.f32 5.0, %v5002_v27  ;;  %v5088_v26 = vadd.f32 5.0, %v5004_v29 }
 0x41c   : > { %v2026_v9 = vmul.f32 0.16666667, %v5055_v16  ;;  %3195 = vrcp.f32 %v1959_v23  ;;  %v2027_v42 = vmul.f32 0.16666667, %v5058_v51  ;;  %v2028_v5 = vmul.f32 0.16666667, %v5061_v50 }
 0x41d   : > { %v2029_v20 = vmul.f32 0.16666667, %v5064_v44  ;;  %3197 = vrcp.f32 %v1960_v52  ;;  %v2030_v37 = vmul.f32 0.16666667, %v5067_v4  ;;  %v2031_v36 = vmul.f32 0.16666667, %v5070_v22 }
 0x41e   : > { %v2032_v56 = vmul.f32 0.16666667, %v5073_v48  ;;  %3199 = vrcp.f32 %v1961_v59  ;;  %v2033_v39 = vmul.f32 0.16666667, %v5076_v63  ;;  %v5099_v11 = vmul.f32 0.16666667, %v5079_v33 }
 0x41f   : > { %v5102_v38 = vmul.f32 0.16666667, %v5082_v41  ;;  %3201 = vrcp.f32 %v1962_v31  ;;  %v5105_v0 = vmul.f32 0.16666667, %v5085_v47  ;;  %v5108_v62 = vmul.f32 0.16666667, %v5088_v26 }
 0x420   : > { %v2038_v1 = vfloor.f32 %v2026_v9  ;;  %3203 = vrcp.f32 %v1963_v28  ;;  %v2039_v23 = vfloor.f32 %v2027_v42  ;;  %v2040_v52 = vfloor.f32 %v2028_v5 }
 0x421   : > { %v2041_v59 = vfloor.f32 %v2029_v20  ;;  %v3186_v29 = vpop.eup %3185  ;;  %3205 = vrcp.f32 %v1964_v46  ;;  %v2042_v27 = vfloor.f32 %v2030_v37  ;;  %v2043_v58 = vfloor.f32 %v2031_v36 }
 0x422   : > { %v2044_v13 = vfloor.f32 %v2032_v56  ;;  %v3188_v18 = vpop.eup %3187  ;;  %v1967_v55 = vmul.f32 %v3186_v29, %v5974_v60  ;;  %3207 = vrcp.f32 %v1965_v61  ;;  %v2045_v31 = vfloor.f32 %v2033_v39 }
 0x423   : > { %v2046_v17 = vfloor.f32 %v5099_v11  ;;  %v3190_v2 = vpop.eup %3189  ;;  %v1969_v30 = vmul.f32 %v3188_v18, %v5976_v8  ;;  %v2047_v28 = vfloor.f32 %v5102_v38  ;;  %v2048_v9 = vfloor.f32 %v5105_v0 }
 0x424   : > { %v2049_v42 = vfloor.f32 %v5108_v62  ;;  %v3192_v46 = vpop.eup %3191  ;;  %v1971_v5 = vmul.f32 %v3190_v2, %v5978_v32  ;;  %v1990_v20 = vsel %vm1942_vm10, %v1967_v55, 0.0  ;;  %v2050_v60 = vmul.f32 6.0, %v2038_v1 }
 0x425   : > { %v2051_v29 = vmul.f32 6.0, %v2039_v23  ;;  %v3194_v61 = vpop.eup %3193  ;;  %v1973_v37 = vmul.f32 %v3192_v46, %v5980_v40  ;;  %v1991_v8 = vsel %vm1943_vm11, %v1969_v30, 0.0  ;;  %v5123_v18 = vmul.f32 %v1990_v20, %v5891_v57 }
 0x426   : > { %v2052_v36 = vmul.f32 6.0, %v2040_v52  ;;  %v3196_v56 = vpop.eup %3195  ;;  %v1975_v39 = vmul.f32 %v3194_v61, %v5982_v3  ;;  %v1992_v32 = vsel %vm1944_vm12, %v1971_v5, 0.0  ;;  %v5129_v2 = vmul.f32 %v1991_v8, %v5893_v49  ;;  %v6011_v61 = vld [vmem:[#allocation49_spill] sm:$0xff] }
 0x427   : > { %v2053_v55 = vmul.f32 6.0, %v2041_v59  ;;  %v3198_v11 = vpop.eup %3197  ;;  %v1977_v40 = vmul.f32 %v3196_v56, %v5984_v6  ;;  %v1993_v30 = vsel %vm1945_vm13, %v1973_v37, 0.0  ;;  %v5135_v38 = vmul.f32 %v1992_v32, %v5895_v19 }
 0x428   : > { %v2054_v0 = vmul.f32 6.0, %v2042_v27  ;;  %v3200_v62 = vpop.eup %3199  ;;  %v1979_v3 = vmul.f32 %v3198_v11, %v5986_v53  ;;  %v1994_v1 = vsel %vm1946_vm5, %v1975_v39, 0.0  ;;  %v5141_v23 = vmul.f32 %v1993_v30, %v5897_v12  ;;  %v6012_v39 = vld [vmem:[#allocation50_spill] sm:$0xff]  ;;  %v6013_v30 = vld [vmem:[#allocation51_spill] sm:$0xff] }
 0x429   : > { %v2055_v52 = vmul.f32 6.0, %v2043_v58  ;;  %v3202_v59 = vpop.eup %3201  ;;  %v1981_v6 = vmul.f32 %v3200_v62, %v5988_v21  ;;  %v1995_v46 = vsel %vm1947_vm14, %v1977_v40, 0.0  ;;  %v5147_v5 = vmul.f32 %v1994_v1, %v5899_v15 }
 0x42a   : > { %v2056_v27 = vmul.f32 6.0, %v2044_v13  ;;  %v3204_v20 = vpop.eup %3203  ;;  %v1983_v53 = vmul.f32 %v3202_v59, %v6011_v61  ;;  %v1996_v37 = vsel %vm1948_vm4, %v1979_v3, 0.0  ;;  %v5153_v8 = vmul.f32 %v1995_v46, %v5901_v25  ;;  %v6014_v59 = vld [vmem:[#allocation52_spill] sm:$0xff] }
 0x42b   : > { %v2057_v58 = vmul.f32 6.0, %v2045_v31  ;;  %v3206_v56 = vpop.eup %3205  ;;  %v1985_v21 = vmul.f32 %v3204_v20, %v6012_v39  ;;  %v1997_v32 = vsel %vm1949_vm15, %v1981_v6, 0.0  ;;  %v5159_v11 = vmul.f32 %v1996_v37, %v5903_v34 }
 0x42c   : > { %v2058_v13 = vmul.f32 6.0, %v2046_v17  ;;  %v3208_v40 = vpop.eup %3207  ;;  %v1987_v62 = vmul.f32 %v3206_v56, %v6013_v30  ;;  %v1998_v3 = vsel %vm1950_vm3, %v1983_v53, 0.0  ;;  %v5165_v1 = vmul.f32 %v1997_v32, %v5905_v43 }
 0x42d   : > { %v2059_v31 = vmul.f32 6.0, %v2047_v28  ;;  %v1989_v46 = vmul.f32 %v3208_v40, %v6014_v59  ;;  %v1999_v20 = vsel %vm1951_vm0, %v1985_v21, 0.0  ;;  %v5171_v6 = vmul.f32 %v1998_v3, %v5907_v14 }
 0x42e   : > { %v2060_v61 = vmul.f32 6.0, %v2048_v9  ;;  %v2000_v17 = vsel %vm1952_vm2, %v1987_v62, 0.0  ;;  %v5176_v37 = vmul.f32 %v1999_v20, %v5909_v45  ;;  %v2061_v53 = vmul.f32 6.0, %v2049_v42 }
 0x42f   : > { %v2062_v56 = vsub.f32 %v5055_v16, %v2050_v60  ;;  %v2001_v28 = vsel %vm1953_vm1, %v1989_v46, 0.0  ;;  %v5182_v39 = vmul.f32 %v2000_v17, %v5911_v10  ;;  %v2063_v21 = vsub.f32 %v5058_v51, %v2051_v29 }
 0x430   : > { %v2064_v32 = vsub.f32 %v5061_v50, %v2052_v36  ;;  %v5187_v9 = vmul.f32 %v2001_v28, %v5913_v24  ;;  %v2065_v40 = vsub.f32 %v5064_v44, %v2053_v55  ;;  %v2066_v30 = vsub.f32 %v5067_v4, %v2054_v0 }
 0x431   : > { %v2067_v42 = vsub.f32 %v5070_v22, %v2055_v52  ;;  %v2068_v16 = vsub.f32 %v5073_v48, %v2056_v27  ;;  %v2069_v60 = vsub.f32 %v5076_v63, %v2057_v58  ;;  %v2070_v62 = vsub.f32 %v5079_v33, %v2058_v13 }
 0x432   : > { %v2071_v3 = vsub.f32 %v5082_v41, %v2059_v31  ;;  %v2072_v51 = vsub.f32 %v5085_v47, %v2060_v61  ;;  %v2073_v50 = vsub.f32 %v5088_v26, %v2061_v53  ;;  %v2074_v29 = vsub.f32 4.0, %v2062_v56 }
 0x433   : > { %v2075_v36 = vsub.f32 4.0, %v2063_v21  ;;  %v2076_v59 = vsub.f32 4.0, %v2064_v32  ;;  %v2077_v44 = vsub.f32 4.0, %v2065_v40  ;;  %v2078_v55 = vsub.f32 4.0, %v2066_v30 }
 0x434   : > { %v2079_v4 = vsub.f32 4.0, %v2067_v42  ;;  %v2080_v0 = vsub.f32 4.0, %v2068_v16  ;;  %v2081_v22 = vsub.f32 4.0, %v2069_v60  ;;  %v2082_v52 = vsub.f32 4.0, %v2070_v62 }
 0x435   : > { %v2083_v48 = vsub.f32 4.0, %v2071_v3  ;;  %v2084_v27 = vsub.f32 4.0, %v2072_v51  ;;  %v2085_v63 = vsub.f32 4.0, %v2073_v50  ;;  %v2086_v58 = vmin.f32 %v2062_v56, %v2074_v29 }
 0x436   : > { %v2087_v33 = vmin.f32 %v2063_v21, %v2075_v36  ;;  %v2088_v13 = vmin.f32 %v2064_v32, %v2076_v59  ;;  %v2089_v41 = vmin.f32 %v2065_v40, %v2077_v44  ;;  %v2090_v31 = vmin.f32 %v2066_v30, %v2078_v55 }
 0x437   : > { %v2091_v47 = vmin.f32 %v2067_v42, %v2079_v4  ;;  %v2092_v46 = vmin.f32 %v2068_v16, %v2080_v0  ;;  %v2093_v26 = vmin.f32 %v2069_v60, %v2081_v22  ;;  %v2094_v20 = vmin.f32 %v2070_v62, %v2082_v52 }
 0x438   : > { %v2095_v61 = vmin.f32 %v2071_v3, %v2083_v48  ;;  %v2096_v17 = vmin.f32 %v2072_v51, %v2084_v27  ;;  %v2097_v53 = vmin.f32 %v2073_v50, %v2085_v63  ;;  %v2098_v28 = vmax.f32 %v2086_v58, 0.0 }
 0x439   : > { %v2099_v24 = vmax.f32 %v2087_v33, 0.0  ;;  %v2100_v10 = vmax.f32 %v2088_v13, 0.0  ;;  %v2101_v7 = vmax.f32 %v2089_v41, 0.0  ;;  %v2102_v35 = vmax.f32 %v2090_v31, 0.0  ;;  %v6040_v31 = vld [vmem:[#allocation34_spill] sm:$0xff] }
 0x43a   : > { %v2103_v54 = vmax.f32 %v2091_v47, 0.0  ;;  %v2104_v45 = vmax.f32 %v2092_v46, 0.0  ;;  %v2105_v14 = vmax.f32 %v2093_v26, 0.0  ;;  %v2106_v56 = vmax.f32 %v2094_v20, 0.0  ;;  %v6039_v20 = vld [vmem:[#allocation16_spill] sm:$0xff] }
 0x43b   : > { %v2107_v21 = vmax.f32 %v2095_v61, 0.0  ;;  %v2108_v32 = vmax.f32 %v2096_v17, 0.0  ;;  %v2109_v40 = vmax.f32 %v2097_v53, 0.0  ;;  %v2110_v30 = vmin.f32 %v2098_v28, 1.0  ;;  %v6029_v61 = vld [vmem:[#allocation11_spill] sm:$0xff]  ;;  %v6030_v53 = vld [vmem:[#allocation29_spill] sm:$0xff] }
 0x43c   : > { %v2111_v42 = vmin.f32 %v2099_v24, 1.0  ;;  %v2112_v16 = vmin.f32 %v2100_v10, 1.0  ;;  %v2113_v60 = vmin.f32 %v2101_v7, 1.0  ;;  %v2114_v62 = vmin.f32 %v2102_v35, 1.0 }
 0x43d   : > { %v2115_v3 = vmin.f32 %v2103_v54, 1.0  ;;  %v2116_v51 = vmin.f32 %v2104_v45, 1.0  ;;  %v2117_v50 = vmin.f32 %v2105_v14, 1.0  ;;  %v2118_v29 = vmin.f32 %v2106_v56, 1.0  ;;  %v6031_v56 = vld [vmem:[#allocation12_spill] sm:$0xff] }
 0x43e   : > { %v2119_v36 = vmin.f32 %v2107_v21, 1.0  ;;  %v2120_v59 = vmin.f32 %v2108_v32, 1.0  ;;  %v2121_v44 = vmin.f32 %v2109_v40, 1.0  ;;  %v5199_v55 = vmul.f32 %v2110_v30, %v5123_v18  ;;  %v6032_v32 = vld [vmem:[#allocation30_spill] sm:$0xff]  ;;  %v6033_v30 = vld [vmem:[#allocation13_spill] sm:$0xff] }
 0x43f   : > { %v5202_v4 = vmul.f32 %v2111_v42, %v5129_v2  ;;  %v5205_v0 = vmul.f32 %v2112_v16, %v5135_v38  ;;  %v5208_v24 = vmul.f32 %v2113_v60, %v5141_v23  ;;  %v5211_v10 = vmul.f32 %v2114_v62, %v5147_v5  ;;  %v6034_v16 = vld [vmem:[#allocation31_spill] sm:$0xff]  ;;  %v6035_v62 = vld [vmem:[#allocation14_spill] sm:$0xff] }
 0x440   : > { %6015 = vst [vmem:[#allocation35_spill] sm:$0xff] %v5199_v55  ;;  %v5214_v14 = vmul.f32 %v2115_v3, %v5153_v8  ;;  %v5217_v45 = vmul.f32 %v2116_v51, %v5159_v11  ;;  %v5220_v54 = vmul.f32 %v2117_v50, %v5165_v1  ;;  %v5223_v35 = vmul.f32 %v2118_v29, %v5171_v6  ;;  %v6036_v51 = vld [vmem:[#allocation32_spill] sm:$0xff]  ;;  %v6037_v29 = vld [vmem:[#allocation15_spill] sm:$0xff] }
 0x441   : > { %6016 = vst [vmem:[#allocation64_spill] sm:$0xff] %v5202_v4  ;;  %6017 = vst [vmem:[#allocation17_spill] sm:$0xff] %v5205_v0  ;;  %v5226_v7 = vmul.f32 %v2119_v36, %v5176_v37  ;;  %v5229_v22 = vmul.f32 %v2120_v59, %v5182_v39  ;;  %v5232_v52 = vmul.f32 %v2121_v44, %v5187_v9  ;;  %v2146_v17 = vadd.f32 3.0, %v6029_v61  ;;  %v6038_v59 = vld [vmem:[#allocation33_spill] sm:$0xff] }
 0x442   : > { %6018 = vst [vmem:[#allocation67_spill] sm:$0xff] %v5208_v24  ;;  %6019 = vst [vmem:[#allocation18_spill] sm:$0xff] %v5211_v10  ;;  %v2147_v28 = vadd.f32 3.0, %v6030_v53  ;;  %v2148_v21 = vadd.f32 3.0, %v6031_v56  ;;  %v2149_v40 = vadd.f32 3.0, %v6032_v32  ;;  %v2150_v42 = vadd.f32 3.0, %v6033_v30 }
 0x443   : > { %6020 = vst [vmem:[#allocation78_spill] sm:$0xff] %v5214_v14  ;;  %6021 = vst [vmem:[#allocation19_spill] sm:$0xff] %v5217_v45  ;;  %v2151_v60 = vadd.f32 3.0, %v6034_v16  ;;  %v2152_v3 = vadd.f32 3.0, %v6035_v62  ;;  %v2153_v50 = vadd.f32 3.0, %v6036_v51  ;;  %v2154_v36 = vadd.f32 3.0, %v6037_v29 }
 0x444   : > { %6022 = vst [vmem:[#allocation79_spill] sm:$0xff] %v5220_v54  ;;  %6023 = vst [vmem:[#allocation20_spill] sm:$0xff] %v5223_v35  ;;  %v2155_v44 = vadd.f32 3.0, %v6038_v59  ;;  %v2156_v46 = vadd.f32 3.0, %v6039_v20  ;;  %v2157_v41 = vadd.f32 3.0, %v6040_v31 }
 0x445   : > { %6024 = vst [vmem:[#allocation80_spill] sm:$0xff] %v5226_v7  ;;  %6025 = vst [vmem:[#allocation27_spill] sm:$0xff] %v5229_v22  ;;  %v2158_v13 = vmul.f32 0.16666667, %v2146_v17  ;;  %v2159_v33 = vmul.f32 0.16666667, %v2147_v28 }
 0x446   : > { %6026 = vst [vmem:[#allocation81_spill] sm:$0xff] %v5232_v52  ;;  %v2160_v27 = vmul.f32 0.16666667, %v2148_v21  ;;  %v2161_v48 = vmul.f32 0.16666667, %v2149_v40 }
 0x447   : > { %v2162_v7 = vmul.f32 0.16666667, %v2150_v42  ;;  %v2163_v35 = vmul.f32 0.16666667, %v2151_v60  ;;  %v2164_v54 = vmul.f32 0.16666667, %v2152_v3  ;;  %v2170_v14 = vfloor.f32 %v2158_v13 }
 0x448   : > { %v2165_v45 = vmul.f32 0.16666667, %v2153_v50  ;;  %v2166_v10 = vmul.f32 0.16666667, %v2154_v36  ;;  %v2167_v24 = vmul.f32 0.16666667, %v2155_v44  ;;  %v2171_v4 = vfloor.f32 %v2159_v33 }
 0x449   : > { %v2168_v0 = vmul.f32 0.16666667, %v2156_v46  ;;  %v2169_v55 = vmul.f32 0.16666667, %v2157_v41  ;;  %v2172_v20 = vfloor.f32 %v2160_v27  ;;  %v2173_v59 = vfloor.f32 %v2161_v48 }
 0x44a   : > { %v2174_v31 = vfloor.f32 %v2162_v7  ;;  %v2175_v29 = vfloor.f32 %v2163_v35  ;;  %v2176_v51 = vfloor.f32 %v2164_v54  ;;  %v2177_v62 = vfloor.f32 %v2165_v45 }
 0x44b   : > { %v2178_v16 = vfloor.f32 %v2166_v10  ;;  %v2179_v63 = vfloor.f32 %v2167_v24  ;;  %v2180_v22 = vfloor.f32 %v2168_v0  ;;  %v2181_v30 = vfloor.f32 %v2169_v55 }
 0x44c   : > { %v2182_v32 = vmul.f32 6.0, %v2170_v14  ;;  %v2183_v56 = vmul.f32 6.0, %v2171_v4  ;;  %v2184_v53 = vmul.f32 6.0, %v2172_v20  ;;  %v2185_v61 = vmul.f32 6.0, %v2173_v59 }
 0x44d   : > { %v2186_v13 = vmul.f32 6.0, %v2174_v31  ;;  %v2187_v58 = vmul.f32 6.0, %v2175_v29  ;;  %v2188_v26 = vmul.f32 6.0, %v2176_v51  ;;  %v2189_v47 = vmul.f32 6.0, %v2177_v62 }
 0x44e   : > { %v2190_v33 = vmul.f32 6.0, %v2178_v16  ;;  %v2191_v43 = vmul.f32 6.0, %v2179_v63  ;;  %v2192_v27 = vmul.f32 6.0, %v2180_v22  ;;  %v2193_v48 = vmul.f32 6.0, %v2181_v30 }
 0x44f   : > { %v2194_v7 = vsub.f32 %v2146_v17, %v2182_v32  ;;  %v2195_v35 = vsub.f32 %v2147_v28, %v2183_v56  ;;  %v2196_v54 = vsub.f32 %v2148_v21, %v2184_v53  ;;  %v2197_v45 = vsub.f32 %v2149_v40, %v2185_v61 }
 0x450   : > { %v2198_v10 = vsub.f32 %v2150_v42, %v2186_v13  ;;  %v2199_v24 = vsub.f32 %v2151_v60, %v2187_v58  ;;  %v2200_v0 = vsub.f32 %v2152_v3, %v2188_v26  ;;  %v2201_v55 = vsub.f32 %v2153_v50, %v2189_v47 }
 0x451   : > { %v2202_v14 = vsub.f32 %v2154_v36, %v2190_v33  ;;  %v2203_v4 = vsub.f32 %v2155_v44, %v2191_v43  ;;  %v2204_v20 = vsub.f32 %v2156_v46, %v2192_v27  ;;  %v2205_v59 = vsub.f32 %v2157_v41, %v2193_v48 }
 0x452   : > { %v2206_v31 = vsub.f32 4.0, %v2194_v7  ;;  %v2207_v29 = vsub.f32 4.0, %v2195_v35  ;;  %v2208_v51 = vsub.f32 4.0, %v2196_v54  ;;  %v2209_v62 = vsub.f32 4.0, %v2197_v45 }
 0x453   : > { %v2210_v16 = vsub.f32 4.0, %v2198_v10  ;;  %v2211_v63 = vsub.f32 4.0, %v2199_v24  ;;  %v2212_v22 = vsub.f32 4.0, %v2200_v0  ;;  %v2213_v30 = vsub.f32 4.0, %v2201_v55 }
 0x454   : > { %v2214_v17 = vsub.f32 4.0, %v2202_v14  ;;  %v2215_v28 = vsub.f32 4.0, %v2203_v4  ;;  %v2216_v53 = vsub.f32 4.0, %v2204_v20  ;;  %v2217_v61 = vsub.f32 4.0, %v2205_v59 }
 0x455   : > { %v2218_v56 = vmin.f32 %v2194_v7, %v2206_v31  ;;  %v2219_v58 = vmin.f32 %v2195_v35, %v2207_v29  ;;  %v2220_v26 = vmin.f32 %v2196_v54, %v2208_v51  ;;  %v2221_v47 = vmin.f32 %v2197_v45, %v2209_v62 }
 0x456   : > { %v2222_v21 = vmin.f32 %v2198_v10, %v2210_v16  ;;  %v2223_v43 = vmin.f32 %v2199_v24, %v2211_v63  ;;  %v2224_v46 = vmin.f32 %v2200_v0, %v2212_v22  ;;  %v2225_v41 = vmin.f32 %v2201_v55, %v2213_v30 }
 0x457   : > { %v2226_v32 = vmin.f32 %v2202_v14, %v2214_v17  ;;  %v2227_v40 = vmin.f32 %v2203_v4, %v2215_v28  ;;  %v2228_v42 = vmin.f32 %v2204_v20, %v2216_v53  ;;  %v2229_v60 = vmin.f32 %v2205_v59, %v2217_v61 }
 0x458   : > { %v2230_v3 = vmax.f32 %v2218_v56, 0.0  ;;  %v2231_v50 = vmax.f32 %v2219_v58, 0.0  ;;  %v2232_v36 = vmax.f32 %v2220_v26, 0.0  ;;  %v2233_v44 = vmax.f32 %v2221_v47, 0.0 }
 0x459   : > { %v2234_v13 = vmax.f32 %v2222_v21, 0.0  ;;  %v2235_v33 = vmax.f32 %v2223_v43, 0.0  ;;  %v2236_v27 = vmax.f32 %v2224_v46, 0.0  ;;  %v2237_v48 = vmax.f32 %v2225_v41, 0.0 }
 0x45a   : > { %v2238_v7 = vmax.f32 %v2226_v32, 0.0  ;;  %v2239_v35 = vmax.f32 %v2227_v40, 0.0  ;;  %v2240_v54 = vmax.f32 %v2228_v42, 0.0  ;;  %v2241_v45 = vmax.f32 %v2229_v60, 0.0  ;;  %v6069_v60 = vld [vmem:[#allocation16_spill] sm:$0xff]  ;;  %v6070_v42 = vld [vmem:[#allocation34_spill] sm:$0xff] }
 0x45b   : > { %v2242_v10 = vmin.f32 %v2230_v3, 1.0  ;;  %v2243_v24 = vmin.f32 %v2231_v50, 1.0  ;;  %v2244_v0 = vmin.f32 %v2232_v36, 1.0  ;;  %v2245_v55 = vmin.f32 %v2233_v44, 1.0  ;;  %v6055_v50 = vld [vmem:[#allocation36_spill] sm:$0xff]  ;;  %v6068_v3 = vld [vmem:[#allocation33_spill] sm:$0xff] }
 0x45c   : > { %v2246_v14 = vmin.f32 %v2234_v13, 1.0  ;;  %v2247_v4 = vmin.f32 %v2235_v33, 1.0  ;;  %v2248_v20 = vmin.f32 %v2236_v27, 1.0  ;;  %v2249_v59 = vmin.f32 %v2237_v48, 1.0  ;;  %v6067_v27 = vld [vmem:[#allocation15_spill] sm:$0xff] }
 0x45d   : > { %v2250_v31 = vmin.f32 %v2238_v7, 1.0  ;;  %v2251_v29 = vmin.f32 %v2239_v35, 1.0  ;;  %v2252_v51 = vmin.f32 %v2240_v54, 1.0  ;;  %v2253_v62 = vmin.f32 %v2241_v45, 1.0  ;;  %v6059_v35 = vld [vmem:[#allocation11_spill] sm:$0xff]  ;;  %v6060_v45 = vld [vmem:[#allocation29_spill] sm:$0xff] }
 0x45e   : > { %v5269_v16 = vmul.f32 %v2242_v10, %v5123_v18  ;;  %v5272_v63 = vmul.f32 %v2243_v24, %v5129_v2  ;;  %v5275_v22 = vmul.f32 %v2244_v0, %v5135_v38  ;;  %v5278_v30 = vmul.f32 %v2245_v55, %v5141_v23  ;;  %v6061_v24 = vld [vmem:[#allocation12_spill] sm:$0xff]  ;;  %v6062_v55 = vld [vmem:[#allocation30_spill] sm:$0xff] }
 0x45f   : > { %v5281_v17 = vmul.f32 %v2246_v14, %v5147_v5  ;;  %v5284_v28 = vmul.f32 %v2247_v4, %v5153_v8  ;;  %v5287_v53 = vmul.f32 %v2248_v20, %v5159_v11  ;;  %v5290_v61 = vmul.f32 %v2249_v59, %v5165_v1  ;;  %v6063_v4 = vld [vmem:[#allocation13_spill] sm:$0xff]  ;;  %v6064_v59 = vld [vmem:[#allocation31_spill] sm:$0xff] }
 0x460   : > { %6042 = vst [vmem:[#allocation28_spill] sm:$0xff] %v5269_v16  ;;  %6043 = vst [vmem:[#allocation53_spill] sm:$0xff] %v5272_v63  ;;  %v5293_v56 = vmul.f32 %v2250_v31, %v5171_v6  ;;  %v5298_v47 = vmul.f32 %v2251_v29, %v5176_v37  ;;  %v5301_v21 = vmul.f32 %v2252_v51, %v5182_v39  ;;  %v2278_v54 = vadd.f32 1.0, %v6059_v35  ;;  %v6065_v29 = vld [vmem:[#allocation14_spill] sm:$0xff] }
 0x461   : > { %6044 = vst [vmem:[#allocation59_spill] sm:$0xff] %v5275_v22  ;;  %6045 = vst [vmem:[#allocation55_spill] sm:$0xff] %v5278_v30  ;;  %v5304_v43 = vmul.f32 %v2253_v62, %v5187_v9  ;;  %v2279_v10 = vadd.f32 1.0, %v6060_v45  ;;  %v2280_v0 = vadd.f32 1.0, %v6061_v24  ;;  %v2281_v14 = vadd.f32 1.0, %v6062_v55  ;;  %v6066_v62 = vld [vmem:[#allocation32_spill] sm:$0xff] }
 0x462   : > { %6046 = vst [vmem:[#allocation61_spill] sm:$0xff] %v5281_v17  ;;  %6047 = vst [vmem:[#allocation56_spill] sm:$0xff] %v5284_v28  ;;  %v2282_v20 = vadd.f32 1.0, %v6063_v4  ;;  %v2283_v31 = vadd.f32 1.0, %v6064_v59  ;;  %v2284_v51 = vadd.f32 1.0, %v6065_v29  ;;  %v2285_v13 = vadd.f32 1.0, %v6066_v62 }
 0x463   : > { %6048 = vst [vmem:[#allocation63_spill] sm:$0xff] %v5287_v53  ;;  %6049 = vst [vmem:[#allocation57_spill] sm:$0xff] %v5290_v61  ;;  %v2286_v36 = vadd.f32 1.0, %v6067_v27  ;;  %v2287_v7 = vadd.f32 1.0, %v6068_v3  ;;  %v2288_v35 = vadd.f32 1.0, %v6069_v60  ;;  %v2289_v45 = vadd.f32 1.0, %v6070_v42 }
 0x464   : > { %6050 = vst [vmem:[#allocation66_spill] sm:$0xff] %v5293_v56  ;;  %6052 = vst [vmem:[#allocation58_spill] sm:$0xff] %v5298_v47  ;;  %v2290_v40 = vmul.f32 0.16666667, %v2278_v54  ;;  %v2291_v55 = vmul.f32 0.16666667, %v2279_v10 }
 0x465   : > { %6053 = vst [vmem:[#allocation69_spill] sm:$0xff] %v5301_v21  ;;  %6054 = vst [vmem:[#allocation21_spill] sm:$0xff] %v5304_v43  ;;  %v2292_v4 = vmul.f32 0.16666667, %v2280_v0  ;;  %v2293_v32 = vmul.f32 0.16666667, %v2281_v14 }
 0x466   : > { %v2294_v59 = vmul.f32 0.16666667, %v2282_v20  ;;  %v2295_v41 = vmul.f32 0.16666667, %v2283_v31  ;;  %v2296_v29 = vmul.f32 0.16666667, %v2284_v51  ;;  %v2302_v46 = vfloor.f32 %v2290_v40 }
 0x467   : > { %v2297_v62 = vmul.f32 0.16666667, %v2285_v13  ;;  %v2298_v26 = vmul.f32 0.16666667, %v2286_v36  ;;  %v2299_v27 = vmul.f32 0.16666667, %v2287_v7  ;;  %v2303_v21 = vfloor.f32 %v2291_v55 }
 0x468   : > { %v2300_v3 = vmul.f32 0.16666667, %v2288_v35  ;;  %v2301_v47 = vmul.f32 0.16666667, %v2289_v45  ;;  %v2304_v60 = vfloor.f32 %v2292_v4  ;;  %v2305_v56 = vfloor.f32 %v2293_v32 }
 0x469   : > { %v2306_v42 = vfloor.f32 %v2294_v59  ;;  %v2307_v61 = vfloor.f32 %v2295_v41  ;;  %v2308_v53 = vfloor.f32 %v2296_v29  ;;  %v2309_v28 = vfloor.f32 %v2297_v62 }
 0x46a   : > { %v2310_v24 = vfloor.f32 %v2298_v26  ;;  %v2311_v43 = vfloor.f32 %v2299_v27  ;;  %v2312_v17 = vfloor.f32 %v2300_v3  ;;  %v2313_v30 = vfloor.f32 %v2301_v47 }
 0x46b   : > { %v2314_v22 = vmul.f32 6.0, %v2302_v46  ;;  %v2315_v63 = vmul.f32 6.0, %v2303_v21  ;;  %v2316_v16 = vmul.f32 6.0, %v2304_v60  ;;  %v2317_v40 = vmul.f32 6.0, %v2305_v56 }
 0x46c   : > { %v2318_v52 = vmul.f32 6.0, %v2306_v42  ;;  %v2319_v58 = vmul.f32 6.0, %v2307_v61  ;;  %v2320_v48 = vmul.f32 6.0, %v2308_v53  ;;  %v2321_v55 = vmul.f32 6.0, %v2309_v28 }
 0x46d   : > { %v2322_v33 = vmul.f32 6.0, %v2310_v24  ;;  %v2323_v44 = vmul.f32 6.0, %v2311_v43  ;;  %v2324_v4 = vmul.f32 6.0, %v2312_v17  ;;  %v2325_v32 = vmul.f32 6.0, %v2313_v30 }
 0x46e   : > { %v2326_v59 = vsub.f32 %v2278_v54, %v2314_v22  ;;  %v2327_v41 = vsub.f32 %v2279_v10, %v2315_v63  ;;  %v2328_v29 = vsub.f32 %v2280_v0, %v2316_v16  ;;  %v2329_v62 = vsub.f32 %v2281_v14, %v2317_v40 }
 0x46f   : > { %v2330_v26 = vsub.f32 %v2282_v20, %v2318_v52  ;;  %v2331_v27 = vsub.f32 %v2283_v31, %v2319_v58  ;;  %v2332_v3 = vsub.f32 %v2284_v51, %v2320_v48  ;;  %v2333_v47 = vsub.f32 %v2285_v13, %v2321_v55 }
 0x470   : > { %v2334_v46 = vsub.f32 %v2286_v36, %v2322_v33  ;;  %v2335_v21 = vsub.f32 %v2287_v7, %v2323_v44  ;;  %v2336_v60 = vsub.f32 %v2288_v35, %v2324_v4  ;;  %v2337_v56 = vsub.f32 %v2289_v45, %v2325_v32 }
 0x471   : > { %v2338_v42 = vsub.f32 4.0, %v2326_v59  ;;  %v2339_v61 = vsub.f32 4.0, %v2327_v41  ;;  %v2340_v53 = vsub.f32 4.0, %v2328_v29  ;;  %v2341_v28 = vsub.f32 4.0, %v2329_v62 }
 0x472   : > { %v2342_v24 = vsub.f32 4.0, %v2330_v26  ;;  %v2343_v43 = vsub.f32 4.0, %v2331_v27  ;;  %v2344_v17 = vsub.f32 4.0, %v2332_v3  ;;  %v2345_v30 = vsub.f32 4.0, %v2333_v47 }
 0x473   : > { %v2346_v22 = vsub.f32 4.0, %v2334_v46  ;;  %v2347_v63 = vsub.f32 4.0, %v2335_v21  ;;  %v2348_v16 = vsub.f32 4.0, %v2336_v60  ;;  %v2349_v54 = vsub.f32 4.0, %v2337_v56 }
 0x474   : > { %v2350_v52 = vmin.f32 %v2326_v59, %v2338_v42  ;;  %v2351_v58 = vmin.f32 %v2327_v41, %v2339_v61  ;;  %v2352_v48 = vmin.f32 %v2328_v29, %v2340_v53  ;;  %v2353_v13 = vmin.f32 %v2329_v62, %v2341_v28 }
 0x475   : > { %v2354_v36 = vmin.f32 %v2330_v26, %v2342_v24  ;;  %v2355_v44 = vmin.f32 %v2331_v27, %v2343_v43  ;;  %v2356_v33 = vmin.f32 %v2332_v3, %v2344_v17  ;;  %v2357_v7 = vmin.f32 %v2333_v47, %v2345_v30 }
 0x476   : > { %v2358_v10 = vmin.f32 %v2334_v46, %v2346_v22  ;;  %v2359_v0 = vmin.f32 %v2335_v21, %v2347_v63  ;;  %v2360_v14 = vmin.f32 %v2336_v60, %v2348_v16  ;;  %v2361_v20 = vmin.f32 %v2337_v56, %v2349_v54 }
 0x477   : > { %v2362_v31 = vmax.f32 %v2350_v52, 0.0  ;;  %v2363_v51 = vmax.f32 %v2351_v58, 0.0  ;;  %v2364_v35 = vmax.f32 %v2352_v48, 0.0  ;;  %v2365_v45 = vmax.f32 %v2353_v13, 0.0  ;;  %v6071_v52 = vld [vmem:[#allocation37_spill] sm:$0xff]  ;;  %v6072_v48 = vld [vmem:[#allocation38_spill] sm:$0xff] }
 0x478   : > { %v2366_v40 = vmax.f32 %v2354_v36, 0.0  ;;  %v2367_v55 = vmax.f32 %v2355_v44, 0.0  ;;  %v2368_v4 = vmax.f32 %v2356_v33, 0.0  ;;  %v2369_v32 = vmax.f32 %v2357_v7, 0.0  ;;  %v6073_v36 = vld [vmem:[#allocation39_spill] sm:$0xff]  ;;  %v6074_v33 = vld [vmem:[#allocation40_spill] sm:$0xff] }
 0x479   : > { %v2370_v59 = vmax.f32 %v2358_v10, 0.0  ;;  %v2371_v41 = vmax.f32 %v2359_v0, 0.0  ;;  %v2372_v29 = vmax.f32 %v2360_v14, 0.0  ;;  %v2373_v62 = vmax.f32 %v2361_v20, 0.0  ;;  %v6075_v10 = vld [vmem:[#allocation35_spill] sm:$0xff]  ;;  %v6077_v20 = vld [vmem:[#allocation64_spill] sm:$0xff] }
 0x47a   : > { %v2374_v26 = vmin.f32 %v2362_v31, 1.0  ;;  %v2375_v27 = vmin.f32 %v2363_v51, 1.0  ;;  %v2376_v3 = vmin.f32 %v2364_v35, 1.0  ;;  %v2377_v47 = vmin.f32 %v2365_v45, 1.0  ;;  %v6079_v35 = vld [vmem:[#allocation17_spill] sm:$0xff] }
 0x47b   : > { %v2378_v46 = vmin.f32 %v2366_v40, 1.0  ;;  %v2379_v21 = vmin.f32 %v2367_v55, 1.0  ;;  %v2380_v60 = vmin.f32 %v2368_v4, 1.0  ;;  %v2381_v56 = vmin.f32 %v2369_v32, 1.0  ;;  %v6081_v55 = vld [vmem:[#allocation67_spill] sm:$0xff] }
 0x47c   : > { %v2382_v42 = vmin.f32 %v2370_v59, 1.0  ;;  %v2383_v61 = vmin.f32 %v2371_v41, 1.0  ;;  %v2384_v53 = vmin.f32 %v2372_v29, 1.0  ;;  %v2385_v28 = vmin.f32 %v2373_v62, 1.0  ;;  %v6083_v59 = vld [vmem:[#allocation18_spill] sm:$0xff] }
 0x47d   : > { %v5343_v24 = vmul.f32 %v2374_v26, %v5123_v18  ;;  %v5346_v43 = vmul.f32 %v2375_v27, %v5129_v2  ;;  %v5349_v17 = vmul.f32 %v2376_v3, %v5135_v38  ;;  %v5352_v30 = vmul.f32 %v2377_v47, %v5141_v23  ;;  %v6085_v62 = vld [vmem:[#allocation78_spill] sm:$0xff]  ;;  %v6087_v3 = vld [vmem:[#allocation19_spill] sm:$0xff] }
 0x47e   : > { %v5355_v22 = vmul.f32 %v2378_v46, %v5147_v5  ;;  %v5358_v63 = vmul.f32 %v2379_v21, %v5153_v8  ;;  %v5361_v16 = vmul.f32 %v2380_v60, %v5159_v11  ;;  %v5364_v18 = vmul.f32 %v2381_v56, %v5165_v1  ;;  %v6089_v21 = vld [vmem:[#allocation79_spill] sm:$0xff] }
 0x47f   : > { %v5367_v2 = vmul.f32 %v2382_v42, %v5171_v6  ;;  %v5370_v38 = vmul.f32 %v2383_v61, %v5176_v37  ;;  %v5373_v23 = vmul.f32 %v2384_v53, %v5182_v39  ;;  %v5376_v5 = vmul.f32 %v2385_v28, %v5187_v9  ;;  %v6091_v42 = vld [vmem:[#allocation20_spill] sm:$0xff] }
 0x480   : > { %v2398_v8 = vsub.f32 %v5891_v57, %v5343_v24  ;;  %v2399_v11 = vsub.f32 %v5893_v49, %v5346_v43  ;;  %v2400_v1 = vsub.f32 %v5895_v19, %v5349_v17  ;;  %v2401_v6 = vsub.f32 %v5897_v12, %v5352_v30  ;;  %v6093_v28 = vld [vmem:[#allocation80_spill] sm:$0xff] }
 0x481   : > { %v2402_v37 = vsub.f32 %v5899_v15, %v5355_v22  ;;  %v2403_v39 = vsub.f32 %v5901_v25, %v5358_v63  ;;  %v2404_v9 = vsub.f32 %v5903_v34, %v5361_v16  ;;  %v2405_v54 = vsub.f32 %v6055_v50, %v5364_v18 }
 0x482   : > { %v2406_v58 = vsub.f32 %v6071_v52, %v5367_v2  ;;  %v2407_v13 = vsub.f32 %v6072_v48, %v5370_v38  ;;  %v2408_v44 = vsub.f32 %v6073_v36, %v5373_v23  ;;  %v2409_v7 = vsub.f32 %v6074_v33, %v5376_v5 }
 0x483   : > { %v6076_v0 = vsub.f32 %v5891_v57, %v6075_v10  ;;  %v6078_v31 = vsub.f32 %v5893_v49, %v6077_v20  ;;  %v6080_v45 = vsub.f32 %v5895_v19, %v6079_v35  ;;  %v6082_v4 = vsub.f32 %v5897_v12, %v6081_v55  ;;  %v6095_v20 = vld [vmem:[#allocation27_spill] sm:$0xff] }
 0x484   : > { %v6084_v41 = vsub.f32 %v5899_v15, %v6083_v59  ;;  %v6086_v26 = vsub.f32 %v5901_v25, %v6085_v62  ;;  %v6088_v47 = vsub.f32 %v5903_v34, %v6087_v3  ;;  %v6090_v60 = vsub.f32 %v6055_v50, %v6089_v21 }
 0x485   : > { %v2564_v14 = vadd.f32 -0.5, %v6076_v0  ;;  %v2565_v51 = vadd.f32 -0.5, %v6078_v31  ;;  %v2566_v40 = vadd.f32 -0.5, %v6080_v45  ;;  %v2567_v32 = vadd.f32 -0.5, %v6082_v4  ;;  %v6097_v45 = vld [vmem:[#allocation81_spill] sm:$0xff] }
 0x486   : > { %v2568_v29 = vadd.f32 -0.5, %v6084_v41  ;;  %v2569_v27 = vadd.f32 -0.5, %v6086_v26  ;;  %v2570_v46 = vadd.f32 -0.5, %v6088_v47  ;;  %v2571_v56 = vadd.f32 -0.5, %v6090_v60 }
 0x487   : > { %v6092_v61 = vsub.f32 %v6071_v52, %v6091_v42  ;;  %v6094_v10 = vsub.f32 %v6072_v48, %v6093_v28  ;;  %v6096_v31 = vsub.f32 %v6073_v36, %v6095_v20  ;;  %v6098_v55 = vsub.f32 %v6074_v33, %v6097_v45 }
 0x488   : > { %v2422_v59 = vmul.f32 2.0, %v2564_v14  ;;  %v2423_v41 = vmul.f32 2.0, %v2565_v51  ;;  %v2424_v62 = vmul.f32 2.0, %v2566_v40  ;;  %v2425_v26 = vmul.f32 2.0, %v2567_v32  ;;  %v6099_v14 = vld [vmem:[#allocation28_spill] sm:$0xff]  ;;  %v6101_v32 = vld [vmem:[#allocation53_spill] sm:$0xff] }
 0x489   : > { %v2572_v53 = vadd.f32 -0.5, %v6092_v61  ;;  %v2573_v0 = vadd.f32 -0.5, %v6094_v10  ;;  %v2574_v35 = vadd.f32 -0.5, %v6096_v31  ;;  %v2575_v4 = vadd.f32 -0.5, %v6098_v55 }
 0x48a   : > { %v2426_v3 = vmul.f32 2.0, %v2568_v29  ;;  %v2427_v47 = vmul.f32 2.0, %v2569_v27  ;;  %v2428_v21 = vmul.f32 2.0, %v2570_v46  ;;  %v2429_v60 = vmul.f32 2.0, %v2571_v56  ;;  %2484 = vst [vmem:[%s5441_s30] sm:$0xff] %v2422_v59  ;;  %2485 = vst [vmem:[%s5441_s30 + $0x8] sm:$0xff] %v2423_v41  ;;  %v6103_v46 = vld [vmem:[#allocation59_spill] sm:$0xff] }
 0x48b   : > { %v2430_v42 = vmul.f32 2.0, %v2572_v53  ;;  %v2431_v61 = vmul.f32 2.0, %v2573_v0  ;;  %v2432_v28 = vmul.f32 2.0, %v2574_v35  ;;  %v2433_v10 = vmul.f32 2.0, %v2575_v4  ;;  %2486 = vst [vmem:[%s5441_s30 + $0x10] sm:$0xff] %v2424_v62  ;;  %2487 = vst [vmem:[%s5441_s30 + $0x18] sm:$0xff] %v2425_v26 }
 0x48c   : > { %v6100_v51 = vsub.f32 %v5891_v57, %v6099_v14  ;;  %v6102_v29 = vsub.f32 %v5893_v49, %v6101_v32  ;;  %v6104_v56 = vsub.f32 %v5895_v19, %v6103_v46  ;;  %v6105_v0 = vld [vmem:[#allocation55_spill] sm:$0xff]  ;;  %2488 = vst [vmem:[%s5441_s30 + $0x20] sm:$0xff] %v2426_v3  ;;  %2489 = vst [vmem:[%s5441_s30 + $0x28] sm:$0xff] %v2427_v47  ;;  %v6107_v35 = vld [vmem:[#allocation61_spill] sm:$0xff]  ;;  %v2592_v57 = vadd.f32 -0.5, %v2402_v37 }
 0x48d   : > { %v6106_v20 = vsub.f32 %v5897_v12, %v6105_v0  ;;  %2490 = vst [vmem:[%s5441_s30 + $0x30] sm:$0xff] %v2428_v21  ;;  %2491 = vst [vmem:[%s5441_s30 + $0x38] sm:$0xff] %v2429_v60  ;;  %v6108_v45 = vsub.f32 %v5899_v15, %v6107_v35  ;;  %v6109_v4 = vld [vmem:[#allocation56_spill] sm:$0xff]  ;;  %v6111_v62 = vld [vmem:[#allocation63_spill] sm:$0xff]  ;;  %v2593_v49 = vadd.f32 -0.5, %v2403_v39  ;;  %v2594_v19 = vadd.f32 -0.5, %v2404_v9 }
 0x48e   : > { %v2576_v40 = vadd.f32 -0.5, %v6100_v51  ;;  %v2577_v27 = vadd.f32 -0.5, %v6102_v29  ;;  %v2578_v53 = vadd.f32 -0.5, %v6104_v56  ;;  %v6110_v59 = vsub.f32 %v5901_v25, %v6109_v4  ;;  %v6113_v51 = vld [vmem:[#allocation57_spill] sm:$0xff]  ;;  %2492 = vst [vmem:[%s5441_s30 + $0x40] sm:$0xff] %v2430_v42  ;;  %2493 = vst [vmem:[%s5441_s30 + $0x48] sm:$0xff] %v2431_v61 }
 0x48f   : > { %v2579_v31 = vadd.f32 -0.5, %v6106_v20  ;;  %v2580_v55 = vadd.f32 -0.5, %v6108_v45  ;;  %v6112_v26 = vsub.f32 %v5903_v34, %v6111_v62  ;;  %v6114_v32 = vsub.f32 %v6055_v50, %v6113_v51  ;;  %2494 = vst [vmem:[%s5441_s30 + $0x50] sm:$0xff] %v2432_v28  ;;  %2495 = vst [vmem:[%s5441_s30 + $0x58] sm:$0xff] %v2433_v10  ;;  %v6115_v3 = vld [vmem:[#allocation66_spill] sm:$0xff]  ;;  %v6119_v0 = vld [vmem:[#allocation69_spill] sm:$0xff] }
 0x490   : > { %v2581_v41 = vadd.f32 -0.5, %v6110_v59  ;;  %v6116_v47 = vsub.f32 %v6071_v52, %v6115_v3  ;;  %v6117_v60 = vld [vmem:[#allocation58_spill] sm:$0xff]  ;;  %v6120_v20 = vsub.f32 %v6073_v36, %v6119_v0  ;;  %v6121_v45 = vld [vmem:[#allocation21_spill] sm:$0xff]  ;;  %v2446_v28 = vmul.f32 2.0, %v2576_v40 }
 0x491   : > { %v2582_v14 = vadd.f32 -0.5, %v6112_v26  ;;  %v2583_v29 = vadd.f32 -0.5, %v6114_v32  ;;  %v6118_v46 = vsub.f32 %v6072_v48, %v6117_v60  ;;  %v6122_v42 = vsub.f32 %v6074_v33, %v6121_v45 }
 0x492   : > { %v2584_v21 = vadd.f32 -0.5, %v6116_v47  ;;  %v2586_v35 = vadd.f32 -0.5, %v6120_v20  ;;  %v2447_v10 = vmul.f32 2.0, %v2577_v27  ;;  %v2448_v4 = vmul.f32 2.0, %v2578_v53  ;;  %2496 = vst [vmem:[%s5441_s30 + $0x60] sm:$0xff] %v2446_v28 }
 0x493   : > { %v2585_v56 = vadd.f32 -0.5, %v6118_v46  ;;  %v2587_v61 = vadd.f32 -0.5, %v6122_v42  ;;  %v2449_v59 = vmul.f32 2.0, %v2579_v31  ;;  %v2450_v62 = vmul.f32 2.0, %v2580_v55 }
 0x494   : > { %v2451_v26 = vmul.f32 2.0, %v2581_v41  ;;  %v2452_v51 = vmul.f32 2.0, %v2582_v14  ;;  %v2453_v32 = vmul.f32 2.0, %v2583_v29  ;;  %v2454_v3 = vmul.f32 2.0, %v2584_v21  ;;  %2497 = vst [vmem:[%s5441_s30 + $0x68] sm:$0xff] %v2447_v10  ;;  %2498 = vst [vmem:[%s5441_s30 + $0x70] sm:$0xff] %v2448_v4 }
 0x495   : > { %v2455_v47 = vmul.f32 2.0, %v2585_v56  ;;  %v2456_v60 = vmul.f32 2.0, %v2586_v35  ;;  %v2457_v46 = vmul.f32 2.0, %v2587_v61  ;;  %2499 = vst [vmem:[%s5441_s30 + $0x78] sm:$0xff] %v2449_v59  ;;  %v2588_v40 = vadd.f32 -0.5, %v2398_v8  ;;  %2500 = vst [vmem:[%s5441_s30 + $0x80] sm:$0xff] %v2450_v62 }
 0x496   : > { %v2589_v27 = vadd.f32 -0.5, %v2399_v11  ;;  %v2590_v53 = vadd.f32 -0.5, %v2400_v1  ;;  %v2591_v31 = vadd.f32 -0.5, %v2401_v6  ;;  %2501 = vst [vmem:[%s5441_s30 + $0x88] sm:$0xff] %v2451_v26  ;;  %2502 = vst [vmem:[%s5441_s30 + $0x90] sm:$0xff] %v2452_v51  ;;  %v2595_v12 = vadd.f32 -0.5, %v2405_v54 }
 0x497   : > { %2503 = vst [vmem:[%s5441_s30 + $0x98] sm:$0xff] %v2453_v32  ;;  %2504 = vst [vmem:[%s5441_s30 + $0xa0] sm:$0xff] %v2454_v3  ;;  %v2596_v15 = vadd.f32 -0.5, %v2406_v58  ;;  %v2597_v25 = vadd.f32 -0.5, %v2407_v13  ;;  %v2598_v34 = vadd.f32 -0.5, %v2408_v44  ;;  %v2599_v50 = vadd.f32 -0.5, %v2409_v7 }
 0x498   : > { %2505 = vst [vmem:[%s5441_s30 + $0xa8] sm:$0xff] %v2455_v47  ;;  %2506 = vst [vmem:[%s5441_s30 + $0xb0] sm:$0xff] %v2456_v60  ;;  %v2470_v24 = vmul.f32 2.0, %v2588_v40  ;;  %v2471_v43 = vmul.f32 2.0, %v2589_v27  ;;  %v2472_v17 = vmul.f32 2.0, %v2590_v53  ;;  %v2473_v30 = vmul.f32 2.0, %v2591_v31 }
 0x499   : > { %2507 = vst [vmem:[%s5441_s30 + $0xb8] sm:$0xff] %v2457_v46  ;;  %v2474_v22 = vmul.f32 2.0, %v2592_v57  ;;  %v2475_v63 = vmul.f32 2.0, %v2593_v49  ;;  %v2476_v16 = vmul.f32 2.0, %v2594_v19  ;;  %v2477_v18 = vmul.f32 2.0, %v2595_v12  ;;  %41 = sbr.rel (!%p39_p11) target bundleno = 32 (0x20), region = 45 }
 0x49a   : > { %v2478_v2 = vmul.f32 2.0, %v2596_v15  ;;  %v2479_v38 = vmul.f32 2.0, %v2597_v25  ;;  %v2480_v23 = vmul.f32 2.0, %v2598_v34  ;;  %v2481_v5 = vmul.f32 2.0, %v2599_v50  ;;  %2508 = vst [vmem:[%s5441_s30 + $0xc0] sm:$0xff] %v2470_v24  ;;  %2509 = vst [vmem:[%s5441_s30 + $0xc8] sm:$0xff] %v2471_v43 }
 0x49b   : > { %2510 = vst [vmem:[%s5441_s30 + $0xd0] sm:$0xff] %v2472_v17  ;;  %2511 = vst [vmem:[%s5441_s30 + $0xd8] sm:$0xff] %v2473_v30 }
 0x49c   : > { %2512 = vst [vmem:[%s5441_s30 + $0xe0] sm:$0xff] %v2474_v22  ;;  %2513 = vst [vmem:[%s5441_s30 + $0xe8] sm:$0xff] %v2475_v63 }
 0x49d   : > { %2514 = vst [vmem:[%s5441_s30 + $0xf0] sm:$0xff] %v2476_v16  ;;  %2515 = vst [vmem:[%s5441_s30 + $0xf8] sm:$0xff] %v2477_v18 }
 0x49e   : > { %2516 = vst [vmem:[%s5441_s30 + $0x100] sm:$0xff] %v2478_v2  ;;  %2517 = vst [vmem:[%s5441_s30 + $0x108] sm:$0xff] %v2479_v38 }
 0x49f   : > { %2518 = vst [vmem:[%s5441_s30 + $0x110] sm:$0xff] %v2480_v23  ;;  %2519 = vst [vmem:[%s5441_s30 + $0x118] sm:$0xff] %v2481_v5 }
 0x4a0   :  { %3252 = shalt.err (!%p3249_p2)
}
 0x4a1   :  { %s3253_s8 = scalar_lea.hbm %s5571_s2, 9216 }
 0x4a2   :  { %p3254_p3 = scmp.ne.s32.totalorder %s5571_s2, %s3253_s8  ;;  %p3257_p4 = scmp.lt.u32.totalorder %s3253_s8, %s5571_s2 }
 0x4a4   :  { %p3259_p5 = pnand %p3257_p4, %p3254_p3 }
 0x4a6   :  { %3262 = shalt.err (!%p3259_p5)
}
 0x4a7   :  { %2531 = dma.vmem_to_hbm [thread:$0]  %s2526_s5, 9216, %s5571_s2, [#allocation4], %s3279_s0, %s3279_s0, %s3280_s29  }
 0x4a8   :  { %3271 = dma.done.wait [#allocation4], 9216  }
 0x4a9   :  { %3272 = vsyncadd [#allocation4], 4294958080 }
 0x4aa   :  { %2535 = vsyncpa [#allocation3], 1 }
 0x4ab   :  { %2536 = vsyncpa [#allocation4], 1 }
 0x4ac   :  { %2537 = vsyncpa [#allocation5], 1 }

</bundles_post_ra>
